<compile_context>
chip_gen: v6e
topology: v6e:2x2x1
jax: 0.10.0
libtpu: 0.0.40
codegen_flags: <defaults>
</compile_context>

<pallas_src>
import functools
import math

import jax
import jax.numpy as jnp
import numpy as np
from jax.experimental import pallas as pl
from jax.experimental.pallas import tpu as pltpu

_EPS = 1e-5
REDUCTION = 16
LAYERS_CFG = [1, 1, 1, 1]          # `layers` argument of ResNet(block, layers)
PLANES_CFG = [16, 32, 64, 128]
STEM_IN = 6
STEM_OUT = 16
LANES = 128                        # every channel axis is zero-padded to 128 lanes


# ----------------------------------------------------------------------------
# Trace-time constant builders (hoisted out of the kernel)
# ----------------------------------------------------------------------------
def _tap_matrix(l_in, l_out, stride, offset, s):
    """Block-diagonal (s*l_out, s*l_in) 0/1 tap-selection matrix (zero pad for free)."""
    m = np.zeros((s * l_out, s * l_in), np.float32)
    for b in range(s):
        for l in range(l_out):
            src = stride * l + offset
            if 0 <= src < l_in:
                m[b * l_out + l, b * l_in + src] = 1.0
    return m


def _pool_matrix(l, s):
    """(s, s*l) per-sample mean-pool matrix (1/l is exact in bf16: l is a power of 2)."""
    m = np.zeros((s, s * l), np.float32)
    for b in range(s):
        m[b, b * l:(b + 1) * l] = 1.0 / l
    return m


def _bcast_matrix(l, s):
    """(s*l, s) 0/1 matrix broadcasting a per-sample row back over that sample's rows."""
    m = np.zeros((s * l, s), np.float32)
    for b in range(s):
        m[b * l:(b + 1) * l, b] = 1.0
    return m


class _SlabPacker:
    """Packs small 2-D matrices into one (rows, 128) slab.

    Each entry starts on an 8-row (sublane) boundary and is lane-padded to 128; the
    returned (row0, rows, cols) entry lets the kernel slice the exact block back out
    with a static slice.
    """

    def __init__(self, dtype):
        self.dtype = dtype
        self._blocks = []
        self._row = 0

    def add(self, mat):
        mat = jnp.asarray(mat, dtype=jnp.float32)
        r, c = mat.shape
        assert c <= LANES
        pad_r = (-r) % 8
        self._blocks.append(jnp.pad(mat, ((0, pad_r), (0, LANES - c))))
        entry = (self._row, r, c)
        self._row += r + pad_r
        return entry

    def finalize(self):
        return jnp.concatenate(self._blocks, axis=0).astype(self.dtype)


def _fold_conv(w, bn, packer, shifts, tap_cache, *, l_in, stride, s):
    """Fold BN into a conv's weights; emit per-tap (128,128) bf16 weight blocks."""
    c_out, c_in, k = w.shape
    pad = 1 if k == 3 else 0
    l_out = (l_in + 2 * pad - k) // stride + 1

    inv = bn['gamma'] * jax.lax.rsqrt(bn['var'] + _EPS)
    w_scaled = w * inv[:, None, None]                                  # (c_out,c_in,k)
    shift = jnp.zeros((LANES,), jnp.float32).at[:c_out].set(bn['beta'] - bn['mean'] * inv)
    shift_idx = len(shifts)
    shifts.append(shift)

    tap_entries, w_entries = [], []
    macs = 0
    for kk in range(k):
        off = kk - pad
        key = (l_in, l_out, stride, off)
        if key not in tap_cache:
            tap_cache[key] = packer.add(_tap_matrix(l_in, l_out, stride, off, s))
        tap_entries.append(tap_cache[key])
        wk = jnp.zeros((LANES, LANES), jnp.float32)
        wk = wk.at[:c_in, :c_out].set(jnp.transpose(w_scaled[:, :, kk]))
        w_entries.append(packer.add(wk))
        macs += s * l_out * (s * l_in) * LANES + s * l_out * LANES * LANES

    rec = dict(taps=tuple(tap_entries), ws=tuple(w_entries), shift=shift_idx)
    return rec, l_out, macs


def _pad_fc(w):
    """Torch Linear weight (out,in) -> (128,128) in->out matmul layout, zero padded."""
    out_c, in_c = w.shape
    return jnp.zeros((LANES, LANES), jnp.float32).at[:in_c, :out_c].set(jnp.transpose(w))


def _pick_samples_per_step(n):
    """v7x (2 TensorCores/chip): 1 sample/step so 'parallel' spans both cores.
    Single-TC chips (v5e/v6e/older): fold the whole batch into one grid step."""
    kind = ""
    try:
        kind = jax.devices()[0].device_kind.lower()
    except Exception:
        pass
    s = 1 if ("v7" in kind or "7x" in kind) else n
    while s > 1 and n % s:
        s -= 1
    return max(1, s)


# ----------------------------------------------------------------------------
# The single fused kernel
# ----------------------------------------------------------------------------
def _fused_resnet_kernel(x_ref, w_ref, s_ref, o_ref, *, prog):
    f32, bf16 = jnp.float32, jnp.bfloat16

    def slab(e):                       # static slice of the bf16 constant/weight slab
        r0, r, c = e
        return w_ref[r0:r0 + r, 0:c]

    def shift_row(i):                  # (1,128) f32 folded-BN shift
        return s_ref[i:i + 1, :]

    def conv_bn(a, rec, relu):
        """sum_k (G_k @ a) @ W_k + shift  on a (s*L, 128) bf16 tile -> f32."""
        acc = None
        for te, we in zip(rec['taps'], rec['ws']):
            sel = jnp.dot(slab(te), a, preferred_element_type=f32).astype(bf16)
            part = jnp.dot(sel, slab(we), preferred_element_type=f32)
            acc = part if acc is None else acc + part
        y = acc + shift_row(rec['shift'])
        if relu:
            y = jnp.maximum(y, 0.0)
        return y

    a = x_ref[...]                                               # (s*L, 128) bf16

    # stem: conv(6->16, k3, s2, p1) + bn + relu
    a = conv_bn(a, prog['stem'], relu=True).astype(bf16)

    # layer1..layer4 (SE basic blocks)
    for blk in prog['blocks']:
        out = conv_bn(a, blk['conv1'], relu=True).astype(bf16)
        out = conv_bn(out, blk['conv2'], relu=False)             # f32 (s*L', 128)
        if blk['ds'] is not None:
            res = conv_bn(a, blk['ds'], relu=False)
        else:
            res = a.astype(f32)
        # Squeeze-and-Excite: per-sample pool, two FCs, sigmoid gate (all via MXU).
        out_b = out.astype(bf16)
        pooled = jnp.dot(slab(blk['pool']), out_b, preferred_element_type=f32)
        h = jnp.maximum(jnp.dot(pooled.astype(bf16), slab(blk['fc1']),
                                preferred_element_type=f32), 0.0)
        gate = jax.nn.sigmoid(jnp.dot(h.astype(bf16), slab(blk['fc2']),
                                      preferred_element_type=f32))
        gate_b = jnp.dot(slab(blk['bcast']), gate.astype(bf16),
                         preferred_element_type=f32)
        a = jnp.maximum(out * gate_b + res, 0.0).astype(bf16)

    # AdaptiveAvgPool1d(1): per-sample mean -> (s, 128), lane-dense store
    o_ref[...] = jnp.dot(slab(prog['final_pool']), a,
                         preferred_element_type=f32).astype(o_ref.dtype)


# ----------------------------------------------------------------------------
# Wrapper: trace-time weight folding / packing + single pallas_call
# ----------------------------------------------------------------------------
def resnet_forward(params, x):
    """x: (N, 6, L) -> (N, 128). Whole forward in one fused pallas_call."""
    n, c_in, l0 = x.shape
    s = _pick_samples_per_step(n)
    steps = n // s

    # activations: (L, C) layout with C zero-padded to 128 lanes, bf16,
    # batch folded sample-major into each grid step's tile.
    xt = jnp.transpose(x, (0, 2, 1))                             # (N, L, C)
    xt = jnp.pad(xt, ((0, 0), (0, 0), (0, LANES - c_in))).astype(jnp.bfloat16)
    xt = xt.reshape(steps, s * l0, LANES)

    packer = _SlabPacker(jnp.bfloat16)
    shifts = []
    tap_cache = {}
    macs = 0

    stem_rec, l, m0 = _fold_conv(params['conv1_w'], params['bn1'], packer, shifts,
                                 tap_cache, l_in=l0, stride=2, s=s)
    macs += m0

    block_recs = []
    for blocks in params['layers']:
        for bi, blk in enumerate(blocks):
            stride = 2 if bi == 0 else 1
            rec1, l_out, m1 = _fold_conv(blk['conv1_w'], blk['bn1'], packer, shifts,
                                         tap_cache, l_in=l, stride=stride, s=s)
            rec2, _, m2 = _fold_conv(blk['conv2_w'], blk['bn2'], packer, shifts,
                                     tap_cache, l_in=l_out, stride=1, s=s)
            macs += m1 + m2
            if blk['ds_w'] is not None:
                recd, _, md = _fold_conv(blk['ds_w'], blk['ds_bn'], packer, shifts,
                                         tap_cache, l_in=l, stride=stride, s=s)
                macs += md
            else:
                recd = None
            fc1 = packer.add(_pad_fc(blk['fc1_w']))
            fc2 = packer.add(_pad_fc(blk['fc2_w']))
            pool = packer.add(_pool_matrix(l_out, s))
            bcast = packer.add(_bcast_matrix(l_out, s))
            macs += 2 * s * LANES * LANES + 2 * s * l_out * (s * l_out) * LANES
            block_recs.append(dict(conv1=rec1, conv2=rec2, ds=recd,
                                   fc1=fc1, fc2=fc2, pool=pool, bcast=bcast))
            l = l_out

    final_pool = packer.add(_pool_matrix(l, s))
    macs += s * (s * l) * LANES

    w_slab = packer.finalize()                                   # bf16 (rows, 128)
    shift_arr = jnp.stack(shifts, axis=0)                        # f32 (n_conv, 128)
    shift_arr = jnp.pad(shift_arr, (((-shift_arr.shape[0]) % 8, 0)[::-1], (0, 0)))

    prog = dict(stem=stem_rec, blocks=tuple(block_recs), final_pool=final_pool)
    c_final = PLANES_CFG[-1]

    cost = pl.CostEstimate(
        flops=int(2 * macs * steps),
        transcendentals=int(len(block_recs) * s * LANES * steps),
        bytes_accessed=int(xt.size * 2 + w_slab.size * 2 + shift_arr.size * 4
                           + steps * s * c_final * 4),
    )

    out = pl.pallas_call(
        functools.partial(_fused_resnet_kernel, prog=prog),
        out_shape=jax.ShapeDtypeStruct((steps, s, c_final), jnp.float32),
        grid=(steps,),
        in_specs=[
            pl.BlockSpec((None, s * l0, LANES), lambda i: (i, 0, 0)),
            pl.BlockSpec(w_slab.shape, lambda i: (0, 0)),
            pl.BlockSpec(shift_arr.shape, lambda i: (0, 0)),
        ],
        out_specs=pl.BlockSpec((None, s, c_final), lambda i: (i, 0, 0)),
        compiler_params=pltpu.CompilerParams(dimension_semantics=("parallel",)),
        cost_estimate=cost,
    )(xt, w_slab, shift_arr)
    return out.reshape(n, c_final)


# ----------------------------------------------------------------------------
# Parameter construction (deterministic, mirrors the PyTorch __init__)
# ----------------------------------------------------------------------------
def _make_bn(c):
    return dict(gamma=jnp.ones((c,), jnp.float32),
                beta=jnp.zeros((c,), jnp.float32),
                mean=jnp.zeros((c,), jnp.float32),
                var=jnp.ones((c,), jnp.float32))


def _kaiming_conv(key, c_out, c_in, k):
    fan_out = c_out * k                       # kaiming_normal_, mode='fan_out', relu
    std = math.sqrt(2.0 / fan_out)
    return std * jax.random.normal(key, (c_out, c_in, k), jnp.float32)


def _linear_w(key, c_out, c_in):
    bound = 1.0 / math.sqrt(c_in)             # ~ PyTorch default Linear init range
    return jax.random.uniform(key, (c_out, c_in), jnp.float32, -bound, bound)


def init_params(key):
    keys = iter(jax.random.split(key, 256))
    p = {'conv1_w': _kaiming_conv(next(keys), STEM_OUT, STEM_IN, 3),
         'bn1': _make_bn(STEM_OUT), 'layers': []}
    in_planes = STEM_OUT
    for planes, nblocks in zip(PLANES_CFG, LAYERS_CFG):
        blocks = []
        for bi in range(nblocks):
            stride = 2 if bi == 0 else 1
            c_mid = max(planes // REDUCTION, 1)
            blk = {
                'conv1_w': _kaiming_conv(next(keys), planes, in_planes, 3),
                'bn1': _make_bn(planes),
                'conv2_w': _kaiming_conv(next(keys), planes, planes, 3),
                'bn2': _make_bn(planes),
                'fc1_w': _linear_w(next(keys), c_mid, planes),
                'fc2_w': _linear_w(next(keys), planes, c_mid),
            }
            if stride != 1 or in_planes != planes:
                blk['ds_w'] = _kaiming_conv(next(keys), planes, in_planes, 1)
                blk['ds_bn'] = _make_bn(planes)
            else:
                blk['ds_w'] = None
                blk['ds_bn'] = None
            blocks.append(blk)
            in_planes = planes
        p['layers'].append(blocks)
    return p


if __name__ == "__main__":
    key = jax.random.PRNGKey(0)
    pkey, xkey = jax.random.split(key)
    params = init_params(pkey)

    # input: (N=2, C=6, L=64) -- L=64 survives the 5 stride-2 stages (64->32->16->8->4->2)
    x = jax.random.normal(xkey, (2, 6, 64), jnp.float32)

    fwd = jax.jit(resnet_forward)
    y = jax.block_until_ready(fwd(params, x))

    assert y.shape == (2, 128), y.shape
    assert bool(jnp.all(jnp.isfinite(y)))
    print("KERNEL_OK")
</pallas_src>

<mosaic_0001>
module attributes {stable_mosaic.version = 11 : i64} {
  func.func @_fused_resnet_kernel(%arg0: i32, %arg1: memref<1x128x128xbf16, #tpu.memory_space<vmem>>, %arg2: memref<5672x128xbf16, #tpu.memory_space<vmem>>, %arg3: memref<16x128xf32, #tpu.memory_space<vmem>>, %arg4: memref<1x2x128xf32, #tpu.memory_space<vmem>>) attributes {dimension_semantics = [#tpu.dimension_semantics<parallel>], iteration_bounds = array<i64: 1>, scalar_prefetch = 0 : i64, scratch_operands = 0 : i64, tpu.core_type = #tpu.core_type<tc>, window_params = [{transform_indices = @transform_0, window_bounds = array<i64: 1, 128, 128>}, {pipeline_mode = #tpu.pipeline_mode<synchronous>, transform_indices = @transform_1, window_bounds = array<i64: 5672, 128>}, {pipeline_mode = #tpu.pipeline_mode<synchronous>, transform_indices = @transform_2, window_bounds = array<i64: 16, 128>}, {transform_indices = @transform_3, window_bounds = array<i64: 1, 2, 128>}]} {
    %c0 = arith.constant 0 : index
    %c0_0 = arith.constant 0 : index
    %c0_1 = arith.constant 0 : index
    %0 = vector.load %arg1[%c0, %c0_0, %c0_1] : memref<1x128x128xbf16, #tpu.memory_space<vmem>>, vector<1x128x128xbf16>
    %1 = vector.shape_cast %0 : vector<1x128x128xbf16> to vector<128x128xbf16>
    %c0_2 = arith.constant 0 : index
    %c0_3 = arith.constant 0 : index
    %2 = vector.load %arg2[%c0_2, %c0_3] : memref<5672x128xbf16, #tpu.memory_space<vmem>>, vector<64x128xbf16>
    %cst = arith.constant dense<0.000000e+00> : vector<64x128xf32>
    %3 = tpu.matmul %2, %1, %cst {dimension_numbers = #tpu.dot_dimension_numbers<[1], [0], [0], [1], [0, 0, 1, 1], [], []>} : vector<64x128xbf16>, vector<128x128xbf16>, vector<64x128xf32> -> vector<64x128xf32>
    %4 = arith.truncf %3 : vector<64x128xf32> to vector<64x128xbf16>
    %c64 = arith.constant 64 : index
    %c0_4 = arith.constant 0 : index
    %5 = vector.load %arg2[%c64, %c0_4] : memref<5672x128xbf16, #tpu.memory_space<vmem>>, vector<128x128xbf16>
    %cst_5 = arith.constant dense<0.000000e+00> : vector<64x128xf32>
    %6 = tpu.matmul %4, %5, %cst_5 {dimension_numbers = #tpu.dot_dimension_numbers<[1], [0], [0], [1], [0, 0, 1, 1], [], []>} : vector<64x128xbf16>, vector<128x128xbf16>, vector<64x128xf32> -> vector<64x128xf32>
    %c192 = arith.constant 192 : index
    %c0_6 = arith.constant 0 : index
    %7 = vector.load %arg2[%c192, %c0_6] : memref<5672x128xbf16, #tpu.memory_space<vmem>>, vector<64x128xbf16>
    %cst_7 = arith.constant dense<0.000000e+00> : vector<64x128xf32>
    %8 = tpu.matmul %7, %1, %cst_7 {dimension_numbers = #tpu.dot_dimension_numbers<[1], [0], [0], [1], [0, 0, 1, 1], [], []>} : vector<64x128xbf16>, vector<128x128xbf16>, vector<64x128xf32> -> vector<64x128xf32>
    %9 = arith.truncf %8 : vector<64x128xf32> to vector<64x128xbf16>
    %c256 = arith.constant 256 : index
    %c0_8 = arith.constant 0 : index
    %10 = vector.load %arg2[%c256, %c0_8] : memref<5672x128xbf16, #tpu.memory_space<vmem>>, vector<128x128xbf16>
    %cst_9 = arith.constant dense<0.000000e+00> : vector<64x128xf32>
    %11 = tpu.matmul %9, %10, %cst_9 {dimension_numbers = #tpu.dot_dimension_numbers<[1], [0], [0], [1], [0, 0, 1, 1], [], []>} : vector<64x128xbf16>, vector<128x128xbf16>, vector<64x128xf32> -> vector<64x128xf32>
    %12 = arith.addf %6, %11 : vector<64x128xf32>
    %c384 = arith.constant 384 : index
    %c0_10 = arith.constant 0 : index
    %13 = vector.load %arg2[%c384, %c0_10] : memref<5672x128xbf16, #tpu.memory_space<vmem>>, vector<64x128xbf16>
    %cst_11 = arith.constant dense<0.000000e+00> : vector<64x128xf32>
    %14 = tpu.matmul %13, %1, %cst_11 {dimension_numbers = #tpu.dot_dimension_numbers<[1], [0], [0], [1], [0, 0, 1, 1], [], []>} : vector<64x128xbf16>, vector<128x128xbf16>, vector<64x128xf32> -> vector<64x128xf32>
    %15 = arith.truncf %14 : vector<64x128xf32> to vector<64x128xbf16>
    %c448 = arith.constant 448 : index
    %c0_12 = arith.constant 0 : index
    %16 = vector.load %arg2[%c448, %c0_12] : memref<5672x128xbf16, #tpu.memory_space<vmem>>, vector<128x128xbf16>
    %cst_13 = arith.constant dense<0.000000e+00> : vector<64x128xf32>
    %17 = tpu.matmul %15, %16, %cst_13 {dimension_numbers = #tpu.dot_dimension_numbers<[1], [0], [0], [1], [0, 0, 1, 1], [], []>} : vector<64x128xbf16>, vector<128x128xbf16>, vector<64x128xf32> -> vector<64x128xf32>
    %18 = arith.addf %12, %17 : vector<64x128xf32>
    %c0_14 = arith.constant 0 : index
    %c0_15 = arith.constant 0 : index
    %19 = vector.load %arg3[%c0_14, %c0_15] : memref<16x128xf32, #tpu.memory_space<vmem>>, vector<1x128xf32>
    %20 = vector.broadcast %19 : vector<1x128xf32> to vector<64x128xf32>
    %21 = arith.addf %18, %20 : vector<64x128xf32>
    %cst_16 = arith.constant 0.000000e+00 : f32
    %22 = vector.broadcast %cst_16 : f32 to vector<64x128xf32>
    %23 = arith.maximumf %21, %22 : vector<64x128xf32>
    %24 = arith.truncf %23 : vector<64x128xf32> to vector<64x128xbf16>
    %c576 = arith.constant 576 : index
    %c0_17 = arith.constant 0 : index
    %25 = vector.load %arg2[%c576, %c0_17] : memref<5672x128xbf16, #tpu.memory_space<vmem>>, vector<32x64xbf16>
    %cst_18 = arith.constant dense<0.000000e+00> : vector<32x128xf32>
    %26 = tpu.matmul %25, %24, %cst_18 {dimension_numbers = #tpu.dot_dimension_numbers<[1], [0], [0], [1], [0, 0, 1, 1], [], []>} : vector<32x64xbf16>, vector<64x128xbf16>, vector<32x128xf32> -> vector<32x128xf32>
    %27 = arith.truncf %26 : vector<32x128xf32> to vector<32x128xbf16>
    %c608 = arith.constant 608 : index
    %c0_19 = arith.constant 0 : index
    %28 = vector.load %arg2[%c608, %c0_19] : memref<5672x128xbf16, #tpu.memory_space<vmem>>, vector<128x128xbf16>
    %cst_20 = arith.constant dense<0.000000e+00> : vector<32x128xf32>
    %29 = tpu.matmul %27, %28, %cst_20 {dimension_numbers = #tpu.dot_dimension_numbers<[1], [0], [0], [1], [0, 0, 1, 1], [], []>} : vector<32x128xbf16>, vector<128x128xbf16>, vector<32x128xf32> -> vector<32x128xf32>
    %c736 = arith.constant 736 : index
    %c0_21 = arith.constant 0 : index
    %30 = vector.load %arg2[%c736, %c0_21] : memref<5672x128xbf16, #tpu.memory_space<vmem>>, vector<32x64xbf16>
    %cst_22 = arith.constant dense<0.000000e+00> : vector<32x128xf32>
    %31 = tpu.matmul %30, %24, %cst_22 {dimension_numbers = #tpu.dot_dimension_numbers<[1], [0], [0], [1], [0, 0, 1, 1], [], []>} : vector<32x64xbf16>, vector<64x128xbf16>, vector<32x128xf32> -> vector<32x128xf32>
    %32 = arith.truncf %31 : vector<32x128xf32> to vector<32x128xbf16>
    %c768 = arith.constant 768 : index
    %c0_23 = arith.constant 0 : index
    %33 = vector.load %arg2[%c768, %c0_23] : memref<5672x128xbf16, #tpu.memory_space<vmem>>, vector<128x128xbf16>
    %cst_24 = arith.constant dense<0.000000e+00> : vector<32x128xf32>
    %34 = tpu.matmul %32, %33, %cst_24 {dimension_numbers = #tpu.dot_dimension_numbers<[1], [0], [0], [1], [0, 0, 1, 1], [], []>} : vector<32x128xbf16>, vector<128x128xbf16>, vector<32x128xf32> -> vector<32x128xf32>
    %35 = arith.addf %29, %34 : vector<32x128xf32>
    %c896 = arith.constant 896 : index
    %c0_25 = arith.constant 0 : index
    %36 = vector.load %arg2[%c896, %c0_25] : memref<5672x128xbf16, #tpu.memory_space<vmem>>, vector<32x64xbf16>
    %cst_26 = arith.constant dense<0.000000e+00> : vector<32x128xf32>
    %37 = tpu.matmul %36, %24, %cst_26 {dimension_numbers = #tpu.dot_dimension_numbers<[1], [0], [0], [1], [0, 0, 1, 1], [], []>} : vector<32x64xbf16>, vector<64x128xbf16>, vector<32x128xf32> -> vector<32x128xf32>
    %38 = arith.truncf %37 : vector<32x128xf32> to vector<32x128xbf16>
    %c928 = arith.constant 928 : index
    %c0_27 = arith.constant 0 : index
    %39 = vector.load %arg2[%c928, %c0_27] : memref<5672x128xbf16, #tpu.memory_space<vmem>>, vector<128x128xbf16>
    %cst_28 = arith.constant dense<0.000000e+00> : vector<32x128xf32>
    %40 = tpu.matmul %38, %39, %cst_28 {dimension_numbers = #tpu.dot_dimension_numbers<[1], [0], [0], [1], [0, 0, 1, 1], [], []>} : vector<32x128xbf16>, vector<128x128xbf16>, vector<32x128xf32> -> vector<32x128xf32>
    %41 = arith.addf %35, %40 : vector<32x128xf32>
    %c1 = arith.constant 1 : index
    %c0_29 = arith.constant 0 : index
    %42 = vector.load %arg3[%c1, %c0_29] : memref<16x128xf32, #tpu.memory_space<vmem>>, vector<1x128xf32>
    %43 = vector.broadcast %42 : vector<1x128xf32> to vector<32x128xf32>
    %44 = arith.addf %41, %43 : vector<32x128xf32>
    %cst_30 = arith.constant 0.000000e+00 : f32
    %45 = vector.broadcast %cst_30 : f32 to vector<32x128xf32>
    %46 = arith.maximumf %44, %45 : vector<32x128xf32>
    %47 = arith.truncf %46 : vector<32x128xf32> to vector<32x128xbf16>
    %c1056 = arith.constant 1056 : index
    %c0_31 = arith.constant 0 : index
    %48 = vector.load %arg2[%c1056, %c0_31] : memref<5672x128xbf16, #tpu.memory_space<vmem>>, vector<32x32xbf16>
    %cst_32 = arith.constant dense<0.000000e+00> : vector<32x128xf32>
    %49 = tpu.matmul %48, %47, %cst_32 {dimension_numbers = #tpu.dot_dimension_numbers<[1], [0], [0], [1], [0, 0, 1, 1], [], []>} : vector<32x32xbf16>, vector<32x128xbf16>, vector<32x128xf32> -> vector<32x128xf32>
    %50 = arith.truncf %49 : vector<32x128xf32> to vector<32x128xbf16>
    %c1088 = arith.constant 1088 : index
    %c0_33 = arith.constant 0 : index
    %51 = vector.load %arg2[%c1088, %c0_33] : memref<5672x128xbf16, #tpu.memory_space<vmem>>, vector<128x128xbf16>
    %cst_34 = arith.constant dense<0.000000e+00> : vector<32x128xf32>
    %52 = tpu.matmul %50, %51, %cst_34 {dimension_numbers = #tpu.dot_dimension_numbers<[1], [0], [0], [1], [0, 0, 1, 1], [], []>} : vector<32x128xbf16>, vector<128x128xbf16>, vector<32x128xf32> -> vector<32x128xf32>
    %c1216 = arith.constant 1216 : index
    %c0_35 = arith.constant 0 : index
    %53 = vector.load %arg2[%c1216, %c0_35] : memref<5672x128xbf16, #tpu.memory_space<vmem>>, vector<32x32xbf16>
    %cst_36 = arith.constant dense<0.000000e+00> : vector<32x128xf32>
    %54 = tpu.matmul %53, %47, %cst_36 {dimension_numbers = #tpu.dot_dimension_numbers<[1], [0], [0], [1], [0, 0, 1, 1], [], []>} : vector<32x32xbf16>, vector<32x128xbf16>, vector<32x128xf32> -> vector<32x128xf32>
    %55 = arith.truncf %54 : vector<32x128xf32> to vector<32x128xbf16>
    %c1248 = arith.constant 1248 : index
    %c0_37 = arith.constant 0 : index
    %56 = vector.load %arg2[%c1248, %c0_37] : memref<5672x128xbf16, #tpu.memory_space<vmem>>, vector<128x128xbf16>
    %cst_38 = arith.constant dense<0.000000e+00> : vector<32x128xf32>
    %57 = tpu.matmul %55, %56, %cst_38 {dimension_numbers = #tpu.dot_dimension_numbers<[1], [0], [0], [1], [0, 0, 1, 1], [], []>} : vector<32x128xbf16>, vector<128x128xbf16>, vector<32x128xf32> -> vector<32x128xf32>
    %58 = arith.addf %52, %57 : vector<32x128xf32>
    %c1376 = arith.constant 1376 : index
    %c0_39 = arith.constant 0 : index
    %59 = vector.load %arg2[%c1376, %c0_39] : memref<5672x128xbf16, #tpu.memory_space<vmem>>, vector<32x32xbf16>
    %cst_40 = arith.constant dense<0.000000e+00> : vector<32x128xf32>
    %60 = tpu.matmul %59, %47, %cst_40 {dimension_numbers = #tpu.dot_dimension_numbers<[1], [0], [0], [1], [0, 0, 1, 1], [], []>} : vector<32x32xbf16>, vector<32x128xbf16>, vector<32x128xf32> -> vector<32x128xf32>
    %61 = arith.truncf %60 : vector<32x128xf32> to vector<32x128xbf16>
    %c1408 = arith.constant 1408 : index
    %c0_41 = arith.constant 0 : index
    %62 = vector.load %arg2[%c1408, %c0_41] : memref<5672x128xbf16, #tpu.memory_space<vmem>>, vector<128x128xbf16>
    %cst_42 = arith.constant dense<0.000000e+00> : vector<32x128xf32>
    %63 = tpu.matmul %61, %62, %cst_42 {dimension_numbers = #tpu.dot_dimension_numbers<[1], [0], [0], [1], [0, 0, 1, 1], [], []>} : vector<32x128xbf16>, vector<128x128xbf16>, vector<32x128xf32> -> vector<32x128xf32>
    %64 = arith.addf %58, %63 : vector<32x128xf32>
    %c2 = arith.constant 2 : index
    %c0_43 = arith.constant 0 : index
    %65 = vector.load %arg3[%c2, %c0_43] : memref<16x128xf32, #tpu.memory_space<vmem>>, vector<1x128xf32>
    %66 = vector.broadcast %65 : vector<1x128xf32> to vector<32x128xf32>
    %67 = arith.addf %64, %66 : vector<32x128xf32>
    %c736_44 = arith.constant 736 : index
    %c0_45 = arith.constant 0 : index
    %68 = vector.load %arg2[%c736_44, %c0_45] : memref<5672x128xbf16, #tpu.memory_space<vmem>>, vector<32x64xbf16>
    %cst_46 = arith.constant dense<0.000000e+00> : vector<32x128xf32>
    %69 = tpu.matmul %68, %24, %cst_46 {dimension_numbers = #tpu.dot_dimension_numbers<[1], [0], [0], [1], [0, 0, 1, 1], [], []>} : vector<32x64xbf16>, vector<64x128xbf16>, vector<32x128xf32> -> vector<32x128xf32>
    %70 = arith.truncf %69 : vector<32x128xf32> to vector<32x128xbf16>
    %c1536 = arith.constant 1536 : index
    %c0_47 = arith.constant 0 : index
    %71 = vector.load %arg2[%c1536, %c0_47] : memref<5672x128xbf16, #tpu.memory_space<vmem>>, vector<128x128xbf16>
    %cst_48 = arith.constant dense<0.000000e+00> : vector<32x128xf32>
    %72 = tpu.matmul %70, %71, %cst_48 {dimension_numbers = #tpu.dot_dimension_numbers<[1], [0], [0], [1], [0, 0, 1, 1], [], []>} : vector<32x128xbf16>, vector<128x128xbf16>, vector<32x128xf32> -> vector<32x128xf32>
    %c3 = arith.constant 3 : index
    %c0_49 = arith.constant 0 : index
    %73 = vector.load %arg3[%c3, %c0_49] : memref<16x128xf32, #tpu.memory_space<vmem>>, vector<1x128xf32>
    %74 = vector.broadcast %73 : vector<1x128xf32> to vector<32x128xf32>
    %75 = arith.addf %72, %74 : vector<32x128xf32>
    %76 = arith.truncf %67 : vector<32x128xf32> to vector<32x128xbf16>
    %c1920 = arith.constant 1920 : index
    %c0_50 = arith.constant 0 : index
    %77 = vector.load %arg2[%c1920, %c0_50] : memref<5672x128xbf16, #tpu.memory_space<vmem>>, vector<2x32xbf16>
    %cst_51 = arith.constant dense<0.000000e+00> : vector<2x128xf32>
    %78 = tpu.matmul %77, %76, %cst_51 {dimension_numbers = #tpu.dot_dimension_numbers<[1], [0], [0], [1], [0, 0, 1, 1], [], []>} : vector<2x32xbf16>, vector<32x128xbf16>, vector<2x128xf32> -> vector<2x128xf32>
    %79 = arith.truncf %78 : vector<2x128xf32> to vector<2x128xbf16>
    %c1664 = arith.constant 1664 : index
    %c0_52 = arith.constant 0 : index
    %80 = vector.load %arg2[%c1664, %c0_52] : memref<5672x128xbf16, #tpu.memory_space<vmem>>, vector<128x128xbf16>
    %cst_53 = arith.constant dense<0.000000e+00> : vector<2x128xf32>
    %81 = tpu.matmul %79, %80, %cst_53 {dimension_numbers = #tpu.dot_dimension_numbers<[1], [0], [0], [1], [0, 0, 1, 1], [], []>} : vector<2x128xbf16>, vector<128x128xbf16>, vector<2x128xf32> -> vector<2x128xf32>
    %cst_54 = arith.constant 0.000000e+00 : f32
    %82 = vector.broadcast %cst_54 : f32 to vector<2x128xf32>
    %83 = arith.maximumf %81, %82 : vector<2x128xf32>
    %84 = arith.truncf %83 : vector<2x128xf32> to vector<2x128xbf16>
    %c1792 = arith.constant 1792 : index
    %c0_55 = arith.constant 0 : index
    %85 = vector.load %arg2[%c1792, %c0_55] : memref<5672x128xbf16, #tpu.memory_space<vmem>>, vector<128x128xbf16>
    %cst_56 = arith.constant dense<0.000000e+00> : vector<2x128xf32>
    %86 = tpu.matmul %84, %85, %cst_56 {dimension_numbers = #tpu.dot_dimension_numbers<[1], [0], [0], [1], [0, 0, 1, 1], [], []>} : vector<2x128xbf16>, vector<128x128xbf16>, vector<2x128xf32> -> vector<2x128xf32>
    %87 = arith.negf %86 : vector<2x128xf32>
    %88 = math.exp %87 : vector<2x128xf32>
    %cst_57 = arith.constant 1.000000e+00 : f32
    %89 = vector.broadcast %cst_57 : f32 to vector<2x128xf32>
    %90 = arith.addf %89, %88 : vector<2x128xf32>
    %91 = arith.divf %89, %90 : vector<2x128xf32>
    %c1928 = arith.constant 1928 : index
    %c0_58 = arith.constant 0 : index
    %92 = vector.load %arg2[%c1928, %c0_58] : memref<5672x128xbf16, #tpu.memory_space<vmem>>, vector<32x2xbf16>
    %93 = arith.truncf %91 : vector<2x128xf32> to vector<2x128xbf16>
    %cst_59 = arith.constant dense<0.000000e+00> : vector<32x128xf32>
    %94 = tpu.matmul %92, %93, %cst_59 {dimension_numbers = #tpu.dot_dimension_numbers<[1], [0], [0], [1], [0, 0, 1, 1], [], []>} : vector<32x2xbf16>, vector<2x128xbf16>, vector<32x128xf32> -> vector<32x128xf32>
    %95 = arith.mulf %67, %94 : vector<32x128xf32>
    %96 = arith.addf %95, %75 : vector<32x128xf32>
    %cst_60 = arith.constant 0.000000e+00 : f32
    %97 = vector.broadcast %cst_60 : f32 to vector<32x128xf32>
    %98 = arith.maximumf %96, %97 : vector<32x128xf32>
    %99 = arith.truncf %98 : vector<32x128xf32> to vector<32x128xbf16>
    %c1960 = arith.constant 1960 : index
    %c0_61 = arith.constant 0 : index
    %100 = vector.load %arg2[%c1960, %c0_61] : memref<5672x128xbf16, #tpu.memory_space<vmem>>, vector<16x32xbf16>
    %cst_62 = arith.constant dense<0.000000e+00> : vector<16x128xf32>
    %101 = tpu.matmul %100, %99, %cst_62 {dimension_numbers = #tpu.dot_dimension_numbers<[1], [0], [0], [1], [0, 0, 1, 1], [], []>} : vector<16x32xbf16>, vector<32x128xbf16>, vector<16x128xf32> -> vector<16x128xf32>
    %102 = arith.truncf %101 : vector<16x128xf32> to vector<16x128xbf16>
    %c1976 = arith.constant 1976 : index
    %c0_63 = arith.constant 0 : index
    %103 = vector.load %arg2[%c1976, %c0_63] : memref<5672x128xbf16, #tpu.memory_space<vmem>>, vector<128x128xbf16>
    %cst_64 = arith.constant dense<0.000000e+00> : vector<16x128xf32>
    %104 = tpu.matmul %102, %103, %cst_64 {dimension_numbers = #tpu.dot_dimension_numbers<[1], [0], [0], [1], [0, 0, 1, 1], [], []>} : vector<16x128xbf16>, vector<128x128xbf16>, vector<16x128xf32> -> vector<16x128xf32>
    %c2104 = arith.constant 2104 : index
    %c0_65 = arith.constant 0 : index
    %105 = vector.load %arg2[%c2104, %c0_65] : memref<5672x128xbf16, #tpu.memory_space<vmem>>, vector<16x32xbf16>
    %cst_66 = arith.constant dense<0.000000e+00> : vector<16x128xf32>
    %106 = tpu.matmul %105, %99, %cst_66 {dimension_numbers = #tpu.dot_dimension_numbers<[1], [0], [0], [1], [0, 0, 1, 1], [], []>} : vector<16x32xbf16>, vector<32x128xbf16>, vector<16x128xf32> -> vector<16x128xf32>
    %107 = arith.truncf %106 : vector<16x128xf32> to vector<16x128xbf16>
    %c2120 = arith.constant 2120 : index
    %c0_67 = arith.constant 0 : index
    %108 = vector.load %arg2[%c2120, %c0_67] : memref<5672x128xbf16, #tpu.memory_space<vmem>>, vector<128x128xbf16>
    %cst_68 = arith.constant dense<0.000000e+00> : vector<16x128xf32>
    %109 = tpu.matmul %107, %108, %cst_68 {dimension_numbers = #tpu.dot_dimension_numbers<[1], [0], [0], [1], [0, 0, 1, 1], [], []>} : vector<16x128xbf16>, vector<128x128xbf16>, vector<16x128xf32> -> vector<16x128xf32>
    %110 = arith.addf %104, %109 : vector<16x128xf32>
    %c2248 = arith.constant 2248 : index
    %c0_69 = arith.constant 0 : index
    %111 = vector.load %arg2[%c2248, %c0_69] : memref<5672x128xbf16, #tpu.memory_space<vmem>>, vector<16x32xbf16>
    %cst_70 = arith.constant dense<0.000000e+00> : vector<16x128xf32>
    %112 = tpu.matmul %111, %99, %cst_70 {dimension_numbers = #tpu.dot_dimension_numbers<[1], [0], [0], [1], [0, 0, 1, 1], [], []>} : vector<16x32xbf16>, vector<32x128xbf16>, vector<16x128xf32> -> vector<16x128xf32>
    %113 = arith.truncf %112 : vector<16x128xf32> to vector<16x128xbf16>
    %c2264 = arith.constant 2264 : index
    %c0_71 = arith.constant 0 : index
    %114 = vector.load %arg2[%c2264, %c0_71] : memref<5672x128xbf16, #tpu.memory_space<vmem>>, vector<128x128xbf16>
    %cst_72 = arith.constant dense<0.000000e+00> : vector<16x128xf32>
    %115 = tpu.matmul %113, %114, %cst_72 {dimension_numbers = #tpu.dot_dimension_numbers<[1], [0], [0], [1], [0, 0, 1, 1], [], []>} : vector<16x128xbf16>, vector<128x128xbf16>, vector<16x128xf32> -> vector<16x128xf32>
    %116 = arith.addf %110, %115 : vector<16x128xf32>
    %c4 = arith.constant 4 : index
    %c0_73 = arith.constant 0 : index
    %117 = vector.load %arg3[%c4, %c0_73] : memref<16x128xf32, #tpu.memory_space<vmem>>, vector<1x128xf32>
    %118 = vector.broadcast %117 : vector<1x128xf32> to vector<16x128xf32>
    %119 = arith.addf %116, %118 : vector<16x128xf32>
    %cst_74 = arith.constant 0.000000e+00 : f32
    %120 = vector.broadcast %cst_74 : f32 to vector<16x128xf32>
    %121 = arith.maximumf %119, %120 : vector<16x128xf32>
    %122 = arith.truncf %121 : vector<16x128xf32> to vector<16x128xbf16>
    %c2392 = arith.constant 2392 : index
    %c0_75 = arith.constant 0 : index
    %123 = vector.load %arg2[%c2392, %c0_75] : memref<5672x128xbf16, #tpu.memory_space<vmem>>, vector<16x16xbf16>
    %cst_76 = arith.constant dense<0.000000e+00> : vector<16x128xf32>
    %124 = tpu.matmul %123, %122, %cst_76 {dimension_numbers = #tpu.dot_dimension_numbers<[1], [0], [0], [1], [0, 0, 1, 1], [], []>} : vector<16x16xbf16>, vector<16x128xbf16>, vector<16x128xf32> -> vector<16x128xf32>
    %125 = arith.truncf %124 : vector<16x128xf32> to vector<16x128xbf16>
    %c2408 = arith.constant 2408 : index
    %c0_77 = arith.constant 0 : index
    %126 = vector.load %arg2[%c2408, %c0_77] : memref<5672x128xbf16, #tpu.memory_space<vmem>>, vector<128x128xbf16>
    %cst_78 = arith.constant dense<0.000000e+00> : vector<16x128xf32>
    %127 = tpu.matmul %125, %126, %cst_78 {dimension_numbers = #tpu.dot_dimension_numbers<[1], [0], [0], [1], [0, 0, 1, 1], [], []>} : vector<16x128xbf16>, vector<128x128xbf16>, vector<16x128xf32> -> vector<16x128xf32>
    %c2536 = arith.constant 2536 : index
    %c0_79 = arith.constant 0 : index
    %128 = vector.load %arg2[%c2536, %c0_79] : memref<5672x128xbf16, #tpu.memory_space<vmem>>, vector<16x16xbf16>
    %cst_80 = arith.constant dense<0.000000e+00> : vector<16x128xf32>
    %129 = tpu.matmul %128, %122, %cst_80 {dimension_numbers = #tpu.dot_dimension_numbers<[1], [0], [0], [1], [0, 0, 1, 1], [], []>} : vector<16x16xbf16>, vector<16x128xbf16>, vector<16x128xf32> -> vector<16x128xf32>
    %130 = arith.truncf %129 : vector<16x128xf32> to vector<16x128xbf16>
    %c2552 = arith.constant 2552 : index
    %c0_81 = arith.constant 0 : index
    %131 = vector.load %arg2[%c2552, %c0_81] : memref<5672x128xbf16, #tpu.memory_space<vmem>>, vector<128x128xbf16>
    %cst_82 = arith.constant dense<0.000000e+00> : vector<16x128xf32>
    %132 = tpu.matmul %130, %131, %cst_82 {dimension_numbers = #tpu.dot_dimension_numbers<[1], [0], [0], [1], [0, 0, 1, 1], [], []>} : vector<16x128xbf16>, vector<128x128xbf16>, vector<16x128xf32> -> vector<16x128xf32>
    %133 = arith.addf %127, %132 : vector<16x128xf32>
    %c2680 = arith.constant 2680 : index
    %c0_83 = arith.constant 0 : index
    %134 = vector.load %arg2[%c2680, %c0_83] : memref<5672x128xbf16, #tpu.memory_space<vmem>>, vector<16x16xbf16>
    %cst_84 = arith.constant dense<0.000000e+00> : vector<16x128xf32>
    %135 = tpu.matmul %134, %122, %cst_84 {dimension_numbers = #tpu.dot_dimension_numbers<[1], [0], [0], [1], [0, 0, 1, 1], [], []>} : vector<16x16xbf16>, vector<16x128xbf16>, vector<16x128xf32> -> vector<16x128xf32>
    %136 = arith.truncf %135 : vector<16x128xf32> to vector<16x128xbf16>
    %c2696 = arith.constant 2696 : index
    %c0_85 = arith.constant 0 : index
    %137 = vector.load %arg2[%c2696, %c0_85] : memref<5672x128xbf16, #tpu.memory_space<vmem>>, vector<128x128xbf16>
    %cst_86 = arith.constant dense<0.000000e+00> : vector<16x128xf32>
    %138 = tpu.matmul %136, %137, %cst_86 {dimension_numbers = #tpu.dot_dimension_numbers<[1], [0], [0], [1], [0, 0, 1, 1], [], []>} : vector<16x128xbf16>, vector<128x128xbf16>, vector<16x128xf32> -> vector<16x128xf32>
    %139 = arith.addf %133, %138 : vector<16x128xf32>
    %c5 = arith.constant 5 : index
    %c0_87 = arith.constant 0 : index
    %140 = vector.load %arg3[%c5, %c0_87] : memref<16x128xf32, #tpu.memory_space<vmem>>, vector<1x128xf32>
    %141 = vector.broadcast %140 : vector<1x128xf32> to vector<16x128xf32>
    %142 = arith.addf %139, %141 : vector<16x128xf32>
    %c2104_88 = arith.constant 2104 : index
    %c0_89 = arith.constant 0 : index
    %143 = vector.load %arg2[%c2104_88, %c0_89] : memref<5672x128xbf16, #tpu.memory_space<vmem>>, vector<16x32xbf16>
    %cst_90 = arith.constant dense<0.000000e+00> : vector<16x128xf32>
    %144 = tpu.matmul %143, %99, %cst_90 {dimension_numbers = #tpu.dot_dimension_numbers<[1], [0], [0], [1], [0, 0, 1, 1], [], []>} : vector<16x32xbf16>, vector<32x128xbf16>, vector<16x128xf32> -> vector<16x128xf32>
    %145 = arith.truncf %144 : vector<16x128xf32> to vector<16x128xbf16>
    %c2824 = arith.constant 2824 : index
    %c0_91 = arith.constant 0 : index
    %146 = vector.load %arg2[%c2824, %c0_91] : memref<5672x128xbf16, #tpu.memory_space<vmem>>, vector<128x128xbf16>
    %cst_92 = arith.constant dense<0.000000e+00> : vector<16x128xf32>
    %147 = tpu.matmul %145, %146, %cst_92 {dimension_numbers = #tpu.dot_dimension_numbers<[1], [0], [0], [1], [0, 0, 1, 1], [], []>} : vector<16x128xbf16>, vector<128x128xbf16>, vector<16x128xf32> -> vector<16x128xf32>
    %c6 = arith.constant 6 : index
    %c0_93 = arith.constant 0 : index
    %148 = vector.load %arg3[%c6, %c0_93] : memref<16x128xf32, #tpu.memory_space<vmem>>, vector<1x128xf32>
    %149 = vector.broadcast %148 : vector<1x128xf32> to vector<16x128xf32>
    %150 = arith.addf %147, %149 : vector<16x128xf32>
    %151 = arith.truncf %142 : vector<16x128xf32> to vector<16x128xbf16>
    %c3208 = arith.constant 3208 : index
    %c0_94 = arith.constant 0 : index
    %152 = vector.load %arg2[%c3208, %c0_94] : memref<5672x128xbf16, #tpu.memory_space<vmem>>, vector<2x16xbf16>
    %cst_95 = arith.constant dense<0.000000e+00> : vector<2x128xf32>
    %153 = tpu.matmul %152, %151, %cst_95 {dimension_numbers = #tpu.dot_dimension_numbers<[1], [0], [0], [1], [0, 0, 1, 1], [], []>} : vector<2x16xbf16>, vector<16x128xbf16>, vector<2x128xf32> -> vector<2x128xf32>
    %154 = arith.truncf %153 : vector<2x128xf32> to vector<2x128xbf16>
    %c2952 = arith.constant 2952 : index
    %c0_96 = arith.constant 0 : index
    %155 = vector.load %arg2[%c2952, %c0_96] : memref<5672x128xbf16, #tpu.memory_space<vmem>>, vector<128x128xbf16>
    %cst_97 = arith.constant dense<0.000000e+00> : vector<2x128xf32>
    %156 = tpu.matmul %154, %155, %cst_97 {dimension_numbers = #tpu.dot_dimension_numbers<[1], [0], [0], [1], [0, 0, 1, 1], [], []>} : vector<2x128xbf16>, vector<128x128xbf16>, vector<2x128xf32> -> vector<2x128xf32>
    %cst_98 = arith.constant 0.000000e+00 : f32
    %157 = vector.broadcast %cst_98 : f32 to vector<2x128xf32>
    %158 = arith.maximumf %156, %157 : vector<2x128xf32>
    %159 = arith.truncf %158 : vector<2x128xf32> to vector<2x128xbf16>
    %c3080 = arith.constant 3080 : index
    %c0_99 = arith.constant 0 : index
    %160 = vector.load %arg2[%c3080, %c0_99] : memref<5672x128xbf16, #tpu.memory_space<vmem>>, vector<128x128xbf16>
    %cst_100 = arith.constant dense<0.000000e+00> : vector<2x128xf32>
    %161 = tpu.matmul %159, %160, %cst_100 {dimension_numbers = #tpu.dot_dimension_numbers<[1], [0], [0], [1], [0, 0, 1, 1], [], []>} : vector<2x128xbf16>, vector<128x128xbf16>, vector<2x128xf32> -> vector<2x128xf32>
    %162 = arith.negf %161 : vector<2x128xf32>
    %163 = math.exp %162 : vector<2x128xf32>
    %cst_101 = arith.constant 1.000000e+00 : f32
    %164 = vector.broadcast %cst_101 : f32 to vector<2x128xf32>
    %165 = arith.addf %164, %163 : vector<2x128xf32>
    %166 = arith.divf %164, %165 : vector<2x128xf32>
    %c3216 = arith.constant 3216 : index
    %c0_102 = arith.constant 0 : index
    %167 = vector.load %arg2[%c3216, %c0_102] : memref<5672x128xbf16, #tpu.memory_space<vmem>>, vector<16x2xbf16>
    %168 = arith.truncf %166 : vector<2x128xf32> to vector<2x128xbf16>
    %cst_103 = arith.constant dense<0.000000e+00> : vector<16x128xf32>
    %169 = tpu.matmul %167, %168, %cst_103 {dimension_numbers = #tpu.dot_dimension_numbers<[1], [0], [0], [1], [0, 0, 1, 1], [], []>} : vector<16x2xbf16>, vector<2x128xbf16>, vector<16x128xf32> -> vector<16x128xf32>
    %170 = arith.mulf %142, %169 : vector<16x128xf32>
    %171 = arith.addf %170, %150 : vector<16x128xf32>
    %cst_104 = arith.constant 0.000000e+00 : f32
    %172 = vector.broadcast %cst_104 : f32 to vector<16x128xf32>
    %173 = arith.maximumf %171, %172 : vector<16x128xf32>
    %174 = arith.truncf %173 : vector<16x128xf32> to vector<16x128xbf16>
    %c3232 = arith.constant 3232 : index
    %c0_105 = arith.constant 0 : index
    %175 = vector.load %arg2[%c3232, %c0_105] : memref<5672x128xbf16, #tpu.memory_space<vmem>>, vector<8x16xbf16>
    %cst_106 = arith.constant dense<0.000000e+00> : vector<8x128xf32>
    %176 = tpu.matmul %175, %174, %cst_106 {dimension_numbers = #tpu.dot_dimension_numbers<[1], [0], [0], [1], [0, 0, 1, 1], [], []>} : vector<8x16xbf16>, vector<16x128xbf16>, vector<8x128xf32> -> vector<8x128xf32>
    %177 = arith.truncf %176 : vector<8x128xf32> to vector<8x128xbf16>
    %c3240 = arith.constant 3240 : index
    %c0_107 = arith.constant 0 : index
    %178 = vector.load %arg2[%c3240, %c0_107] : memref<5672x128xbf16, #tpu.memory_space<vmem>>, vector<128x128xbf16>
    %cst_108 = arith.constant dense<0.000000e+00> : vector<8x128xf32>
    %179 = tpu.matmul %177, %178, %cst_108 {dimension_numbers = #tpu.dot_dimension_numbers<[1], [0], [0], [1], [0, 0, 1, 1], [], []>} : vector<8x128xbf16>, vector<128x128xbf16>, vector<8x128xf32> -> vector<8x128xf32>
    %c3368 = arith.constant 3368 : index
    %c0_109 = arith.constant 0 : index
    %180 = vector.load %arg2[%c3368, %c0_109] : memref<5672x128xbf16, #tpu.memory_space<vmem>>, vector<8x16xbf16>
    %cst_110 = arith.constant dense<0.000000e+00> : vector<8x128xf32>
    %181 = tpu.matmul %180, %174, %cst_110 {dimension_numbers = #tpu.dot_dimension_numbers<[1], [0], [0], [1], [0, 0, 1, 1], [], []>} : vector<8x16xbf16>, vector<16x128xbf16>, vector<8x128xf32> -> vector<8x128xf32>
    %182 = arith.truncf %181 : vector<8x128xf32> to vector<8x128xbf16>
    %c3376 = arith.constant 3376 : index
    %c0_111 = arith.constant 0 : index
    %183 = vector.load %arg2[%c3376, %c0_111] : memref<5672x128xbf16, #tpu.memory_space<vmem>>, vector<128x128xbf16>
    %cst_112 = arith.constant dense<0.000000e+00> : vector<8x128xf32>
    %184 = tpu.matmul %182, %183, %cst_112 {dimension_numbers = #tpu.dot_dimension_numbers<[1], [0], [0], [1], [0, 0, 1, 1], [], []>} : vector<8x128xbf16>, vector<128x128xbf16>, vector<8x128xf32> -> vector<8x128xf32>
    %185 = arith.addf %179, %184 : vector<8x128xf32>
    %c3504 = arith.constant 3504 : index
    %c0_113 = arith.constant 0 : index
    %186 = vector.load %arg2[%c3504, %c0_113] : memref<5672x128xbf16, #tpu.memory_space<vmem>>, vector<8x16xbf16>
    %cst_114 = arith.constant dense<0.000000e+00> : vector<8x128xf32>
    %187 = tpu.matmul %186, %174, %cst_114 {dimension_numbers = #tpu.dot_dimension_numbers<[1], [0], [0], [1], [0, 0, 1, 1], [], []>} : vector<8x16xbf16>, vector<16x128xbf16>, vector<8x128xf32> -> vector<8x128xf32>
    %188 = arith.truncf %187 : vector<8x128xf32> to vector<8x128xbf16>
    %c3512 = arith.constant 3512 : index
    %c0_115 = arith.constant 0 : index
    %189 = vector.load %arg2[%c3512, %c0_115] : memref<5672x128xbf16, #tpu.memory_space<vmem>>, vector<128x128xbf16>
    %cst_116 = arith.constant dense<0.000000e+00> : vector<8x128xf32>
    %190 = tpu.matmul %188, %189, %cst_116 {dimension_numbers = #tpu.dot_dimension_numbers<[1], [0], [0], [1], [0, 0, 1, 1], [], []>} : vector<8x128xbf16>, vector<128x128xbf16>, vector<8x128xf32> -> vector<8x128xf32>
    %191 = arith.addf %185, %190 : vector<8x128xf32>
    %c7 = arith.constant 7 : index
    %c0_117 = arith.constant 0 : index
    %192 = vector.load %arg3[%c7, %c0_117] : memref<16x128xf32, #tpu.memory_space<vmem>>, vector<1x128xf32>
    %193 = vector.broadcast %192 : vector<1x128xf32> to vector<8x128xf32>
    %194 = arith.addf %191, %193 : vector<8x128xf32>
    %cst_118 = arith.constant 0.000000e+00 : f32
    %195 = vector.broadcast %cst_118 : f32 to vector<8x128xf32>
    %196 = arith.maximumf %194, %195 : vector<8x128xf32>
    %197 = arith.truncf %196 : vector<8x128xf32> to vector<8x128xbf16>
    %c3640 = arith.constant 3640 : index
    %c0_119 = arith.constant 0 : index
    %198 = vector.load %arg2[%c3640, %c0_119] : memref<5672x128xbf16, #tpu.memory_space<vmem>>, vector<8x8xbf16>
    %cst_120 = arith.constant dense<0.000000e+00> : vector<8x128xf32>
    %199 = tpu.matmul %198, %197, %cst_120 {dimension_numbers = #tpu.dot_dimension_numbers<[1], [0], [0], [1], [0, 0, 1, 1], [], []>} : vector<8x8xbf16>, vector<8x128xbf16>, vector<8x128xf32> -> vector<8x128xf32>
    %200 = arith.truncf %199 : vector<8x128xf32> to vector<8x128xbf16>
    %c3648 = arith.constant 3648 : index
    %c0_121 = arith.constant 0 : index
    %201 = vector.load %arg2[%c3648, %c0_121] : memref<5672x128xbf16, #tpu.memory_space<vmem>>, vector<128x128xbf16>
    %cst_122 = arith.constant dense<0.000000e+00> : vector<8x128xf32>
    %202 = tpu.matmul %200, %201, %cst_122 {dimension_numbers = #tpu.dot_dimension_numbers<[1], [0], [0], [1], [0, 0, 1, 1], [], []>} : vector<8x128xbf16>, vector<128x128xbf16>, vector<8x128xf32> -> vector<8x128xf32>
    %c3776 = arith.constant 3776 : index
    %c0_123 = arith.constant 0 : index
    %203 = vector.load %arg2[%c3776, %c0_123] : memref<5672x128xbf16, #tpu.memory_space<vmem>>, vector<8x8xbf16>
    %cst_124 = arith.constant dense<0.000000e+00> : vector<8x128xf32>
    %204 = tpu.matmul %203, %197, %cst_124 {dimension_numbers = #tpu.dot_dimension_numbers<[1], [0], [0], [1], [0, 0, 1, 1], [], []>} : vector<8x8xbf16>, vector<8x128xbf16>, vector<8x128xf32> -> vector<8x128xf32>
    %205 = arith.truncf %204 : vector<8x128xf32> to vector<8x128xbf16>
    %c3784 = arith.constant 3784 : index
    %c0_125 = arith.constant 0 : index
    %206 = vector.load %arg2[%c3784, %c0_125] : memref<5672x128xbf16, #tpu.memory_space<vmem>>, vector<128x128xbf16>
    %cst_126 = arith.constant dense<0.000000e+00> : vector<8x128xf32>
    %207 = tpu.matmul %205, %206, %cst_126 {dimension_numbers = #tpu.dot_dimension_numbers<[1], [0], [0], [1], [0, 0, 1, 1], [], []>} : vector<8x128xbf16>, vector<128x128xbf16>, vector<8x128xf32> -> vector<8x128xf32>
    %208 = arith.addf %202, %207 : vector<8x128xf32>
    %c3912 = arith.constant 3912 : index
    %c0_127 = arith.constant 0 : index
    %209 = vector.load %arg2[%c3912, %c0_127] : memref<5672x128xbf16, #tpu.memory_space<vmem>>, vector<8x8xbf16>
    %cst_128 = arith.constant dense<0.000000e+00> : vector<8x128xf32>
    %210 = tpu.matmul %209, %197, %cst_128 {dimension_numbers = #tpu.dot_dimension_numbers<[1], [0], [0], [1], [0, 0, 1, 1], [], []>} : vector<8x8xbf16>, vector<8x128xbf16>, vector<8x128xf32> -> vector<8x128xf32>
    %211 = arith.truncf %210 : vector<8x128xf32> to vector<8x128xbf16>
    %c3920 = arith.constant 3920 : index
    %c0_129 = arith.constant 0 : index
    %212 = vector.load %arg2[%c3920, %c0_129] : memref<5672x128xbf16, #tpu.memory_space<vmem>>, vector<128x128xbf16>
    %cst_130 = arith.constant dense<0.000000e+00> : vector<8x128xf32>
    %213 = tpu.matmul %211, %212, %cst_130 {dimension_numbers = #tpu.dot_dimension_numbers<[1], [0], [0], [1], [0, 0, 1, 1], [], []>} : vector<8x128xbf16>, vector<128x128xbf16>, vector<8x128xf32> -> vector<8x128xf32>
    %214 = arith.addf %208, %213 : vector<8x128xf32>
    %c8 = arith.constant 8 : index
    %c0_131 = arith.constant 0 : index
    %215 = vector.load %arg3[%c8, %c0_131] : memref<16x128xf32, #tpu.memory_space<vmem>>, vector<1x128xf32>
    %216 = vector.broadcast %215 : vector<1x128xf32> to vector<8x128xf32>
    %217 = arith.addf %214, %216 : vector<8x128xf32>
    %c3368_132 = arith.constant 3368 : index
    %c0_133 = arith.constant 0 : index
    %218 = vector.load %arg2[%c3368_132, %c0_133] : memref<5672x128xbf16, #tpu.memory_space<vmem>>, vector<8x16xbf16>
    %cst_134 = arith.constant dense<0.000000e+00> : vector<8x128xf32>
    %219 = tpu.matmul %218, %174, %cst_134 {dimension_numbers = #tpu.dot_dimension_numbers<[1], [0], [0], [1], [0, 0, 1, 1], [], []>} : vector<8x16xbf16>, vector<16x128xbf16>, vector<8x128xf32> -> vector<8x128xf32>
    %220 = arith.truncf %219 : vector<8x128xf32> to vector<8x128xbf16>
    %c4048 = arith.constant 4048 : index
    %c0_135 = arith.constant 0 : index
    %221 = vector.load %arg2[%c4048, %c0_135] : memref<5672x128xbf16, #tpu.memory_space<vmem>>, vector<128x128xbf16>
    %cst_136 = arith.constant dense<0.000000e+00> : vector<8x128xf32>
    %222 = tpu.matmul %220, %221, %cst_136 {dimension_numbers = #tpu.dot_dimension_numbers<[1], [0], [0], [1], [0, 0, 1, 1], [], []>} : vector<8x128xbf16>, vector<128x128xbf16>, vector<8x128xf32> -> vector<8x128xf32>
    %c9 = arith.constant 9 : index
    %c0_137 = arith.constant 0 : index
    %223 = vector.load %arg3[%c9, %c0_137] : memref<16x128xf32, #tpu.memory_space<vmem>>, vector<1x128xf32>
    %224 = vector.broadcast %223 : vector<1x128xf32> to vector<8x128xf32>
    %225 = arith.addf %222, %224 : vector<8x128xf32>
    %226 = arith.truncf %217 : vector<8x128xf32> to vector<8x128xbf16>
    %c4432 = arith.constant 4432 : index
    %c0_138 = arith.constant 0 : index
    %227 = vector.load %arg2[%c4432, %c0_138] : memref<5672x128xbf16, #tpu.memory_space<vmem>>, vector<2x8xbf16>
    %cst_139 = arith.constant dense<0.000000e+00> : vector<2x128xf32>
    %228 = tpu.matmul %227, %226, %cst_139 {dimension_numbers = #tpu.dot_dimension_numbers<[1], [0], [0], [1], [0, 0, 1, 1], [], []>} : vector<2x8xbf16>, vector<8x128xbf16>, vector<2x128xf32> -> vector<2x128xf32>
    %229 = arith.truncf %228 : vector<2x128xf32> to vector<2x128xbf16>
    %c4176 = arith.constant 4176 : index
    %c0_140 = arith.constant 0 : index
    %230 = vector.load %arg2[%c4176, %c0_140] : memref<5672x128xbf16, #tpu.memory_space<vmem>>, vector<128x128xbf16>
    %cst_141 = arith.constant dense<0.000000e+00> : vector<2x128xf32>
    %231 = tpu.matmul %229, %230, %cst_141 {dimension_numbers = #tpu.dot_dimension_numbers<[1], [0], [0], [1], [0, 0, 1, 1], [], []>} : vector<2x128xbf16>, vector<128x128xbf16>, vector<2x128xf32> -> vector<2x128xf32>
    %cst_142 = arith.constant 0.000000e+00 : f32
    %232 = vector.broadcast %cst_142 : f32 to vector<2x128xf32>
    %233 = arith.maximumf %231, %232 : vector<2x128xf32>
    %234 = arith.truncf %233 : vector<2x128xf32> to vector<2x128xbf16>
    %c4304 = arith.constant 4304 : index
    %c0_143 = arith.constant 0 : index
    %235 = vector.load %arg2[%c4304, %c0_143] : memref<5672x128xbf16, #tpu.memory_space<vmem>>, vector<128x128xbf16>
    %cst_144 = arith.constant dense<0.000000e+00> : vector<2x128xf32>
    %236 = tpu.matmul %234, %235, %cst_144 {dimension_numbers = #tpu.dot_dimension_numbers<[1], [0], [0], [1], [0, 0, 1, 1], [], []>} : vector<2x128xbf16>, vector<128x128xbf16>, vector<2x128xf32> -> vector<2x128xf32>
    %237 = arith.negf %236 : vector<2x128xf32>
    %238 = math.exp %237 : vector<2x128xf32>
    %cst_145 = arith.constant 1.000000e+00 : f32
    %239 = vector.broadcast %cst_145 : f32 to vector<2x128xf32>
    %240 = arith.addf %239, %238 : vector<2x128xf32>
    %241 = arith.divf %239, %240 : vector<2x128xf32>
    %c4440 = arith.constant 4440 : index
    %c0_146 = arith.constant 0 : index
    %242 = vector.load %arg2[%c4440, %c0_146] : memref<5672x128xbf16, #tpu.memory_space<vmem>>, vector<8x2xbf16>
    %243 = arith.truncf %241 : vector<2x128xf32> to vector<2x128xbf16>
    %cst_147 = arith.constant dense<0.000000e+00> : vector<8x128xf32>
    %244 = tpu.matmul %242, %243, %cst_147 {dimension_numbers = #tpu.dot_dimension_numbers<[1], [0], [0], [1], [0, 0, 1, 1], [], []>} : vector<8x2xbf16>, vector<2x128xbf16>, vector<8x128xf32> -> vector<8x128xf32>
    %245 = arith.mulf %217, %244 : vector<8x128xf32>
    %246 = arith.addf %245, %225 : vector<8x128xf32>
    %cst_148 = arith.constant 0.000000e+00 : f32
    %247 = vector.broadcast %cst_148 : f32 to vector<8x128xf32>
    %248 = arith.maximumf %246, %247 : vector<8x128xf32>
    %249 = arith.truncf %248 : vector<8x128xf32> to vector<8x128xbf16>
    %c4448 = arith.constant 4448 : index
    %c0_149 = arith.constant 0 : index
    %250 = vector.load %arg2[%c4448, %c0_149] : memref<5672x128xbf16, #tpu.memory_space<vmem>>, vector<4x8xbf16>
    %cst_150 = arith.constant dense<0.000000e+00> : vector<4x128xf32>
    %251 = tpu.matmul %250, %249, %cst_150 {dimension_numbers = #tpu.dot_dimension_numbers<[1], [0], [0], [1], [0, 0, 1, 1], [], []>} : vector<4x8xbf16>, vector<8x128xbf16>, vector<4x128xf32> -> vector<4x128xf32>
    %252 = arith.truncf %251 : vector<4x128xf32> to vector<4x128xbf16>
    %c4456 = arith.constant 4456 : index
    %c0_151 = arith.constant 0 : index
    %253 = vector.load %arg2[%c4456, %c0_151] : memref<5672x128xbf16, #tpu.memory_space<vmem>>, vector<128x128xbf16>
    %cst_152 = arith.constant dense<0.000000e+00> : vector<4x128xf32>
    %254 = tpu.matmul %252, %253, %cst_152 {dimension_numbers = #tpu.dot_dimension_numbers<[1], [0], [0], [1], [0, 0, 1, 1], [], []>} : vector<4x128xbf16>, vector<128x128xbf16>, vector<4x128xf32> -> vector<4x128xf32>
    %c4584 = arith.constant 4584 : index
    %c0_153 = arith.constant 0 : index
    %255 = vector.load %arg2[%c4584, %c0_153] : memref<5672x128xbf16, #tpu.memory_space<vmem>>, vector<4x8xbf16>
    %cst_154 = arith.constant dense<0.000000e+00> : vector<4x128xf32>
    %256 = tpu.matmul %255, %249, %cst_154 {dimension_numbers = #tpu.dot_dimension_numbers<[1], [0], [0], [1], [0, 0, 1, 1], [], []>} : vector<4x8xbf16>, vector<8x128xbf16>, vector<4x128xf32> -> vector<4x128xf32>
    %257 = arith.truncf %256 : vector<4x128xf32> to vector<4x128xbf16>
    %c4592 = arith.constant 4592 : index
    %c0_155 = arith.constant 0 : index
    %258 = vector.load %arg2[%c4592, %c0_155] : memref<5672x128xbf16, #tpu.memory_space<vmem>>, vector<128x128xbf16>
    %cst_156 = arith.constant dense<0.000000e+00> : vector<4x128xf32>
    %259 = tpu.matmul %257, %258, %cst_156 {dimension_numbers = #tpu.dot_dimension_numbers<[1], [0], [0], [1], [0, 0, 1, 1], [], []>} : vector<4x128xbf16>, vector<128x128xbf16>, vector<4x128xf32> -> vector<4x128xf32>
    %260 = arith.addf %254, %259 : vector<4x128xf32>
    %c4720 = arith.constant 4720 : index
    %c0_157 = arith.constant 0 : index
    %261 = vector.load %arg2[%c4720, %c0_157] : memref<5672x128xbf16, #tpu.memory_space<vmem>>, vector<4x8xbf16>
    %cst_158 = arith.constant dense<0.000000e+00> : vector<4x128xf32>
    %262 = tpu.matmul %261, %249, %cst_158 {dimension_numbers = #tpu.dot_dimension_numbers<[1], [0], [0], [1], [0, 0, 1, 1], [], []>} : vector<4x8xbf16>, vector<8x128xbf16>, vector<4x128xf32> -> vector<4x128xf32>
    %263 = arith.truncf %262 : vector<4x128xf32> to vector<4x128xbf16>
    %c4728 = arith.constant 4728 : index
    %c0_159 = arith.constant 0 : index
    %264 = vector.load %arg2[%c4728, %c0_159] : memref<5672x128xbf16, #tpu.memory_space<vmem>>, vector<128x128xbf16>
    %cst_160 = arith.constant dense<0.000000e+00> : vector<4x128xf32>
    %265 = tpu.matmul %263, %264, %cst_160 {dimension_numbers = #tpu.dot_dimension_numbers<[1], [0], [0], [1], [0, 0, 1, 1], [], []>} : vector<4x128xbf16>, vector<128x128xbf16>, vector<4x128xf32> -> vector<4x128xf32>
    %266 = arith.addf %260, %265 : vector<4x128xf32>
    %c10 = arith.constant 10 : index
    %c0_161 = arith.constant 0 : index
    %267 = vector.load %arg3[%c10, %c0_161] : memref<16x128xf32, #tpu.memory_space<vmem>>, vector<1x128xf32>
    %268 = vector.broadcast %267 : vector<1x128xf32> to vector<4x128xf32>
    %269 = arith.addf %266, %268 : vector<4x128xf32>
    %cst_162 = arith.constant 0.000000e+00 : f32
    %270 = vector.broadcast %cst_162 : f32 to vector<4x128xf32>
    %271 = arith.maximumf %269, %270 : vector<4x128xf32>
    %272 = arith.truncf %271 : vector<4x128xf32> to vector<4x128xbf16>
    %c4856 = arith.constant 4856 : index
    %c0_163 = arith.constant 0 : index
    %273 = vector.load %arg2[%c4856, %c0_163] : memref<5672x128xbf16, #tpu.memory_space<vmem>>, vector<4x4xbf16>
    %cst_164 = arith.constant dense<0.000000e+00> : vector<4x128xf32>
    %274 = tpu.matmul %273, %272, %cst_164 {dimension_numbers = #tpu.dot_dimension_numbers<[1], [0], [0], [1], [0, 0, 1, 1], [], []>} : vector<4x4xbf16>, vector<4x128xbf16>, vector<4x128xf32> -> vector<4x128xf32>
    %275 = arith.truncf %274 : vector<4x128xf32> to vector<4x128xbf16>
    %c4864 = arith.constant 4864 : index
    %c0_165 = arith.constant 0 : index
    %276 = vector.load %arg2[%c4864, %c0_165] : memref<5672x128xbf16, #tpu.memory_space<vmem>>, vector<128x128xbf16>
    %cst_166 = arith.constant dense<0.000000e+00> : vector<4x128xf32>
    %277 = tpu.matmul %275, %276, %cst_166 {dimension_numbers = #tpu.dot_dimension_numbers<[1], [0], [0], [1], [0, 0, 1, 1], [], []>} : vector<4x128xbf16>, vector<128x128xbf16>, vector<4x128xf32> -> vector<4x128xf32>
    %c4992 = arith.constant 4992 : index
    %c0_167 = arith.constant 0 : index
    %278 = vector.load %arg2[%c4992, %c0_167] : memref<5672x128xbf16, #tpu.memory_space<vmem>>, vector<4x4xbf16>
    %cst_168 = arith.constant dense<0.000000e+00> : vector<4x128xf32>
    %279 = tpu.matmul %278, %272, %cst_168 {dimension_numbers = #tpu.dot_dimension_numbers<[1], [0], [0], [1], [0, 0, 1, 1], [], []>} : vector<4x4xbf16>, vector<4x128xbf16>, vector<4x128xf32> -> vector<4x128xf32>
    %280 = arith.truncf %279 : vector<4x128xf32> to vector<4x128xbf16>
    %c5000 = arith.constant 5000 : index
    %c0_169 = arith.constant 0 : index
    %281 = vector.load %arg2[%c5000, %c0_169] : memref<5672x128xbf16, #tpu.memory_space<vmem>>, vector<128x128xbf16>
    %cst_170 = arith.constant dense<0.000000e+00> : vector<4x128xf32>
    %282 = tpu.matmul %280, %281, %cst_170 {dimension_numbers = #tpu.dot_dimension_numbers<[1], [0], [0], [1], [0, 0, 1, 1], [], []>} : vector<4x128xbf16>, vector<128x128xbf16>, vector<4x128xf32> -> vector<4x128xf32>
    %283 = arith.addf %277, %282 : vector<4x128xf32>
    %c5128 = arith.constant 5128 : index
    %c0_171 = arith.constant 0 : index
    %284 = vector.load %arg2[%c5128, %c0_171] : memref<5672x128xbf16, #tpu.memory_space<vmem>>, vector<4x4xbf16>
    %cst_172 = arith.constant dense<0.000000e+00> : vector<4x128xf32>
    %285 = tpu.matmul %284, %272, %cst_172 {dimension_numbers = #tpu.dot_dimension_numbers<[1], [0], [0], [1], [0, 0, 1, 1], [], []>} : vector<4x4xbf16>, vector<4x128xbf16>, vector<4x128xf32> -> vector<4x128xf32>
    %286 = arith.truncf %285 : vector<4x128xf32> to vector<4x128xbf16>
    %c5136 = arith.constant 5136 : index
    %c0_173 = arith.constant 0 : index
    %287 = vector.load %arg2[%c5136, %c0_173] : memref<5672x128xbf16, #tpu.memory_space<vmem>>, vector<128x128xbf16>
    %cst_174 = arith.constant dense<0.000000e+00> : vector<4x128xf32>
    %288 = tpu.matmul %286, %287, %cst_174 {dimension_numbers = #tpu.dot_dimension_numbers<[1], [0], [0], [1], [0, 0, 1, 1], [], []>} : vector<4x128xbf16>, vector<128x128xbf16>, vector<4x128xf32> -> vector<4x128xf32>
    %289 = arith.addf %283, %288 : vector<4x128xf32>
    %c11 = arith.constant 11 : index
    %c0_175 = arith.constant 0 : index
    %290 = vector.load %arg3[%c11, %c0_175] : memref<16x128xf32, #tpu.memory_space<vmem>>, vector<1x128xf32>
    %291 = vector.broadcast %290 : vector<1x128xf32> to vector<4x128xf32>
    %292 = arith.addf %289, %291 : vector<4x128xf32>
    %c4584_176 = arith.constant 4584 : index
    %c0_177 = arith.constant 0 : index
    %293 = vector.load %arg2[%c4584_176, %c0_177] : memref<5672x128xbf16, #tpu.memory_space<vmem>>, vector<4x8xbf16>
    %cst_178 = arith.constant dense<0.000000e+00> : vector<4x128xf32>
    %294 = tpu.matmul %293, %249, %cst_178 {dimension_numbers = #tpu.dot_dimension_numbers<[1], [0], [0], [1], [0, 0, 1, 1], [], []>} : vector<4x8xbf16>, vector<8x128xbf16>, vector<4x128xf32> -> vector<4x128xf32>
    %295 = arith.truncf %294 : vector<4x128xf32> to vector<4x128xbf16>
    %c5264 = arith.constant 5264 : index
    %c0_179 = arith.constant 0 : index
    %296 = vector.load %arg2[%c5264, %c0_179] : memref<5672x128xbf16, #tpu.memory_space<vmem>>, vector<128x128xbf16>
    %cst_180 = arith.constant dense<0.000000e+00> : vector<4x128xf32>
    %297 = tpu.matmul %295, %296, %cst_180 {dimension_numbers = #tpu.dot_dimension_numbers<[1], [0], [0], [1], [0, 0, 1, 1], [], []>} : vector<4x128xbf16>, vector<128x128xbf16>, vector<4x128xf32> -> vector<4x128xf32>
    %c12 = arith.constant 12 : index
    %c0_181 = arith.constant 0 : index
    %298 = vector.load %arg3[%c12, %c0_181] : memref<16x128xf32, #tpu.memory_space<vmem>>, vector<1x128xf32>
    %299 = vector.broadcast %298 : vector<1x128xf32> to vector<4x128xf32>
    %300 = arith.addf %297, %299 : vector<4x128xf32>
    %301 = arith.truncf %292 : vector<4x128xf32> to vector<4x128xbf16>
    %c5648 = arith.constant 5648 : index
    %c0_182 = arith.constant 0 : index
    %302 = vector.load %arg2[%c5648, %c0_182] : memref<5672x128xbf16, #tpu.memory_space<vmem>>, vector<2x4xbf16>
    %cst_183 = arith.constant dense<0.000000e+00> : vector<2x128xf32>
    %303 = tpu.matmul %302, %301, %cst_183 {dimension_numbers = #tpu.dot_dimension_numbers<[1], [0], [0], [1], [0, 0, 1, 1], [], []>} : vector<2x4xbf16>, vector<4x128xbf16>, vector<2x128xf32> -> vector<2x128xf32>
    %304 = arith.truncf %303 : vector<2x128xf32> to vector<2x128xbf16>
    %c5392 = arith.constant 5392 : index
    %c0_184 = arith.constant 0 : index
    %305 = vector.load %arg2[%c5392, %c0_184] : memref<5672x128xbf16, #tpu.memory_space<vmem>>, vector<128x128xbf16>
    %cst_185 = arith.constant dense<0.000000e+00> : vector<2x128xf32>
    %306 = tpu.matmul %304, %305, %cst_185 {dimension_numbers = #tpu.dot_dimension_numbers<[1], [0], [0], [1], [0, 0, 1, 1], [], []>} : vector<2x128xbf16>, vector<128x128xbf16>, vector<2x128xf32> -> vector<2x128xf32>
    %cst_186 = arith.constant 0.000000e+00 : f32
    %307 = vector.broadcast %cst_186 : f32 to vector<2x128xf32>
    %308 = arith.maximumf %306, %307 : vector<2x128xf32>
    %309 = arith.truncf %308 : vector<2x128xf32> to vector<2x128xbf16>
    %c5520 = arith.constant 5520 : index
    %c0_187 = arith.constant 0 : index
    %310 = vector.load %arg2[%c5520, %c0_187] : memref<5672x128xbf16, #tpu.memory_space<vmem>>, vector<128x128xbf16>
    %cst_188 = arith.constant dense<0.000000e+00> : vector<2x128xf32>
    %311 = tpu.matmul %309, %310, %cst_188 {dimension_numbers = #tpu.dot_dimension_numbers<[1], [0], [0], [1], [0, 0, 1, 1], [], []>} : vector<2x128xbf16>, vector<128x128xbf16>, vector<2x128xf32> -> vector<2x128xf32>
    %312 = arith.negf %311 : vector<2x128xf32>
    %313 = math.exp %312 : vector<2x128xf32>
    %cst_189 = arith.constant 1.000000e+00 : f32
    %314 = vector.broadcast %cst_189 : f32 to vector<2x128xf32>
    %315 = arith.addf %314, %313 : vector<2x128xf32>
    %316 = arith.divf %314, %315 : vector<2x128xf32>
    %c5656 = arith.constant 5656 : index
    %c0_190 = arith.constant 0 : index
    %317 = vector.load %arg2[%c5656, %c0_190] : memref<5672x128xbf16, #tpu.memory_space<vmem>>, vector<4x2xbf16>
    %318 = arith.truncf %316 : vector<2x128xf32> to vector<2x128xbf16>
    %cst_191 = arith.constant dense<0.000000e+00> : vector<4x128xf32>
    %319 = tpu.matmul %317, %318, %cst_191 {dimension_numbers = #tpu.dot_dimension_numbers<[1], [0], [0], [1], [0, 0, 1, 1], [], []>} : vector<4x2xbf16>, vector<2x128xbf16>, vector<4x128xf32> -> vector<4x128xf32>
    %320 = arith.mulf %292, %319 : vector<4x128xf32>
    %321 = arith.addf %320, %300 : vector<4x128xf32>
    %cst_192 = arith.constant 0.000000e+00 : f32
    %322 = vector.broadcast %cst_192 : f32 to vector<4x128xf32>
    %323 = arith.maximumf %321, %322 : vector<4x128xf32>
    %324 = arith.truncf %323 : vector<4x128xf32> to vector<4x128xbf16>
    %c5664 = arith.constant 5664 : index
    %c0_193 = arith.constant 0 : index
    %325 = vector.load %arg2[%c5664, %c0_193] : memref<5672x128xbf16, #tpu.memory_space<vmem>>, vector<2x4xbf16>
    %cst_194 = arith.constant dense<0.000000e+00> : vector<2x128xf32>
    %326 = tpu.matmul %325, %324, %cst_194 {dimension_numbers = #tpu.dot_dimension_numbers<[1], [0], [0], [1], [0, 0, 1, 1], [], []>} : vector<2x4xbf16>, vector<4x128xbf16>, vector<2x128xf32> -> vector<2x128xf32>
    %c0_195 = arith.constant 0 : index
    %c0_196 = arith.constant 0 : index
    %c0_197 = arith.constant 0 : index
    %327 = vector.load %arg4[%c0_195, %c0_196, %c0_197] : memref<1x2x128xf32, #tpu.memory_space<vmem>>, vector<1x2x128xf32>
    %328 = vector.shape_cast %327 : vector<1x2x128xf32> to vector<2x128xf32>
    %329 = vector.shape_cast %326 : vector<2x128xf32> to vector<1x2x128xf32>
    tpu.vector_store %arg4[%c0_195, %c0_196, %c0_197], %329 {strides = array<i32>} : memref<1x2x128xf32, #tpu.memory_space<vmem>>, vector<1x2x128xf32>,
    return
  }
  func.func @transform_0(%arg0: i32) -> (i32, i32, i32) {
    %c0_i32 = arith.constant 0 : i32
    %c0_i32_0 = arith.constant 0 : i32
    %c0_i32_1 = arith.constant 0 : i32
    return %arg0, %c0_i32, %c0_i32_0 : i32, i32, i32
  }
  func.func @transform_1(%arg0: i32) -> (i32, i32) {
    %c0_i32 = arith.constant 0 : i32
    %c0_i32_0 = arith.constant 0 : i32
    %c0_i32_1 = arith.constant 0 : i32
    return %c0_i32, %c0_i32_0 : i32, i32
  }
  func.func @transform_2(%arg0: i32) -> (i32, i32) {
    %c0_i32 = arith.constant 0 : i32
    %c0_i32_0 = arith.constant 0 : i32
    %c0_i32_1 = arith.constant 0 : i32
    return %c0_i32, %c0_i32_0 : i32, i32
  }
  func.func @transform_3(%arg0: i32) -> (i32, i32, i32) {
    %c0_i32 = arith.constant 0 : i32
    %c0_i32_0 = arith.constant 0 : i32
    %c0_i32_1 = arith.constant 0 : i32
    return %arg0, %c0_i32, %c0_i32_0 : i32, i32, i32
  }
}

</mosaic_0001>

<bundles_post_ra>
// kernel: resnet_forward.1
= control target key start
LH: loop header
LB: loop body
LE: loop exit
PB: predicated region body
PF: predicated region fallthrough
CT: control target
= control target key end

     0   :  { %s10727_s0 = inlined_call_operand.vmem [shape: bf16[1,128,128], index: 0, kind: input, shape index: {}]   ;;  %s10728_s1 = inlined_call_operand.vmem [shape: bf16[5672,128], index: 1, kind: input, shape index: {}]   ;;  %s10729_s2 = inlined_call_operand.vmem [shape: f32[16,128], index: 2, kind: input, shape index: {}]   ;;  %s10730_s3 = inlined_call_operand.hbm [shape: f32[1,2,128], index: 3, kind: output, shape index: {}]  }
   0x1   :  { %v8981_v0 = vld [vmem:[%s10727_s0 + $0x38] sm:$0xff]   ;;  %v8557_v1 = vld [vmem:[%s10727_s0 + $0x30] sm:$0xff]   ;;  %v8558_v2 = vld [vmem:[%s10727_s0 + $0x28] sm:$0xff]  }
   0x2   :  { %7458 = vmatprep.subr.bf16.mxu0 %v8981_v0  ;;  %7482 = vmatprep.subr.bf16.mxu1 %v8981_v0  ;;  %v8559_v3 = vld [vmem:[%s10727_s0 + $0x20] sm:$0xff]   ;;  %v8560_v6 = vld [vmem:[%s10727_s0 + $0x18] sm:$0xff]   ;;  %v8561_v7 = vld [vmem:[%s10727_s0 + $0x10] sm:$0xff]  }
   0x3   :  { %7459 = vmatpush3.bf16.msra.mxu0 %v8981_v0  ;;  %7483 = vmatpush3.bf16.msra.mxu1 %v8981_v0  ;;  %v8564_v4 = vld [vmem:[%s10728_s1] sm:$0xff]   ;;  %v8562_v8 = vld [vmem:[%s10727_s0 + $0x8] sm:$0xff]   ;;  %v8572_v10 = vld [vmem:[%s10728_s1 + $0xb8] sm:$0xff]  }
   0x4   :  { %7460 = vmatprep.subr.bf16.mxu0 %v8557_v1  ;;  %7484 = vmatprep.subr.bf16.mxu1 %v8557_v1  ;;  %v8565_v5 = vld [vmem:[%s10728_s1 + $0x60] sm:$0xff]   ;;  %v8573_v11 = vld [vmem:[%s10728_s1 + $0x58] sm:$0xff]   ;;  %v8566_v12 = vld [vmem:[%s10728_s1 + $0x8] sm:$0xff]  }
   0x5   :  { %7474 = vmatprep.mubr.bf16.mxu0 %v8564_v4  ;;  %7498 = vmatprep.mubr.bf16.mxu1 %v8565_v5  ;;  %v8563_v9 = vld [vmem:[%s10727_s0] sm:$0xff]   ;;  %v8567_v13 = vld [vmem:[%s10728_s1 + $0x68] sm:$0xff]   ;;  %v8568_v14 = vld [vmem:[%s10728_s1 + $0x10] sm:$0xff]  }
   0x6   :  { %v8569_v15 = vld [vmem:[%s10728_s1 + $0x70] sm:$0xff]   ;;  %v8576_v18 = vld [vmem:[%s10728_s1 + $0xa8] sm:$0xff]   ;;  %v8570_v20 = vld [vmem:[%s10728_s1 + $0x18] sm:$0xff]  }
   0x7   :  { %7461 = vmatpush3.bf16.msra.mxu0 %v8557_v1  ;;  %7485 = vmatpush3.bf16.msra.mxu1 %v8557_v1  ;;  %v8574_v16 = vld [vmem:[%s10728_s1 + $0xb0] sm:$0xff]   ;;  %v8577_v19 = vld [vmem:[%s10728_s1 + $0x48] sm:$0xff]   ;;  %v8571_v21 = vld [vmem:[%s10728_s1 + $0x78] sm:$0xff]  }
   0x8   :  { %7462 = vmatprep.subr.bf16.mxu0 %v8558_v2  ;;  %7486 = vmatprep.subr.bf16.mxu1 %v8558_v2  ;;  %v8575_v17 = vld [vmem:[%s10728_s1 + $0x50] sm:$0xff]   ;;  %v8578_v22 = vld [vmem:[%s10728_s1 + $0xa0] sm:$0xff]   ;;  %v8580_v24 = vld [vmem:[%s10728_s1 + $0x98] sm:$0xff]  }
   0x9   :  { %v8579_v23 = vld [vmem:[%s10728_s1 + $0x40] sm:$0xff]   ;;  %v8581_v25 = vld [vmem:[%s10728_s1 + $0x38] sm:$0xff]   ;;  %v8582_v26 = vld [vmem:[%s10728_s1 + $0x90] sm:$0xff]  }
   0xa   :  { %v8583_v27 = vld [vmem:[%s10728_s1 + $0x30] sm:$0xff]   ;;  %v8584_v28 = vld [vmem:[%s10728_s1 + $0x88] sm:$0xff]   ;;  %v8586_v30 = vld [vmem:[%s10728_s1 + $0x80] sm:$0xff]  }
   0xb   :  { %7463 = vmatpush3.bf16.msra.mxu0 %v8558_v2  ;;  %7487 = vmatpush3.bf16.msra.mxu1 %v8558_v2  ;;  %v8585_v29 = vld [vmem:[%s10728_s1 + $0x28] sm:$0xff]   ;;  %v8587_v31 = vld [vmem:[%s10728_s1 + $0x20] sm:$0xff]   ;;  %v8925_v48 = vld [vmem:[%s10727_s0 + $0x38] sm:$0xff]  }
   0xc   :  { %7464 = vmatprep.subr.bf16.mxu0 %v8559_v3  ;;  %7488 = vmatprep.subr.bf16.mxu1 %v8559_v3  ;;  %v8926_v49 = vld [vmem:[%s10727_s0 + $0x30] sm:$0xff]   ;;  %v8588_v52 = vld [vmem:[%s10728_s1 + $0xc0] sm:$0xff]   ;;  %v8927_v59 = vld [vmem:[%s10727_s0 + $0x28] sm:$0xff]  }
   0xd   :  { %v8928_v60 = vld [vmem:[%s10727_s0 + $0x20] sm:$0xff]  }
   0xf   :  { %7465 = vmatpush3.bf16.msra.mxu0 %v8559_v3  ;;  %7489 = vmatpush3.bf16.msra.mxu1 %v8559_v3 }
  0x10   :  { %7466 = vmatprep.subr.bf16.mxu0 %v8560_v6  ;;  %7490 = vmatprep.subr.bf16.mxu1 %v8560_v6 }
  0x13   :  { %7467 = vmatpush3.bf16.msra.mxu0 %v8560_v6  ;;  %7491 = vmatpush3.bf16.msra.mxu1 %v8560_v6 }
  0x14   :  { %7468 = vmatprep.subr.bf16.mxu0 %v8561_v7  ;;  %7492 = vmatprep.subr.bf16.mxu1 %v8561_v7 }
  0x17   :  { %7469 = vmatpush3.bf16.msra.mxu0 %v8561_v7  ;;  %7493 = vmatpush3.bf16.msra.mxu1 %v8561_v7 }
  0x18   :  { %7470 = vmatprep.subr.bf16.mxu0 %v8562_v8  ;;  %7494 = vmatprep.subr.bf16.mxu1 %v8562_v8 }
  0x1b   :  { %7471 = vmatpush3.bf16.msra.mxu0 %v8562_v8  ;;  %7495 = vmatpush3.bf16.msra.mxu1 %v8562_v8 }
  0x1c   :  { %7472 = vmatprep.subr.bf16.mxu0 %v8563_v9  ;;  %7496 = vmatprep.subr.bf16.mxu1 %v8563_v9 }
  0x1f   :  { %7473 = vmatpush3.bf16.msra.mxu0 %v8563_v9  ;;  %7497 = vmatpush3.bf16.msra.mxu1 %v8563_v9 }
  0x20   :  { %7506 = vmatprep.subr.bf16.mxu0 %v8572_v10  ;;  %7530 = vmatprep.subr.bf16.mxu1 %v8573_v11 }
  0x22   :  { %7475 = vmatmul.mubr.bf16.vlgmr.msra.gmra.mxu0 %v8566_v12  ;;  %7499 = vmatmul.mubr.bf16.vlgmr.msra.gmra.mxu1 %v8567_v13 }
  0x23   :  { %7478 = vmatprep.mubr.bf16.mxu0 %v8568_v14  ;;  %7502 = vmatprep.mubr.bf16.mxu1 %v8569_v15 }
  0x24   :  { %7507 = vmatpush3.bf16.msra.mxu0 %v8572_v10  ;;  %7531 = vmatpush3.bf16.msra.mxu1 %v8573_v11 }
  0x25   :  { %7508 = vmatprep.subr.bf16.mxu0 %v8574_v16  ;;  %7532 = vmatprep.subr.bf16.mxu1 %v8575_v17 }
  0x28   :  { %7509 = vmatpush3.bf16.msra.mxu0 %v8574_v16  ;;  %7533 = vmatpush3.bf16.msra.mxu1 %v8575_v17 }
  0x29   :  { %7510 = vmatprep.subr.bf16.mxu0 %v8576_v18  ;;  %7534 = vmatprep.subr.bf16.mxu1 %v8577_v19 }
  0x2a   :  { %7479 = vmatmul.mubr.bf16.gmra.mxu0 %v8570_v20  ;;  %7503 = vmatmul.mubr.bf16.gmra.mxu1 %v8571_v21 }
  0x2c   :  { %7511 = vmatpush3.bf16.msra.mxu0 %v8576_v18  ;;  %7535 = vmatpush3.bf16.msra.mxu1 %v8577_v19 }
  0x2d   :  { %7512 = vmatprep.subr.bf16.mxu0 %v8578_v22  ;;  %7536 = vmatprep.subr.bf16.mxu1 %v8579_v23 }
  0x30   :  { %7513 = vmatpush3.bf16.msra.mxu0 %v8578_v22  ;;  %7537 = vmatpush3.bf16.msra.mxu1 %v8579_v23 }
  0x31   :  { %7514 = vmatprep.subr.bf16.mxu0 %v8580_v24  ;;  %7538 = vmatprep.subr.bf16.mxu1 %v8581_v25 }
  0x34   :  { %7515 = vmatpush3.bf16.msra.mxu0 %v8580_v24  ;;  %7539 = vmatpush3.bf16.msra.mxu1 %v8581_v25 }
  0x35   :  { %7516 = vmatprep.subr.bf16.mxu0 %v8582_v26  ;;  %7540 = vmatprep.subr.bf16.mxu1 %v8583_v27 }
  0x38   :  { %7517 = vmatpush3.bf16.msra.mxu0 %v8582_v26  ;;  %7541 = vmatpush3.bf16.msra.mxu1 %v8583_v27 }
  0x39   :  { %7518 = vmatprep.subr.bf16.mxu0 %v8584_v28  ;;  %7542 = vmatprep.subr.bf16.mxu1 %v8585_v29 }
  0x3c   :  { %7519 = vmatpush3.bf16.msra.mxu0 %v8584_v28  ;;  %7543 = vmatpush3.bf16.msra.mxu1 %v8585_v29 }
  0x3d   :  { %7520 = vmatprep.subr.bf16.mxu0 %v8586_v30  ;;  %7544 = vmatprep.subr.bf16.mxu1 %v8587_v31 }
  0x40   :  { %7521 = vmatpush3.bf16.msra.mxu0 %v8586_v30  ;;  %7545 = vmatpush3.bf16.msra.mxu1 %v8587_v31 }
  0x41   :  { %7554 = vmatprep.subr.bf16.mxu0 %v8981_v0 }
  0xe2   :  { %v7476_v32 = vpop.f32.mrf.mxu0  ;;  %v7500_v33 = vpop.f32.mrf.mxu1 }
  0xe4   :  { %v146_v34 = vpop.f32.mrf.mxu0  ;;  %v263_v35 = vpop.f32.mrf.mxu1 }
  0xe6   :  { %v7477_v36 = vpop.f32.mrf.mxu0  ;;  %v7501_v37 = vpop.f32.mrf.mxu1 }
  0xe7   :  { %v178_v38 = vpack.c.bf16 %v7477_v36, %v7476_v32  ;;  %v295_v43 = vpack.c.bf16 %v7501_v37, %v7500_v33 }
  0xe8   :  { %v149_v39 = vpop.f32.mrf.mxu0  ;;  %v266_v40 = vpop.f32.mrf.mxu1 }
  0xe9   :  { %v177_v41 = vpack.c.bf16 %v149_v39, %v146_v34  ;;  %v294_v42 = vpack.c.bf16 %v266_v40, %v263_v35 }
  0xea   :  { %v7480_v44 = vpop.f32.mrf.mxu0  ;;  %v7504_v45 = vpop.f32.mrf.mxu1 }
  0xeb   :  { %7522 = vmatprep.mubr.bf16.mxu0 %v294_v42  ;;  %7546 = vmatprep.mubr.bf16.mxu1 %v177_v41 }
  0xec   :  { %7523 = vmatmul.mubr.bf16.vlgmr.msra.gmra.mxu0 %v295_v43  ;;  %7547 = vmatmul.mubr.bf16.vlgmr.msra.gmra.mxu1 %v178_v38  ;;  %v162_v46 = vpop.f32.mrf.mxu0  ;;  %v279_v47 = vpop.f32.mrf.mxu1 }
  0xed   :  { %7555 = vmatpush3.bf16.msra.mxu0 %v8925_v48 }
  0xee   :  { %7556 = vmatprep.subr.bf16.mxu0 %v8926_v49  ;;  %v7481_v50 = vpop.f32.mrf.mxu0  ;;  %v7505_v51 = vpop.f32.mrf.mxu1 }
  0xef   :  { %v180_v53 = vpack.c.bf16 %v7481_v50, %v7480_v44  ;;  %v297_v54 = vpack.c.bf16 %v7505_v51, %v7504_v45 }
  0xf0   :  { %v165_v55 = vpop.f32.mrf.mxu0  ;;  %v282_v56 = vpop.f32.mrf.mxu1 }
  0xf1   :  { %7557 = vmatpush3.bf16.msra.mxu0 %v8926_v49  ;;  %v179_v57 = vpack.c.bf16 %v165_v55, %v162_v46  ;;  %v296_v58 = vpack.c.bf16 %v282_v56, %v279_v47 }
  0xf2   :  { %7558 = vmatprep.subr.bf16.mxu0 %v8927_v59 }
  0xf3   :  { %7526 = vmatprep.mubr.bf16.mxu0 %v296_v58  ;;  %7550 = vmatprep.mubr.bf16.mxu1 %v179_v57 }
  0xf4   :  { %7527 = vmatmul.mubr.bf16.gmra.mxu0 %v297_v54  ;;  %7551 = vmatmul.mubr.bf16.gmra.mxu1 %v180_v53 }
  0xf5   :  { %7559 = vmatpush3.bf16.msra.mxu0 %v8927_v59  ;;  %7570 = vmatprep.mubr.bf16.mxu0 %v8588_v52 }
  0xf6   :  { %7560 = vmatprep.subr.bf16.mxu0 %v8928_v60 }
  0xf7   :  { %8 = vsyncpa [#allocation3], 0  ;;  %v8929_v61 = vld [vmem:[%s10727_s0 + $0x18] sm:$0xff]   ;;  %v8930_v62 = vld [vmem:[%s10727_s0 + $0x10] sm:$0xff]   ;;  %vm817_vm0 = vcmask 523264   ;;  %vm1389_vm1 = vcmask 261120  }
  0xf8   :  { %v8931_v63 = vld [vmem:[%s10727_s0 + $0x8] sm:$0xff]   ;;  %v8932_v0 = vld [vmem:[%s10727_s0] sm:$0xff]   ;;  %v8590_v2 = vld [vmem:[%s10728_s1 + $0xd0] sm:$0xff]   ;;  %vm8956_vm2 = vmmov 0   ;;  %vm2337_vm3 = vcmask 15360   ;;  %vm2344_vm4 = vcmask 1040384  }
  0xf9   :  { %7561 = vmatpush3.bf16.msra.mxu0 %v8928_v60  ;;  %v8589_v1 = vld [vmem:[%s10728_s1 + $0xc8] sm:$0xff]   ;;  %v8591_v3 = vld [vmem:[%s10728_s1 + $0xd8] sm:$0xff]   ;;  %v8593_v5 = vld [vmem:[%s10728_s1 + $0x110] sm:$0xff]   ;;  %vm2901_vm5 = vcmask 130048   ;;  %vm4270_vm6 = vcmask 1043456   ;;  %vm4266_vm7 = vcmask 64512  }
  0xfa   :  { %7562 = vmatprep.subr.bf16.mxu0 %v8929_v61  ;;  %v8592_v4 = vld [vmem:[%s10728_s1 + $0x118] sm:$0xff]   ;;  %v8594_v6 = vld [vmem:[%s10728_s1 + $0x108] sm:$0xff]   ;;  %v8595_v7 = vld [vmem:[%s10728_s1 + $0x100] sm:$0xff]   ;;  %vm5614_vm8 = vcmask 1041408   ;;  %vm5610_vm9 = vcmask 31744  }
  0xfb   :  { %7578 = vmatprep.subr.bf16.mxu1 %v8592_v4  ;;  %v8596_v8 = vld [vmem:[%s10728_s1 + $0xf8] sm:$0xff]   ;;  %v8597_v9 = vld [vmem:[%s10728_s1 + $0xf0] sm:$0xff]   ;;  %v8598_v10 = vld [vmem:[%s10728_s1 + $0xe8] sm:$0xff]  }
  0xfc   :  { %7579 = vmatpush3.bf16.msra.mxu1 %v8592_v4  ;;  %v8599_v11 = vld [vmem:[%s10728_s1 + $0xe0] sm:$0xff]   ;;  %v8601_v33 = vld [vmem:[%s10728_s1 + $0x170] sm:$0xff]  }
  0xfd   :  { %7563 = vmatpush3.bf16.msra.mxu0 %v8929_v61  ;;  %7580 = vmatprep.subr.bf16.mxu1 %v8593_v5  ;;  %v8600_v32 = vld [vmem:[%s10728_s1 + $0x120] sm:$0xff]  }
  0xfe   :  { %7564 = vmatprep.subr.bf16.mxu0 %v8930_v62  ;;  %v6600_v45 = vld [vmem:[%s10729_s2] ss:$0 sm:$0xff] }
 0x100   :  { %7581 = vmatpush3.bf16.msra.mxu1 %v8593_v5 }
 0x101   :  { %7565 = vmatpush3.bf16.msra.mxu0 %v8930_v62  ;;  %7582 = vmatprep.subr.bf16.mxu1 %v8594_v6 }
 0x102   :  { %7566 = vmatprep.subr.bf16.mxu0 %v8931_v63 }
 0x104   :  { %7583 = vmatpush3.bf16.msra.mxu1 %v8594_v6 }
 0x105   :  { %7567 = vmatpush3.bf16.msra.mxu0 %v8931_v63  ;;  %7584 = vmatprep.subr.bf16.mxu1 %v8595_v7 }
 0x106   :  { %7568 = vmatprep.subr.bf16.mxu0 %v8932_v0 }
 0x108   :  { %7585 = vmatpush3.bf16.msra.mxu1 %v8595_v7 }
 0x109   :  { %7569 = vmatpush3.bf16.msra.mxu0 %v8932_v0  ;;  %7586 = vmatprep.subr.bf16.mxu1 %v8596_v8 }
 0x10c   :  { %7571 = vmatmul.mubr.bf16.vlgmr.msra.gmra.mxu0 %v8589_v1  ;;  %7587 = vmatpush3.bf16.msra.mxu1 %v8596_v8 }
 0x10d   :  { %7574 = vmatprep.mubr.bf16.mxu0 %v8590_v2  ;;  %7588 = vmatprep.subr.bf16.mxu1 %v8597_v9 }
 0x110   :  { %7589 = vmatpush3.bf16.msra.mxu1 %v8597_v9 }
 0x111   :  { %7590 = vmatprep.subr.bf16.mxu1 %v8598_v10 }
 0x114   :  { %7575 = vmatmul.mubr.bf16.gmra.mxu0 %v8591_v3  ;;  %7591 = vmatpush3.bf16.msra.mxu1 %v8598_v10 }
 0x115   :  { %7592 = vmatprep.subr.bf16.mxu1 %v8599_v11  ;;  %7610 = vmatprep.mubr.msk.bf16.mxu0 %vm817_vm0, %v8600_v32  ;;  %v8615_v32 = vld [vmem:[%s10728_s1 + $0x150] sm:$0xff]  }
 0x118   :  { %7593 = vmatpush3.bf16.msra.mxu1 %v8599_v11 }
 0x1ac   :  { %v7524_v12 = vpop.f32.mrf.mxu0  ;;  %v7548_v34 = vpop.f32.mrf.mxu1 }
 0x1ad   :  { %v518_v42 = vadd.f32 %v7548_v34, %v7524_v12  ;;  %v8616_v34 = vld [vmem:[%s10728_s1 + $0x148] sm:$0xff]  }
 0x1ae   :  { %v9141_v13 = vpop.f32.mrf.mxu0  ;;  %v509_v35 = vpop.f32.mrf.mxu1 }
 0x1af   :  { %v510_v8 = vadd.f32 %v509_v35, %v9141_v13  ;;  %v8609_v35 = vld [vmem:[%s10728_s1 + $0x190] sm:$0xff]  }
 0x1b0   :  { %v7525_v14 = vpop.f32.mrf.mxu0  ;;  %v7549_v36 = vpop.f32.mrf.mxu1 }
 0x1b1   :  { %v521_v47 = vadd.f32 %v7549_v36, %v7525_v14  ;;  %v8617_v36 = vld [vmem:[%s10728_s1 + $0x140] sm:$0xff]  }
 0x1b2   :  { %v399_v15 = vpop.f32.mrf.mxu0  ;;  %v512_v37 = vpop.f32.mrf.mxu1 }
 0x1b3   :  { %v513_v4 = vadd.f32 %v512_v37, %v399_v15  ;;  %v8610_v37 = vld [vmem:[%s10728_s1 + $0x188] sm:$0xff]  }
 0x1b4   :  { %v7528_v16 = vpop.f32.mrf.mxu0  ;;  %v7552_v38 = vpop.f32.mrf.mxu1 }
 0x1b5   :  { %v534_v52 = vadd.f32 %v7552_v38, %v7528_v16  ;;  %v8611_v38 = vld [vmem:[%s10728_s1 + $0x180] sm:$0xff]  }
 0x1b6   :  { %v412_v17 = vpop.f32.mrf.mxu0  ;;  %v525_v39 = vpop.f32.mrf.mxu1 }
 0x1b7   :  { %v526_v55 = vadd.f32 %v525_v39, %v412_v17  ;;  %v8618_v39 = vld [vmem:[%s10728_s1 + $0x138] sm:$0xff]  }
 0x1b8   :  { %v7529_v18 = vpop.f32.mrf.mxu0  ;;  %v7553_v40 = vpop.f32.mrf.mxu1 }
 0x1b9   :  { %v537_v60 = vadd.f32 %v7553_v40, %v7529_v18  ;;  %v8619_v40 = vld [vmem:[%s10728_s1 + $0x130] sm:$0xff]  }
 0x1ba   :  { %v415_v19 = vpop.f32.mrf.mxu0  ;;  %v528_v41 = vpop.f32.mrf.mxu1 }
 0x1bb   :  { %v529_v0 = vadd.f32 %v528_v41, %v415_v19  ;;  %v8622_v41 = vld [vmem:[%s10728_s1 + $0x208] sm:$0xff]  }
 0x1cc   :  { %v7572_v20 = vpop.f32.mrf.mxu0 }
 0x1ce   :  { %v606_v21 = vpop.f32.mrf.mxu0 }
 0x1d0   :  { %v7573_v22 = vpop.f32.mrf.mxu0 }
 0x1d1   :  { %v638_v25 = vpack.c.bf16 %v7573_v22, %v7572_v20 }
 0x1d2   :  { %v609_v23 = vpop.f32.mrf.mxu0 }
 0x1d3   :  { %v637_v24 = vpack.c.bf16 %v609_v23, %v606_v21  ;;  %v8604_v23 = vld [vmem:[%s10728_s1 + $0x1b8] sm:$0xff]  }
 0x1d4   :  { %v7576_v26 = vpop.f32.mrf.mxu0 }
 0x1d5   :  { %7594 = vmatprep.mubr.bf16.mxu1 %v637_v24  ;;  %v8612_v24 = vld [vmem:[%s10728_s1 + $0x168] sm:$0xff]  }
 0x1d6   :  { %v622_v27 = vpop.f32.mrf.mxu0  ;;  %7595 = vmatmul.mubr.bf16.vlgmr.msra.gmra.mxu1 %v638_v25  ;;  %v8602_v25 = vld [vmem:[%s10728_s1 + $0x128] sm:$0xff]  }
 0x1d8   :  { %v7577_v28 = vpop.f32.mrf.mxu0 }
 0x1d9   :  { %v640_v31 = vpack.c.bf16 %v7577_v28, %v7576_v26  ;;  %v8603_v26 = vld [vmem:[%s10728_s1 + $0x178] sm:$0xff]   ;;  %v8613_v28 = vld [vmem:[%s10728_s1 + $0x160] sm:$0xff]  }
 0x1da   :  { %v625_v29 = vpop.f32.mrf.mxu0 }
 0x1db   :  { %v639_v30 = vpack.c.bf16 %v625_v29, %v622_v27  ;;  %v8605_v27 = vld [vmem:[%s10728_s1 + $0x1b0] sm:$0xff]   ;;  %v8606_v29 = vld [vmem:[%s10728_s1 + $0x1a8] sm:$0xff]  }
 0x1dd   :  { %7598 = vmatprep.mubr.bf16.mxu1 %v639_v30  ;;  %v8614_v30 = vld [vmem:[%s10728_s1 + $0x158] sm:$0xff]  }
 0x1de   :  { %7599 = vmatmul.mubr.bf16.gmra.mxu1 %v640_v31  ;;  %v8607_v31 = vld [vmem:[%s10728_s1 + $0x1a0] sm:$0xff]  }
 0x1df   :  { %7622 = vmatprep.mubr.msk.bf16.mxu1 %vm817_vm0, %v8601_v33  ;;  %v8608_v33 = vld [vmem:[%s10728_s1 + $0x198] sm:$0xff]  }
 0x296   :  { %v7596_v43 = vpop.f32.mrf.mxu1 }
 0x297   :  { %v772_v44 = vadd.f32 %v7596_v43, %v518_v42 }
 0x298   :  { %v739_v46 = vpop.f32.mrf.mxu1 }
 0x299   :  { %v785_v49 = vadd.f32 %v6600_v45, %v772_v44  ;;  %v770_v14 = vadd.f32 %v739_v46, %v510_v8 }
 0x29a   :  { %v7597_v48 = vpop.f32.mrf.mxu1 }
 0x29b   :  { %v773_v50 = vadd.f32 %v7597_v48, %v521_v47  ;;  %v793_v56 = vmax.f32 %v785_v49, 0.0  ;;  %v783_v13 = vadd.f32 %v6600_v45, %v770_v14  ;;  %v8645_v14 = vld [vmem:[%s10728_s1 + $0x240] sm:$0xff]  }
 0x29c   :  { %v742_v51 = vpop.f32.mrf.mxu1 }
 0x29d   :  { %v786_v53 = vadd.f32 %v6600_v45, %v773_v50  ;;  %v771_v9 = vadd.f32 %v742_v51, %v513_v4  ;;  %v791_v21 = vmax.f32 %v783_v13, 0.0 }
 0x29e   :  { %v7600_v54 = vpop.f32.mrf.mxu1 }
 0x29f   :  { %v794_v57 = vmax.f32 %v786_v53, 0.0  ;;  %v776_v58 = vadd.f32 %v7600_v54, %v534_v52  ;;  %v784_v20 = vadd.f32 %v6600_v45, %v771_v9  ;;  %v8620_v53 = vld [vmem:[%s10728_s1 + $0x1c0] sm:$0xff]   ;;  %v8630_v9 = vld [vmem:[%s10728_s1 + $0x210] sm:$0xff]  }
 0x2a0   :  { %v755_v59 = vpop.f32.mrf.mxu1 }
 0x2a1   :  { %v9154_v61 = vpack.c.bf16 %v794_v57, %v793_v56  ;;  %v774_v62 = vadd.f32 %v755_v59, %v526_v55  ;;  %v789_v1 = vadd.f32 %v6600_v45, %v776_v58  ;;  %v792_v15 = vmax.f32 %v784_v20, 0.0  ;;  %v8623_v55 = vld [vmem:[%s10728_s1 + $0x200] sm:$0xff]   ;;  %v8621_v56 = vld [vmem:[%s10728_s1 + $0x1c8] sm:$0xff]   ;;  %v8624_v57 = vld [vmem:[%s10728_s1 + $0x1f8] sm:$0xff]  }
 0x2a2   :  { %v7601_v63 = vpop.f32.mrf.mxu1  ;;  %v8625_v58 = vld [vmem:[%s10728_s1 + $0x1f0] sm:$0xff]   ;;  %v8626_v59 = vld [vmem:[%s10728_s1 + $0x1e8] sm:$0xff]  }
 0x2a3   :  { %v777_v2 = vadd.f32 %v7601_v63, %v537_v60  ;;  %v787_v5 = vadd.f32 %v6600_v45, %v774_v62  ;;  %v797_v10 = vmax.f32 %v789_v1, 0.0  ;;  %v9171_v22 = vpack.c.bf16 %v792_v15, %v791_v21  ;;  %v8627_v60 = vld [vmem:[%s10728_s1 + $0x1e0] sm:$0xff]   ;;  %v8629_v62 = vld [vmem:[%s10728_s1 + $0x1d0] sm:$0xff]  }
 0x2a4   :  { %v758_v3 = vpop.f32.mrf.mxu1 }
 0x2a5   :  { %v790_v6 = vadd.f32 %v6600_v45, %v777_v2  ;;  %v775_v7 = vadd.f32 %v758_v3, %v529_v0  ;;  %v795_v16 = vmax.f32 %v787_v5, 0.0 }
 0x2a7   :  { %v798_v11 = vmax.f32 %v790_v6, 0.0  ;;  %v788_v12 = vadd.f32 %v6600_v45, %v775_v7 }
 0x2a9   :  { %v9157_v17 = vpack.c.bf16 %v798_v11, %v797_v10  ;;  %v796_v18 = vmax.f32 %v788_v12, 0.0  ;;  %v8642_v10 = vld [vmem:[%s10728_s1 + $0x258] sm:$0xff]   ;;  %v8643_v11 = vld [vmem:[%s10728_s1 + $0x250] sm:$0xff]   ;;  %v8644_v12 = vld [vmem:[%s10728_s1 + $0x248] sm:$0xff]  }
 0x2ab   :  { %v9159_v19 = vpack.c.bf16 %v796_v18, %v795_v16  ;;  %7602 = vmatprep.subr.bf16.mxu0 %v9157_v17  ;;  %7614 = vmatprep.subr.bf16.mxu1 %v9157_v17  ;;  %v8646_v16 = vld [vmem:[%s10728_s1 + $0x238] sm:$0xff]  }
 0x2ac   :  { %7603 = vmatpush3.bf16.msra.mxu0 %v9157_v17  ;;  %7615 = vmatpush3.bf16.msra.mxu1 %v9157_v17 }
 0x2ad   :  { %7604 = vmatprep.subr.bf16.mxu0 %v9159_v19  ;;  %7616 = vmatprep.subr.bf16.mxu1 %v9159_v19 }
 0x2b0   :  { %7605 = vmatpush3.bf16.msra.mxu0 %v9159_v19  ;;  %7617 = vmatpush3.bf16.msra.mxu1 %v9159_v19 }
 0x2b1   :  { %7606 = vmatprep.subr.bf16.mxu0 %v9154_v61  ;;  %7618 = vmatprep.subr.bf16.mxu1 %v9154_v61 }
 0x2b4   :  { %7607 = vmatpush3.bf16.msra.mxu0 %v9154_v61  ;;  %7619 = vmatpush3.bf16.msra.mxu1 %v9154_v61 }
 0x2b5   :  { %7608 = vmatprep.subr.bf16.mxu0 %v9171_v22  ;;  %7620 = vmatprep.subr.bf16.mxu1 %v9171_v22 }
 0x2b8   :  { %7609 = vmatpush3.bf16.msra.mxu0 %v9171_v22  ;;  %7621 = vmatpush3.bf16.msra.mxu1 %v9171_v22 }
 0x2b9   :  { %7626 = vmatprep.subr.bf16.mxu0 %v8604_v23  ;;  %7646 = vmatprep.subr.bf16.mxu1 %v8612_v24 }
 0x2bb   :  { %7611 = vmatmul.mubr.msk.bf16.vlgmr.msra.gmra.mxu0 %vm817_vm0, %v8602_v25  ;;  %7623 = vmatmul.mubr.msk.bf16.vlgmr.msra.gmra.mxu1 %vm817_vm0, %v8603_v26 }
 0x2bc   :  { %7627 = vmatpush3.bf16.msra.mxu0 %v8604_v23  ;;  %7647 = vmatpush3.bf16.msra.mxu1 %v8612_v24  ;;  %v6637_v24 = vld [vmem:[%s10729_s2 + $0x1] ss:$0 sm:$0xff] }
 0x2bd   :  { %7628 = vmatprep.subr.bf16.mxu0 %v8605_v27  ;;  %7648 = vmatprep.subr.bf16.mxu1 %v8613_v28 }
 0x2c0   :  { %7629 = vmatpush3.bf16.msra.mxu0 %v8605_v27  ;;  %7649 = vmatpush3.bf16.msra.mxu1 %v8613_v28 }
 0x2c1   :  { %7630 = vmatprep.subr.bf16.mxu0 %v8606_v29  ;;  %7650 = vmatprep.subr.bf16.mxu1 %v8614_v30 }
 0x2c4   :  { %7631 = vmatpush3.bf16.msra.mxu0 %v8606_v29  ;;  %7651 = vmatpush3.bf16.msra.mxu1 %v8614_v30 }
 0x2c5   :  { %7632 = vmatprep.subr.bf16.mxu0 %v8607_v31  ;;  %7652 = vmatprep.subr.bf16.mxu1 %v8615_v32 }
 0x2c8   :  { %7633 = vmatpush3.bf16.msra.mxu0 %v8607_v31  ;;  %7653 = vmatpush3.bf16.msra.mxu1 %v8615_v32 }
 0x2c9   :  { %7634 = vmatprep.subr.bf16.mxu0 %v8608_v33  ;;  %7654 = vmatprep.subr.bf16.mxu1 %v8616_v34 }
 0x2cc   :  { %7635 = vmatpush3.bf16.msra.mxu0 %v8608_v33  ;;  %7655 = vmatpush3.bf16.msra.mxu1 %v8616_v34 }
 0x2cd   :  { %7636 = vmatprep.subr.bf16.mxu0 %v8609_v35  ;;  %7656 = vmatprep.subr.bf16.mxu1 %v8617_v36 }
 0x2d0   :  { %7637 = vmatpush3.bf16.msra.mxu0 %v8609_v35  ;;  %7657 = vmatpush3.bf16.msra.mxu1 %v8617_v36 }
 0x2d1   :  { %7638 = vmatprep.subr.bf16.mxu0 %v8610_v37  ;;  %7658 = vmatprep.subr.bf16.mxu1 %v8618_v39 }
 0x2d4   :  { %7639 = vmatpush3.bf16.msra.mxu0 %v8610_v37  ;;  %7659 = vmatpush3.bf16.msra.mxu1 %v8618_v39 }
 0x2d5   :  { %7640 = vmatprep.subr.bf16.mxu0 %v8611_v38  ;;  %7660 = vmatprep.subr.bf16.mxu1 %v8619_v40 }
 0x2d8   :  { %7641 = vmatpush3.bf16.msra.mxu0 %v8611_v38  ;;  %7661 = vmatpush3.bf16.msra.mxu1 %v8619_v40 }
 0x2d9   :  { %7666 = vmatprep.subr.bf16.mxu0 %v9157_v17  ;;  %7678 = vmatprep.subr.bf16.mxu1 %v8622_v41 }
 0x37b   :  { %v7612_v42 = vpop.f32.mrf.mxu0  ;;  %v7624_v43 = vpop.f32.mrf.mxu1 }
 0x37d   :  { %v858_v44 = vpop.f32.mrf.mxu0  ;;  %v945_v45 = vpop.f32.mrf.mxu1 }
 0x37f   :  { %v7613_v46 = vpop.f32.mrf.mxu0  ;;  %v7625_v47 = vpop.f32.mrf.mxu1 }
 0x380   :  { %v874_v48 = vpack.c.bf16 %v7613_v46, %v7612_v42  ;;  %v9244_v54 = vpack.c.bf16 %v7625_v47, %v7624_v43  ;;  %v8631_v43 = vld [vmem:[%s10728_s1 + $0x218] sm:$0xff]   ;;  %v8633_v46 = vld [vmem:[%s10728_s1 + $0x268] sm:$0xff]   ;;  %v8635_v47 = vld [vmem:[%s10728_s1 + $0x2a0] sm:$0xff]  }
 0x381   :  { %v861_v49 = vpop.f32.mrf.mxu0  ;;  %v948_v50 = vpop.f32.mrf.mxu1 }
 0x382   :  { %v873_v51 = vpack.c.bf16 %v861_v49, %v858_v44  ;;  %v9239_v52 = vpack.c.bf16 %v948_v50, %v945_v45  ;;  %v8632_v44 = vld [vmem:[%s10728_s1 + $0x260] sm:$0xff]   ;;  %v8634_v45 = vld [vmem:[%s10728_s1 + $0x2a8] sm:$0xff]   ;;  %v8637_v49 = vld [vmem:[%s10728_s1 + $0x290] sm:$0xff]  }
 0x383   :  { %v8638_v50 = vld [vmem:[%s10728_s1 + $0x288] sm:$0xff]  }
 0x384   :  { %7642 = vmatprep.mubr.bf16.mxu0 %v9239_v52  ;;  %7662 = vmatprep.mubr.bf16.mxu1 %v873_v51  ;;  %v8639_v51 = vld [vmem:[%s10728_s1 + $0x280] sm:$0xff]  }
 0x385   :  { %7643 = vmatmul.mubr.bf16.vlgmr.msra.gmra.mxu0 %v9244_v54  ;;  %7663 = vmatmul.mubr.bf16.vlgmr.msra.gmra.mxu1 %v874_v48  ;;  %v8636_v48 = vld [vmem:[%s10728_s1 + $0x298] sm:$0xff]  }
 0x386   :  { %7667 = vmatpush3.bf16.msra.mxu0 %v9157_v17  ;;  %7674 = vmatprep.mubr.msk.bf16.mxu0 %vm817_vm0, %v8620_v53  ;;  %v8647_v17 = vld [vmem:[%s10728_s1 + $0x230] sm:$0xff]   ;;  %v8640_v53 = vld [vmem:[%s10728_s1 + $0x278] sm:$0xff]  }
 0x387   :  { %7668 = vmatprep.subr.bf16.mxu0 %v9159_v19  ;;  %7679 = vmatpush3.bf16.msra.mxu1 %v8622_v41 }
 0x388   :  { %7680 = vmatprep.subr.bf16.mxu1 %v8623_v55 }
 0x38a   :  { %7669 = vmatpush3.bf16.msra.mxu0 %v9159_v19 }
 0x38b   :  { %7670 = vmatprep.subr.bf16.mxu0 %v9154_v61  ;;  %7681 = vmatpush3.bf16.msra.mxu1 %v8623_v55  ;;  %v8641_v55 = vld [vmem:[%s10728_s1 + $0x270] sm:$0xff]  }
 0x38c   :  { %7682 = vmatprep.subr.bf16.mxu1 %v8624_v57 }
 0x38e   :  { %7671 = vmatpush3.bf16.msra.mxu0 %v9154_v61  ;;  %v8628_v61 = vld [vmem:[%s10728_s1 + $0x1d8] sm:$0xff]  }
 0x38f   :  { %7672 = vmatprep.subr.bf16.mxu0 %v9171_v22  ;;  %7683 = vmatpush3.bf16.msra.mxu1 %v8624_v57  ;;  %v8649_v57 = vld [vmem:[%s10728_s1 + $0x220] sm:$0xff]  }
 0x390   :  { %7684 = vmatprep.subr.bf16.mxu1 %v8625_v58 }
 0x392   :  { %7673 = vmatpush3.bf16.msra.mxu0 %v9171_v22 }
 0x393   :  { %7685 = vmatpush3.bf16.msra.mxu1 %v8625_v58  ;;  %v8660_v58 = vld [vmem:[%s10728_s1 + $0x2f8] sm:$0xff]  }
 0x394   :  { %7686 = vmatprep.subr.bf16.mxu1 %v8626_v59 }
 0x395   :  { %7675 = vmatmul.mubr.msk.bf16.vlgmr.msra.gmra.mxu0 %vm817_vm0, %v8621_v56  ;;  %v8648_v56 = vld [vmem:[%s10728_s1 + $0x228] sm:$0xff]  }
 0x396   :  { %7702 = vmatprep.mubr.msk.bf16.mxu0 %vm1389_vm1, %v8630_v9  ;;  %v8651_v9 = vld [vmem:[%s10728_s1 + $0x338] sm:$0xff]  }
 0x397   :  { %7687 = vmatpush3.bf16.msra.mxu1 %v8626_v59 }
 0x398   :  { %7688 = vmatprep.subr.bf16.mxu1 %v8627_v60 }
 0x39b   :  { %7689 = vmatpush3.bf16.msra.mxu1 %v8627_v60 }
 0x39c   :  { %7690 = vmatprep.subr.bf16.mxu1 %v8628_v61 }
 0x39f   :  { %7691 = vmatpush3.bf16.msra.mxu1 %v8628_v61 }
 0x3a0   :  { %7692 = vmatprep.subr.bf16.mxu1 %v8629_v62 }
 0x3a3   :  { %7693 = vmatpush3.bf16.msra.mxu1 %v8629_v62 }
 0x3a4   :  { %7734 = vmatprep.subr.bf16.mxu1 %v8642_v10 }
 0x445   :  { %v7644_v63 = vpop.f32.mrf.mxu0  ;;  %v7664_v18 = vpop.f32.mrf.mxu1 }
 0x446   :  { %v1166_v15 = vadd.f32 %v7664_v18, %v7644_v63  ;;  %v8659_v18 = vld [vmem:[%s10728_s1 + $0x300] sm:$0xff]  }
 0x447   :  { %v1060_v0 = vpop.f32.mrf.mxu0  ;;  %v1157_v20 = vpop.f32.mrf.mxu1 }
 0x448   :  { %v1158_v22 = vadd.f32 %v1157_v20, %v1060_v0  ;;  %v8662_v20 = vld [vmem:[%s10728_s1 + $0x2e8] sm:$0xff]  }
 0x449   :  { %v7645_v1 = vpop.f32.mrf.mxu0  ;;  %v7665_v19 = vpop.f32.mrf.mxu1 }
 0x44a   :  { %v1169_v26 = vadd.f32 %v7665_v19, %v7645_v1  ;;  %v8663_v19 = vld [vmem:[%s10728_s1 + $0x2e0] sm:$0xff]  }
 0x44b   :  { %v1063_v2 = vpop.f32.mrf.mxu0  ;;  %v1160_v13 = vpop.f32.mrf.mxu1 }
 0x44c   :  { %v1161_v29 = vadd.f32 %v1160_v13, %v1063_v2  ;;  %v8661_v2 = vld [vmem:[%s10728_s1 + $0x2f0] sm:$0xff]   ;;  %v8664_v13 = vld [vmem:[%s10728_s1 + $0x2d8] sm:$0xff]  }
 0x455   :  { %v7676_v3 = vpop.f32.mrf.mxu0 }
 0x457   :  { %v1226_v4 = vpop.f32.mrf.mxu0 }
 0x459   :  { %v7677_v5 = vpop.f32.mrf.mxu0 }
 0x45a   :  { %v1242_v8 = vpack.c.bf16 %v7677_v5, %v7676_v3 }
 0x45b   :  { %v1229_v6 = vpop.f32.mrf.mxu0 }
 0x45c   :  { %v1241_v7 = vpack.c.bf16 %v1229_v6, %v1226_v4 }
 0x45e   :  { %7694 = vmatprep.mubr.bf16.mxu1 %v1241_v7  ;;  %v8650_v7 = vld [vmem:[%s10728_s1 + $0x2b0] sm:$0xff]  }
 0x45f   :  { %7695 = vmatmul.mubr.bf16.vlgmr.msra.gmra.mxu1 %v1242_v8 }
 0x460   :  { %7735 = vmatpush3.bf16.msra.mxu1 %v8642_v10  ;;  %v8652_v10 = vld [vmem:[%s10728_s1 + $0x2b8] sm:$0xff]  }
 0x461   :  { %7736 = vmatprep.subr.bf16.mxu1 %v8643_v11 }
 0x464   :  { %7737 = vmatpush3.bf16.msra.mxu1 %v8643_v11  ;;  %v8653_v11 = vld [vmem:[%s10728_s1 + $0x330] sm:$0xff]  }
 0x465   :  { %7738 = vmatprep.subr.bf16.mxu1 %v8644_v12 }
 0x468   :  { %7739 = vmatpush3.bf16.msra.mxu1 %v8644_v12  ;;  %v8654_v12 = vld [vmem:[%s10728_s1 + $0x328] sm:$0xff]  }
 0x469   :  { %7740 = vmatprep.subr.bf16.mxu1 %v8645_v14 }
 0x46c   :  { %7741 = vmatpush3.bf16.msra.mxu1 %v8645_v14  ;;  %v8655_v14 = vld [vmem:[%s10728_s1 + $0x320] sm:$0xff]  }
 0x46d   :  { %7742 = vmatprep.subr.bf16.mxu1 %v8646_v16 }
 0x470   :  { %7743 = vmatpush3.bf16.msra.mxu1 %v8646_v16  ;;  %v8656_v16 = vld [vmem:[%s10728_s1 + $0x318] sm:$0xff]  }
 0x471   :  { %7744 = vmatprep.subr.bf16.mxu1 %v8647_v17 }
 0x474   :  { %7745 = vmatpush3.bf16.msra.mxu1 %v8647_v17  ;;  %v8658_v17 = vld [vmem:[%s10728_s1 + $0x308] sm:$0xff]  }
 0x475   :  { %7746 = vmatprep.subr.bf16.mxu1 %v8648_v56 }
 0x478   :  { %7747 = vmatpush3.bf16.msra.mxu1 %v8648_v56 }
 0x479   :  { %7748 = vmatprep.subr.bf16.mxu1 %v8649_v57 }
 0x47c   :  { %7749 = vmatpush3.bf16.msra.mxu1 %v8649_v57 }
 0x47d   :  { %7762 = vmatprep.subr.bf16.mxu1 %v8660_v58 }
 0x51f   :  { %v7696_v21 = vpop.f32.mrf.mxu1 }
 0x520   :  { %v1358_v23 = vadd.f32 %v7696_v21, %v1166_v15  ;;  %v8666_v15 = vld [vmem:[%s10728_s1 + $0x2c8] sm:$0xff]   ;;  %v8667_v21 = vld [vmem:[%s10728_s1 + $0x2c0] sm:$0xff]  }
 0x521   :  { %v1341_v25 = vpop.f32.mrf.mxu1 }
 0x522   :  { %v1356_v27 = vadd.f32 %v1341_v25, %v1158_v22  ;;  %v1367_v30 = vadd.f32 %v6637_v24, %v1358_v23 }
 0x523   :  { %v7697_v28 = vpop.f32.mrf.mxu1 }
 0x524   :  { %v1359_v31 = vadd.f32 %v7697_v28, %v1169_v26  ;;  %v1365_v33 = vadd.f32 %v6637_v24, %v1356_v27  ;;  %v1371_v36 = vmax.f32 %v1367_v30, 0.0 }
 0x525   :  { %v1344_v32 = vpop.f32.mrf.mxu1 }
 0x526   :  { %v1368_v34 = vadd.f32 %v6637_v24, %v1359_v31  ;;  %v1357_v35 = vadd.f32 %v1344_v32, %v1161_v29  ;;  %v1369_v39 = vmax.f32 %v1365_v33, 0.0  ;;  %v8955_v32 = vmov 0.0   ;;  %v8668_v33 = vld [vmem:[%s10728_s1 + $0x378] sm:$0xff]  }
 0x528   :  { %v1372_v37 = vmax.f32 %v1368_v34, 0.0  ;;  %v1366_v38 = vadd.f32 %v6637_v24, %v1357_v35  ;;  %v8669_v34 = vld [vmem:[%s10728_s1 + $0x370] sm:$0xff]   ;;  %v8670_v35 = vld [vmem:[%s10728_s1 + $0x368] sm:$0xff]  }
 0x52a   :  { %v9306_v40 = vpack.c.bf16 %v1372_v37, %v1371_v36  ;;  %v1370_v41 = vmax.f32 %v1366_v38, 0.0  ;;  %v8671_v36 = vld [vmem:[%s10728_s1 + $0x360] sm:$0xff]   ;;  %v8672_v37 = vld [vmem:[%s10728_s1 + $0x358] sm:$0xff]   ;;  %v8673_v38 = vld [vmem:[%s10728_s1 + $0x350] sm:$0xff]  }
 0x52c   :  { %v9308_v42 = vpack.c.bf16 %v1370_v41, %v1369_v39  ;;  %7698 = vmatprep.subr.bf16.mxu0 %v9306_v40  ;;  %v8674_v39 = vld [vmem:[%s10728_s1 + $0x348] sm:$0xff]  }
 0x52d   :  { %7699 = vmatpush3.bf16.msra.mxu0 %v9306_v40 }
 0x52e   :  { %7700 = vmatprep.subr.bf16.mxu0 %v9308_v42 }
 0x531   :  { %7701 = vmatpush3.bf16.msra.mxu0 %v9308_v42 }
 0x532   :  { %7706 = vmatprep.subr.bf16.mxu0 %v9306_v40 }
 0x534   :  { %7703 = vmatmul.mubr.msk.bf16.vlgmr.msra.gmra.mxu0 %vm1389_vm1, %v8631_v43 }
 0x535   :  { %7707 = vmatpush3.bf16.msra.mxu0 %v9306_v40  ;;  %7710 = vmatprep.mubr.msk.bf16.mxu0 %vm1389_vm1, %v8632_v44 }
 0x536   :  { %7708 = vmatprep.subr.bf16.mxu0 %v9308_v42 }
 0x539   :  { %7709 = vmatpush3.bf16.msra.mxu0 %v9308_v42 }
 0x53a   :  { %7714 = vmatprep.subr.bf16.mxu0 %v8634_v45 }
 0x53c   :  { %7711 = vmatmul.mubr.msk.bf16.vlgmr.msra.gmra.mxu0 %vm1389_vm1, %v8633_v46 }
 0x53d   :  { %7715 = vmatpush3.bf16.msra.mxu0 %v8634_v45 }
 0x53e   :  { %7716 = vmatprep.subr.bf16.mxu0 %v8635_v47 }
 0x541   :  { %7717 = vmatpush3.bf16.msra.mxu0 %v8635_v47 }
 0x542   :  { %7718 = vmatprep.subr.bf16.mxu0 %v8636_v48 }
 0x545   :  { %7719 = vmatpush3.bf16.msra.mxu0 %v8636_v48 }
 0x546   :  { %7720 = vmatprep.subr.bf16.mxu0 %v8637_v49 }
 0x549   :  { %7721 = vmatpush3.bf16.msra.mxu0 %v8637_v49  ;;  %v6674_v49 = vld [vmem:[%s10729_s2 + $0x2] ss:$0 sm:$0xff] }
 0x54a   :  { %7722 = vmatprep.subr.bf16.mxu0 %v8638_v50 }
 0x54d   :  { %7723 = vmatpush3.bf16.msra.mxu0 %v8638_v50 }
 0x54e   :  { %7724 = vmatprep.subr.bf16.mxu0 %v8639_v51 }
 0x551   :  { %7725 = vmatpush3.bf16.msra.mxu0 %v8639_v51 }
 0x552   :  { %7726 = vmatprep.subr.bf16.mxu0 %v8640_v53 }
 0x555   :  { %7727 = vmatpush3.bf16.msra.mxu0 %v8640_v53 }
 0x556   :  { %7728 = vmatprep.subr.bf16.mxu0 %v8641_v55 }
 0x559   :  { %7729 = vmatpush3.bf16.msra.mxu0 %v8641_v55 }
 0x55a   :  { %7754 = vmatprep.subr.bf16.mxu0 %v9306_v40 }
 0x5f4   :  { %v7704_v59 = vpop.f32.mrf.mxu0 }
 0x5f6   :  { %v1430_v60 = vpop.f32.mrf.mxu0 }
 0x5f8   :  { %v7705_v61 = vpop.f32.mrf.mxu0 }
 0x5f9   :  { %v1446_v0 = vpack.c.bf16 %v7705_v61, %v7704_v59 }
 0x5fa   :  { %v1433_v62 = vpop.f32.mrf.mxu0 }
 0x5fb   :  { %v1445_v63 = vpack.c.bf16 %v1433_v62, %v1430_v60 }
 0x5fc   :  { %v7712_v1 = vpop.f32.mrf.mxu0 }
 0x5fd   :  { %7750 = vmatprep.mubr.bf16.mxu1 %v1445_v63 }
 0x5fe   :  { %v1517_v3 = vpop.f32.mrf.mxu0  ;;  %7751 = vmatmul.mubr.bf16.vlgmr.msra.gmra.mxu1 %v1446_v0 }
 0x5ff   :  { %7763 = vmatpush3.bf16.msra.mxu1 %v8660_v58 }
 0x600   :  { %v7713_v4 = vpop.f32.mrf.mxu0  ;;  %7764 = vmatprep.subr.bf16.mxu1 %v8661_v2 }
 0x601   :  { %v1533_v8 = vpack.c.bf16 %v7713_v4, %v7712_v1  ;;  %v2061_v1 = vld [vmem:[%s10728_s1 + $0x3c0] sm:$0x1]  ;;  %v8677_v4 = vld [vmem:[%s10728_s1 + $0x3b0] sm:$0xff]  }
 0x602   :  { %v1520_v5 = vpop.f32.mrf.mxu0 }
 0x603   :  { %v1532_v6 = vpack.c.bf16 %v1520_v5, %v1517_v3  ;;  %7765 = vmatpush3.bf16.msra.mxu1 %v8661_v2  ;;  %v8675_v2 = vld [vmem:[%s10728_s1 + $0x340] sm:$0xff]   ;;  %v8676_v3 = vld [vmem:[%s10728_s1 + $0x3b8] sm:$0xff]   ;;  %v8678_v5 = vld [vmem:[%s10728_s1 + $0x3a8] sm:$0xff]  }
 0x604   :  { %7766 = vmatprep.subr.bf16.mxu1 %v8662_v20 }
 0x605   :  { %7730 = vmatprep.mubr.bf16.mxu0 %v1532_v6  ;;  %v8679_v6 = vld [vmem:[%s10728_s1 + $0x3a0] sm:$0xff]  }
 0x606   :  { %7731 = vmatmul.mubr.bf16.vlgmr.msra.gmra.mxu0 %v1533_v8  ;;  %v8681_v8 = vld [vmem:[%s10728_s1 + $0x390] sm:$0xff]  }
 0x607   :  { %7755 = vmatpush3.bf16.msra.mxu0 %v9306_v40  ;;  %7758 = vmatprep.mubr.msk.bf16.mxu0 %vm1389_vm1, %v8650_v7  ;;  %v8680_v7 = vld [vmem:[%s10728_s1 + $0x398] sm:$0xff]  }
 0x608   :  { %7756 = vmatprep.subr.bf16.mxu0 %v9308_v42  ;;  %7767 = vmatpush3.bf16.msra.mxu1 %v8662_v20 }
 0x609   :  { %7768 = vmatprep.subr.bf16.mxu1 %v8663_v19 }
 0x60b   :  { %7757 = vmatpush3.bf16.msra.mxu0 %v9308_v42 }
 0x60c   :  { %7782 = vmatprep.subr.bf16.mxu0 %v8651_v9  ;;  %7769 = vmatpush3.bf16.msra.mxu1 %v8663_v19 }
 0x60d   :  { %7770 = vmatprep.subr.bf16.mxu1 %v8664_v13 }
 0x60e   :  { %7759 = vmatmul.mubr.msk.bf16.vlgmr.msra.gmra.mxu0 %vm1389_vm1, %v8652_v10 }
 0x60f   :  { %7783 = vmatpush3.bf16.msra.mxu0 %v8651_v9  ;;  %7798 = vmatprep.mubr.bf16.mxu0 %v9239_v52  ;;  %v8657_v52 = vld [vmem:[%s10728_s1 + $0x310] sm:$0xff]   ;;  %v8682_v9 = vld [vmem:[%s10728_s1 + $0x388] sm:$0xff]  }
 0x610   :  { %7784 = vmatprep.subr.bf16.mxu0 %v8653_v11  ;;  %7771 = vmatpush3.bf16.msra.mxu1 %v8664_v13 }
 0x613   :  { %7785 = vmatpush3.bf16.msra.mxu0 %v8653_v11 }
 0x614   :  { %7786 = vmatprep.subr.bf16.mxu0 %v8654_v12 }
 0x617   :  { %7787 = vmatpush3.bf16.msra.mxu0 %v8654_v12 }
 0x618   :  { %7788 = vmatprep.subr.bf16.mxu0 %v8655_v14 }
 0x61b   :  { %7789 = vmatpush3.bf16.msra.mxu0 %v8655_v14 }
 0x61c   :  { %7790 = vmatprep.subr.bf16.mxu0 %v8656_v16 }
 0x61f   :  { %7791 = vmatpush3.bf16.msra.mxu0 %v8656_v16 }
 0x620   :  { %7792 = vmatprep.subr.bf16.mxu0 %v8657_v52 }
 0x623   :  { %7793 = vmatpush3.bf16.msra.mxu0 %v8657_v52  ;;  %v8683_v52 = vld [vmem:[%s10728_s1 + $0x380] sm:$0xff]  }
 0x624   :  { %7794 = vmatprep.subr.bf16.mxu0 %v8658_v17 }
 0x627   :  { %7795 = vmatpush3.bf16.msra.mxu0 %v8658_v17 }
 0x628   :  { %7796 = vmatprep.subr.bf16.mxu0 %v8659_v18 }
 0x62b   :  { %7797 = vmatpush3.bf16.msra.mxu0 %v8659_v18 }
 0x62c   :  { %7810 = vmatprep.subr.bf16.mxu0 %v8955_v32 }
 0x62e   :  { %7799 = vmatmul.mubr.bf16.vlgmr.msra.gmra.mxu0 %v9244_v54  ;;  %v8665_v54 = vld [vmem:[%s10728_s1 + $0x2d0] sm:$0xff]  }
 0x62f   :  { %7772 = vmatprep.subr.bf16.mxu1 %v8665_v54  ;;  %7826 = vmatprep.mubr.msk.bf16.mxu0 %vm8956_vm2, %v8955_v32 }
 0x630   :  { %7773 = vmatpush3.bf16.msra.mxu1 %v8665_v54  ;;  %7811 = vmatpush3.bf16.msra.mxu0 %v8668_v33 }
 0x631   :  { %7774 = vmatprep.subr.bf16.mxu1 %v8666_v15  ;;  %7812 = vmatprep.subr.bf16.mxu0 %v8955_v32 }
 0x634   :  { %7775 = vmatpush3.bf16.msra.mxu1 %v8666_v15  ;;  %7813 = vmatpush3.bf16.msra.mxu0 %v8669_v34 }
 0x635   :  { %7776 = vmatprep.subr.bf16.mxu1 %v8667_v21  ;;  %7814 = vmatprep.subr.bf16.mxu0 %v8955_v32 }
 0x638   :  { %7777 = vmatpush3.bf16.msra.mxu1 %v8667_v21  ;;  %7815 = vmatpush3.bf16.msra.mxu0 %v8670_v35 }
 0x639   :  { %7802 = vmatprep.subr.bf16.mxu1 %v8955_v32  ;;  %7816 = vmatprep.subr.bf16.mxu0 %v8955_v32 }
 0x63c   :  { %7817 = vmatpush3.bf16.msra.mxu0 %v8671_v36  ;;  %v8685_v36 = vld [vmem:[%s10728_s1 + $0x3cc] sm:$0xff]  }
 0x63d   :  { %7818 = vmatprep.subr.bf16.mxu0 %v8955_v32 }
 0x640   :  { %7819 = vmatpush3.bf16.msra.mxu0 %v8672_v37  ;;  %v6675_v37 = vld [vmem:[%s10729_s2 + $0x3] ss:$0 sm:$0xff] }
 0x641   :  { %7820 = vmatprep.subr.bf16.mxu0 %v8955_v32 }
 0x644   :  { %7821 = vmatpush3.bf16.msra.mxu0 %v8673_v38 }
 0x645   :  { %7822 = vmatprep.subr.bf16.mxu0 %v8955_v32 }
 0x648   :  { %7823 = vmatpush3.bf16.msra.mxu0 %v8674_v39 }
 0x649   :  { %7824 = vmatprep.subr.bf16.mxu0 %v8955_v32 }
 0x64c   :  { %7825 = vmatpush3.bf16.msra.mxu0 %v8675_v2  ;;  %v8690_v2 = vld [vmem:[%s10728_s1 + $0x454] sm:$0xff]  }
 0x6be   :  { %v7752_v40 = vpop.f32.mrf.mxu1 }
 0x6c0   :  { %v1729_v41 = vpop.f32.mrf.mxu1 }
 0x6c2   :  { %v7753_v42 = vpop.f32.mrf.mxu1 }
 0x6c4   :  { %v1732_v43 = vpop.f32.mrf.mxu1 }
 0x6c6   :  { %v7732_v22 = vpop.f32.mrf.mxu0 }
 0x6c7   :  { %v1738_v45 = vadd.f32 %v7752_v40, %v7732_v22 }
 0x6c8   :  { %v1632_v23 = vpop.f32.mrf.mxu0 }
 0x6c9   :  { %v1730_v51 = vadd.f32 %v1729_v41, %v1632_v23 }
 0x6ca   :  { %v7733_v24 = vpop.f32.mrf.mxu0 }
 0x6cb   :  { %v1741_v47 = vadd.f32 %v7753_v42, %v7733_v24  ;;  %v8684_v24 = vld [vmem:[%s10728_s1 + $0x3c4] sm:$0xff]  }
 0x6cc   :  { %v1635_v25 = vpop.f32.mrf.mxu0 }
 0x6cd   :  { %v1733_v53 = vadd.f32 %v1732_v43, %v1635_v25 }
 0x6ce   :  { %v7760_v26 = vpop.f32.mrf.mxu0 }
 0x6d0   :  { %v1798_v27 = vpop.f32.mrf.mxu0 }
 0x6d2   :  { %v7761_v28 = vpop.f32.mrf.mxu0 }
 0x6d3   :  { %v1814_v31 = vpack.c.bf16 %v7761_v28, %v7760_v26 }
 0x6d4   :  { %v1801_v29 = vpop.f32.mrf.mxu0 }
 0x6d5   :  { %v1813_v30 = vpack.c.bf16 %v1801_v29, %v1798_v27 }
 0x6d7   :  { %7778 = vmatprep.mubr.bf16.mxu1 %v1813_v30 }
 0x6d8   :  { %7779 = vmatmul.mubr.bf16.vlgmr.msra.gmra.mxu1 %v1814_v31 }
 0x6d9   :  { %7806 = vmatprep.mubr.msk.bf16.mxu1 %vm8956_vm2, %v8955_v32 }
 0x6ee   :  { %v7800_v17 = vpop.f32.mrf.mxu0 }
 0x6ef   :  { %v2053_v41 = vadd.f32 %v7800_v17, %v6675_v37 }
 0x6f0   :  { %v2044_v18 = vpop.f32.mrf.mxu0 }
 0x6f2   :  { %v7801_v20 = vpop.f32.mrf.mxu0 }
 0x6f3   :  { %v2056_v43 = vadd.f32 %v7801_v20, %v6675_v37 }
 0x6f4   :  { %v2047_v19 = vpop.f32.mrf.mxu0 }
 0x798   :  { %v7780_v44 = vpop.f32.mrf.mxu1 }
 0x799   :  { %v1930_v48 = vadd.f32 %v7780_v44, %v1738_v45 }
 0x79a   :  { %v1913_v46 = vpop.f32.mrf.mxu1 }
 0x79b   :  { %v9459_v57 = vadd.f32 %v6674_v49, %v1930_v48  ;;  %v1928_v58 = vadd.f32 %v1913_v46, %v1730_v51  ;;  %v2045_v48 = vadd.f32 %v6675_v37, %v2044_v18 }
 0x79c   :  { %v7781_v50 = vpop.f32.mrf.mxu1 }
 0x79d   :  { %v1931_v55 = vadd.f32 %v7781_v50, %v1741_v47  ;;  %v9467_v63 = vadd.f32 %v6674_v49, %v1928_v58 }
 0x79e   :  { %v1916_v56 = vpop.f32.mrf.mxu1 }
 0x79f   :  { %v9461_v59 = vadd.f32 %v6674_v49, %v1931_v55  ;;  %v1929_v60 = vadd.f32 %v1916_v56, %v1733_v53 }
 0x7a1   :  { %v2060_v61 = vpack.c.bf16 %v9461_v59, %v9459_v57  ;;  %v9465_v62 = vadd.f32 %v6674_v49, %v1929_v60  ;;  %v2048_v49 = vadd.f32 %v6675_v37, %v2047_v19 }
 0x7a3   :  { %7803 = vmatpush3.bf16.msra.mxu1 %v2060_v61  ;;  %v2059_v0 = vpack.c.bf16 %v9465_v62, %v9467_v63 }
 0x7a4   :  { %7804 = vmatprep.subr.bf16.mxu1 %v8955_v32 }
 0x7a7   :  { %7805 = vmatpush3.bf16.msra.mxu1 %v2059_v0  ;;  %v8688_v0 = vld [vmem:[%s10728_s1 + $0x45c] sm:$0xff]  }
 0x7a8   :  { %7830 = vmatprep.subr.bf16.mxu1 %v8955_v32 }
 0x7aa   :  { %7807 = vmatmul.mubr.msk.bf16.vlgmr.msra.gmra.mxu1 %vm1389_vm1, %v2061_v1  ;;  %v8689_v1 = vld [vmem:[%s10728_s1 + $0x414] sm:$0xff]  }
 0x7ab   :  { %7846 = vmatprep.mubr.msk.bf16.mxu1 %vm8956_vm2, %v8955_v32  ;;  %7831 = vmatpush3.bf16.msra.mxu1 %v8676_v3  ;;  %v8691_v3 = vld [vmem:[%s10728_s1 + $0x40c] sm:$0xff]  }
 0x7ac   :  { %7832 = vmatprep.subr.bf16.mxu1 %v8955_v32 }
 0x7af   :  { %7833 = vmatpush3.bf16.msra.mxu1 %v8677_v4  ;;  %v8692_v4 = vld [vmem:[%s10728_s1 + $0x44c] sm:$0xff]  }
 0x7b0   :  { %7834 = vmatprep.subr.bf16.mxu1 %v8955_v32 }
 0x7b3   :  { %7835 = vmatpush3.bf16.msra.mxu1 %v8678_v5  ;;  %v8693_v5 = vld [vmem:[%s10728_s1 + $0x404] sm:$0xff]  }
 0x7b4   :  { %7836 = vmatprep.subr.bf16.mxu1 %v8955_v32 }
 0x7b7   :  { %7837 = vmatpush3.bf16.msra.mxu1 %v8679_v6  ;;  %v8694_v6 = vld [vmem:[%s10728_s1 + $0x444] sm:$0xff]  }
 0x7b8   :  { %7838 = vmatprep.subr.bf16.mxu1 %v8955_v32 }
 0x7bb   :  { %7839 = vmatpush3.bf16.msra.mxu1 %v8680_v7  ;;  %v8695_v7 = vld [vmem:[%s10728_s1 + $0x3fc] sm:$0xff]  }
 0x7bc   :  { %7840 = vmatprep.subr.bf16.mxu1 %v8955_v32 }
 0x7bf   :  { %7841 = vmatpush3.bf16.msra.mxu1 %v8681_v8  ;;  %v8696_v8 = vld [vmem:[%s10728_s1 + $0x43c] sm:$0xff]  }
 0x7c0   :  { %7842 = vmatprep.subr.bf16.mxu1 %v8955_v32 }
 0x7c3   :  { %7843 = vmatpush3.bf16.msra.mxu1 %v8682_v9  ;;  %v8697_v9 = vld [vmem:[%s10728_s1 + $0x3f4] sm:$0xff]  }
 0x7c4   :  { %7844 = vmatprep.subr.bf16.mxu1 %v8955_v32 }
 0x7c7   :  { %7845 = vmatpush3.bf16.msra.mxu1 %v8683_v52  ;;  %v8703_v52 = vld [vmem:[%s10728_s1 + $0x3dc] sm:$0xff]  }
 0x7c8   :  { %7856 = vmatprep.subr.bf16.mxu1 %v8955_v32 }
 0x86a   :  { %v2099_v10 = vpop.f32.mrf.mxu1 }
 0x86b   :  { %v2105_v11 = vpack.c.bf16 %v2099_v10, %v2099_v10  ;;  %v8698_v10 = vld [vmem:[%s10728_s1 + $0x434] sm:$0xff]  }
 0x86c   :  { %v7808_v12 = vpop.f32.mrf.mxu1 }
 0x86d   :  { %7827 = vmatmul.mubr.bf16.vlgmr.msra.gmra.mxu0 %v2105_v11  ;;  %v8699_v11 = vld [vmem:[%s10728_s1 + $0x3ec] sm:$0xff]  }
 0x86e   :  { %v2102_v14 = vpop.f32.mrf.mxu1  ;;  %7852 = vmatprep.mubr.msk.bf16.mxu0 %vm2337_vm3, %v8684_v24  ;;  %v8700_v12 = vld [vmem:[%s10728_s1 + $0x42c] sm:$0xff]  }
 0x86f   :  { %v8701_v14 = vld [vmem:[%s10728_s1 + $0x3e4] sm:$0xff]  }
 0x870   :  { %v7809_v16 = vpop.f32.mrf.mxu1 }
 0x871   :  { %v8702_v16 = vld [vmem:[%s10728_s1 + $0x424] sm:$0xff]  }
 0x92d   :  { %v2204_v13 = vpop.f32.mrf.mxu0 }
 0x92e   :  { %v2210_v54 = vmax.f32 %v2204_v13, 0.0 }
 0x92f   :  { %v7828_v15 = vpop.f32.mrf.mxu0 }
 0x930   :  { %v2211_v21 = vpack.c.bf16 %v2210_v54, %v2210_v54 }
 0x931   :  { %v2207_v22 = vpop.f32.mrf.mxu0 }
 0x932   :  { %7847 = vmatmul.mubr.bf16.vlgmr.msra.gmra.mxu1 %v2211_v21  ;;  %v8705_v22 = vld [vmem:[%s10728_s1 + $0x4a4] sm:$0xff]  }
 0x933   :  { %v7829_v23 = vpop.f32.mrf.mxu0  ;;  %7860 = vmatprep.mubr.msk.bf16.mxu1 %vm8956_vm2, %v8955_v32 }
 0x9f2   :  { %v2310_v25 = vpop.f32.mrf.mxu1 }
 0x9f3   :  { %v6701_v26 = vmul.f32 -1.442695, %v2310_v25  ;;  %v8706_v25 = vld [vmem:[%s10728_s1 + $0x49c] sm:$0xff]  }
 0x9f4   :  { %v7848_v27 = vpop.f32.mrf.mxu1 }
 0x9f5   :  { %8909 = vpow2.f32 %v6701_v26  ;;  %v8704_v26 = vld [vmem:[%s10728_s1 + $0x464] sm:$0xff]   ;;  %v8707_v27 = vld [vmem:[%s10728_s1 + $0x494] sm:$0xff]  }
 0x9f6   :  { %v2313_v28 = vpop.f32.mrf.mxu1 }
 0x9f7   :  { %v8708_v28 = vld [vmem:[%s10728_s1 + $0x48c] sm:$0xff]  }
 0x9f8   :  { %v7849_v29 = vpop.f32.mrf.mxu1 }
 0x9f9   :  { %v8709_v29 = vld [vmem:[%s10728_s1 + $0x484] sm:$0xff]  }
 0xa02   :  { %v8910_v30 = vpop.eup %8909 }
 0xa03   :  { %v2319_v31 = vadd.f32 1.0, %v8910_v30  ;;  %v8710_v30 = vld [vmem:[%s10728_s1 + $0x47c] sm:$0xff]  }
 0xa05   :  { %8911 = vrcp.f32 %v2319_v31  ;;  %v8711_v31 = vld [vmem:[%s10728_s1 + $0x474] sm:$0xff]  }
 0xa12   :  { %v8912_v33 = vpop.eup %8911 }
 0xa13   :  { %v2326_v34 = vpack.c.bf16 %v8912_v33, %v8912_v33  ;;  %v8712_v33 = vld [vmem:[%s10728_s1 + $0x46c] sm:$0xff]  }
 0xa15   :  { %8552 = vmatprep.subr.msk.bf16.mxu0 %vm2344_vm4, %v2326_v34  ;;  %v2346_v35 = vsel %vm2344_vm4, %v2326_v34, 0 }
 0xa16   :  { %7851 = vmatpush3.bf16.msra.mxu0 %v2346_v35 }
 0xa17   :  { %7864 = vmatprep.subr.bf16.mxu0 %v8955_v32 }
 0xa19   :  { %7853 = vmatmul.mubr.msk.bf16.vlgmr.msra.gmra.mxu0 %vm2337_vm3, %v8685_v36 }
 0xa1a   :  { %7868 = vmatprep.mubr.msk.bf16.mxu0 %vm8956_vm2, %v8955_v32 }
 0xad9   :  { %v7854_v38 = vpop.f32.mrf.mxu0 }
 0xada   :  { %v2399_v39 = vmul.f32 %v7854_v38, %v9459_v57 }
 0xadb   :  { %v2382_v40 = vpop.f32.mrf.mxu0 }
 0xadc   :  { %v2403_v44 = vadd.f32 %v2399_v39, %v2053_v41  ;;  %v2397_v45 = vmul.f32 %v2382_v40, %v9467_v63  ;;  %v8687_v63 = vld [vmem:[%s10728_s1 + $0x41c] sm:$0xff]  }
 0xadd   :  { %v7855_v42 = vpop.f32.mrf.mxu0 }
 0xade   :  { %v2400_v46 = vmul.f32 %v7855_v42, %v9461_v59  ;;  %v2407_v53 = vmax.f32 %v2403_v44, 0.0  ;;  %v2401_v55 = vadd.f32 %v2397_v45, %v2045_v48 }
 0xadf   :  { %v2385_v47 = vpop.f32.mrf.mxu0 }
 0xae0   :  { %v2404_v50 = vadd.f32 %v2400_v46, %v2056_v43  ;;  %v2398_v51 = vmul.f32 %v2385_v47, %v9465_v62  ;;  %v2405_v61 = vmax.f32 %v2401_v55, 0.0  ;;  %v8686_v62 = vld [vmem:[%s10728_s1 + $0x3d4] sm:$0xff]   ;;  %v8722_v55 = vld [vmem:[%s10728_s1 + $0x4cc] sm:$0xff]  }
 0xae2   :  { %v2408_v56 = vmax.f32 %v2404_v50, 0.0  ;;  %v2402_v58 = vadd.f32 %v2398_v51, %v2048_v49  ;;  %v8715_v49 = vld [vmem:[%s10728_s1 + $0x4ec] sm:$0xff]   ;;  %v8716_v50 = vld [vmem:[%s10728_s1 + $0x4e4] sm:$0xff]   ;;  %v8718_v51 = vld [vmem:[%s10728_s1 + $0x4dc] sm:$0xff]  }
 0xae4   :  { %v9536_v57 = vpack.c.bf16 %v2408_v56, %v2407_v53  ;;  %v2406_v60 = vmax.f32 %v2402_v58, 0.0  ;;  %v8720_v53 = vld [vmem:[%s10728_s1 + $0x4d4] sm:$0xff]   ;;  %v8724_v56 = vld [vmem:[%s10728_s1 + $0x4c4] sm:$0xff]   ;;  %v8726_v58 = vld [vmem:[%s10728_s1 + $0x4bc] sm:$0xff]  }
 0xae6   :  { %7857 = vmatpush3.bf16.msra.mxu1 %v9536_v57  ;;  %7865 = vmatpush3.bf16.msra.mxu0 %v9536_v57  ;;  %v9542_v59 = vpack.c.bf16 %v2406_v60, %v2405_v61  ;;  %v6736_v61 = vld [vmem:[%s10729_s2 + $0x4] ss:$0 sm:$0xff] }
 0xae7   :  { %7858 = vmatprep.subr.bf16.mxu1 %v8955_v32  ;;  %7866 = vmatprep.subr.bf16.mxu0 %v8955_v32 }
 0xaea   :  { %7859 = vmatpush3.bf16.msra.mxu1 %v9542_v59  ;;  %7867 = vmatpush3.bf16.msra.mxu0 %v9542_v59 }
 0xaeb   :  { %7872 = vmatprep.subr.bf16.mxu1 %v8955_v32  ;;  %7892 = vmatprep.subr.bf16.mxu0 %v8955_v32 }
 0xaed   :  { %7861 = vmatmul.mubr.msk.bf16.vlgmr.msra.gmra.mxu1 %vm1389_vm1, %v8686_v62  ;;  %7869 = vmatmul.mubr.msk.bf16.vlgmr.msra.gmra.mxu0 %vm1389_vm1, %v8687_v63 }
 0xaee   :  { %7873 = vmatpush3.bf16.msra.mxu1 %v8688_v0  ;;  %7893 = vmatpush3.bf16.msra.mxu0 %v8689_v1 }
 0xaef   :  { %7874 = vmatprep.subr.bf16.mxu1 %v8955_v32  ;;  %7894 = vmatprep.subr.bf16.mxu0 %v8955_v32 }
 0xaf0   :  { %7888 = vmatprep.mubr.msk.bf16.mxu1 %vm8956_vm2, %v8955_v32  ;;  %7908 = vmatprep.mubr.msk.bf16.mxu0 %vm8956_vm2, %v8955_v32 }
 0xaf2   :  { %7875 = vmatpush3.bf16.msra.mxu1 %v8690_v2  ;;  %7895 = vmatpush3.bf16.msra.mxu0 %v8691_v3 }
 0xaf3   :  { %7876 = vmatprep.subr.bf16.mxu1 %v8955_v32  ;;  %7896 = vmatprep.subr.bf16.mxu0 %v8955_v32 }
 0xaf6   :  { %7877 = vmatpush3.bf16.msra.mxu1 %v8692_v4  ;;  %7897 = vmatpush3.bf16.msra.mxu0 %v8693_v5 }
 0xaf7   :  { %7878 = vmatprep.subr.bf16.mxu1 %v8955_v32  ;;  %7898 = vmatprep.subr.bf16.mxu0 %v8955_v32 }
 0xafa   :  { %7879 = vmatpush3.bf16.msra.mxu1 %v8694_v6  ;;  %7899 = vmatpush3.bf16.msra.mxu0 %v8695_v7  ;;  %v8713_v6 = vld [vmem:[%s10728_s1 + $0x4ac] sm:$0xff]   ;;  %v8714_v7 = vld [vmem:[%s10728_s1 + $0x4f4] sm:$0xff]  }
 0xafb   :  { %7880 = vmatprep.subr.bf16.mxu1 %v8955_v32  ;;  %7900 = vmatprep.subr.bf16.mxu0 %v8955_v32 }
 0xafe   :  { %7881 = vmatpush3.bf16.msra.mxu1 %v8696_v8  ;;  %7901 = vmatpush3.bf16.msra.mxu0 %v8697_v9  ;;  %v8717_v8 = vld [vmem:[%s10728_s1 + $0x534] sm:$0xff]   ;;  %v8719_v9 = vld [vmem:[%s10728_s1 + $0x52c] sm:$0xff]  }
 0xaff   :  { %7882 = vmatprep.subr.bf16.mxu1 %v8955_v32  ;;  %7902 = vmatprep.subr.bf16.mxu0 %v8955_v32 }
 0xb02   :  { %7883 = vmatpush3.bf16.msra.mxu1 %v8698_v10  ;;  %7903 = vmatpush3.bf16.msra.mxu0 %v8699_v11  ;;  %v8721_v10 = vld [vmem:[%s10728_s1 + $0x524] sm:$0xff]   ;;  %v8723_v11 = vld [vmem:[%s10728_s1 + $0x51c] sm:$0xff]  }
 0xb03   :  { %7884 = vmatprep.subr.bf16.mxu1 %v8955_v32  ;;  %7904 = vmatprep.subr.bf16.mxu0 %v8955_v32 }
 0xb06   :  { %7885 = vmatpush3.bf16.msra.mxu1 %v8700_v12  ;;  %7905 = vmatpush3.bf16.msra.mxu0 %v8701_v14  ;;  %v8725_v12 = vld [vmem:[%s10728_s1 + $0x514] sm:$0xff]   ;;  %v8727_v14 = vld [vmem:[%s10728_s1 + $0x50c] sm:$0xff]  }
 0xb07   :  { %7886 = vmatprep.subr.bf16.mxu1 %v8955_v32  ;;  %7906 = vmatprep.subr.bf16.mxu0 %v8955_v32 }
 0xb0a   :  { %7887 = vmatpush3.bf16.msra.mxu1 %v8702_v16  ;;  %7907 = vmatpush3.bf16.msra.mxu0 %v8703_v52  ;;  %v8728_v16 = vld [vmem:[%s10728_s1 + $0x4b4] sm:$0xff]   ;;  %v8729_v52 = vld [vmem:[%s10728_s1 + $0x504] sm:$0xff]  }
 0xb0b   :  { %7912 = vmatprep.subr.bf16.mxu1 %v8955_v32  ;;  %7920 = vmatprep.subr.bf16.mxu0 %v8955_v32 }
 0xbad   :  { %v2455_v17 = vpop.f32.mrf.mxu1  ;;  %v2523_v18 = vpop.f32.mrf.mxu0 }
 0xbaf   :  { %v7862_v20 = vpop.f32.mrf.mxu1  ;;  %v7870_v19 = vpop.f32.mrf.mxu0 }
 0xbb1   :  { %v2458_v13 = vpop.f32.mrf.mxu1  ;;  %v2526_v54 = vpop.f32.mrf.mxu0 }
 0xbb2   :  { %v2462_v15 = vpack.c.bf16 %v2458_v13, %v2455_v17  ;;  %v9624_v21 = vpack.c.bf16 %v2526_v54, %v2523_v18  ;;  %v8731_v17 = vld [vmem:[%s10728_s1 + $0x4fc] sm:$0xff]  }
 0xbb3   :  { %v7871_v23 = vpop.f32.mrf.mxu0  ;;  %v7863_v24 = vpop.f32.mrf.mxu1  ;;  %v8730_v13 = vld [vmem:[%s10728_s1 + $0x5bc] sm:$0xff]  }
 0xbb4   :  { %7889 = vmatmul.mubr.bf16.vlgmr.msra.gmra.mxu1 %v9624_v21  ;;  %7909 = vmatmul.mubr.bf16.vlgmr.msra.gmra.mxu0 %v2462_v15  ;;  %v8732_v23 = vld [vmem:[%s10728_s1 + $0x5b4] sm:$0xff]  }
 0xbb5   :  { %7913 = vmatpush3.bf16.msra.mxu1 %v9536_v57  ;;  %7916 = vmatprep.mubr.msk.bf16.mxu1 %vm8956_vm2, %v8955_v32 }
 0xbb6   :  { %7914 = vmatprep.subr.bf16.mxu1 %v8955_v32  ;;  %7921 = vmatpush3.bf16.msra.mxu0 %v8705_v22 }
 0xbb7   :  { %7922 = vmatprep.subr.bf16.mxu0 %v8955_v32  ;;  %7936 = vmatprep.mubr.msk.bf16.mxu0 %vm8956_vm2, %v8955_v32 }
 0xbb9   :  { %7915 = vmatpush3.bf16.msra.mxu1 %v9542_v59 }
 0xbba   :  { %7923 = vmatpush3.bf16.msra.mxu0 %v8706_v25  ;;  %7940 = vmatprep.subr.bf16.mxu1 %v8955_v32 }
 0xbbb   :  { %7924 = vmatprep.subr.bf16.mxu0 %v8955_v32 }
 0xbbc   :  { %7917 = vmatmul.mubr.msk.bf16.vlgmr.msra.gmra.mxu1 %vm1389_vm1, %v8704_v26  ;;  %v8733_v26 = vld [vmem:[%s10728_s1 + $0x5ac] sm:$0xff]  }
 0xbbd   :  { %7942 = vmatprep.mubr.msk.bf16.mxu1 %vm8956_vm2, %v8955_v32 }
 0xbbe   :  { %7925 = vmatpush3.bf16.msra.mxu0 %v8707_v27 }
 0xbbf   :  { %7926 = vmatprep.subr.bf16.mxu0 %v8955_v32 }
 0xbc2   :  { %7927 = vmatpush3.bf16.msra.mxu0 %v8708_v28 }
 0xbc3   :  { %7928 = vmatprep.subr.bf16.mxu0 %v8955_v32 }
 0xbc6   :  { %7929 = vmatpush3.bf16.msra.mxu0 %v8709_v29  ;;  %v8734_v29 = vld [vmem:[%s10728_s1 + $0x5a4] sm:$0xff]  }
 0xbc7   :  { %7930 = vmatprep.subr.bf16.mxu0 %v8955_v32 }
 0xbca   :  { %7931 = vmatpush3.bf16.msra.mxu0 %v8710_v30  ;;  %v8735_v30 = vld [vmem:[%s10728_s1 + $0x53c] sm:$0xff]  }
 0xbcb   :  { %7932 = vmatprep.subr.bf16.mxu0 %v8955_v32 }
 0xbce   :  { %7933 = vmatpush3.bf16.msra.mxu0 %v8711_v31  ;;  %v8736_v31 = vld [vmem:[%s10728_s1 + $0x59c] sm:$0xff]  }
 0xbcf   :  { %7934 = vmatprep.subr.bf16.mxu0 %v8955_v32 }
 0xbd2   :  { %7935 = vmatpush3.bf16.msra.mxu0 %v8712_v33  ;;  %v8740_v33 = vld [vmem:[%s10728_s1 + $0x57c] sm:$0xff]  }
 0xbd3   :  { %7972 = vmatprep.subr.bf16.mxu0 %v8955_v32 }
 0xc74   :  { %v2629_v34 = vpop.f32.mrf.mxu1  ;;  %v2718_v35 = vpop.f32.mrf.mxu0 }
 0xc75   :  { %v2719_v36 = vadd.f32 %v2718_v35, %v2629_v34  ;;  %v8737_v34 = vld [vmem:[%s10728_s1 + $0x594] sm:$0xff]  }
 0xc76   :  { %v7890_v37 = vpop.f32.mrf.mxu1  ;;  %v7910_v38 = vpop.f32.mrf.mxu0  ;;  %v8741_v35 = vld [vmem:[%s10728_s1 + $0x574] sm:$0xff]  }
 0xc77   :  { %v8739_v37 = vld [vmem:[%s10728_s1 + $0x584] sm:$0xff]   ;;  %v8742_v38 = vld [vmem:[%s10728_s1 + $0x56c] sm:$0xff]  }
 0xc78   :  { %v2632_v39 = vpop.f32.mrf.mxu1  ;;  %v2721_v40 = vpop.f32.mrf.mxu0 }
 0xc79   :  { %v2722_v41 = vadd.f32 %v2721_v40, %v2632_v39  ;;  %v8743_v39 = vld [vmem:[%s10728_s1 + $0x564] sm:$0xff]   ;;  %v8745_v40 = vld [vmem:[%s10728_s1 + $0x554] sm:$0xff]  }
 0xc7a   :  { %v7891_v42 = vpop.f32.mrf.mxu1  ;;  %v7911_v43 = vpop.f32.mrf.mxu0 }
 0xc7b   :  { %v8747_v42 = vld [vmem:[%s10728_s1 + $0x544] sm:$0xff]  }
 0xc7c   :  { %v2769_v44 = vpop.f32.mrf.mxu1 }
 0xc7e   :  { %v7918_v45 = vpop.f32.mrf.mxu1 }
 0xc80   :  { %v2772_v46 = vpop.f32.mrf.mxu1 }
 0xc81   :  { %v2776_v47 = vpack.c.bf16 %v2772_v46, %v2769_v44 }
 0xc82   :  { %v7919_v48 = vpop.f32.mrf.mxu1 }
 0xc83   :  { %7937 = vmatmul.mubr.bf16.vlgmr.msra.gmra.mxu0 %v2776_v47 }
 0xc84   :  { %7988 = vmatprep.mubr.msk.bf16.mxu0 %vm8956_vm2, %v8955_v32  ;;  %7973 = vmatpush3.bf16.msra.mxu0 %v8715_v49 }
 0xc85   :  { %7974 = vmatprep.subr.bf16.mxu0 %v8955_v32 }
 0xc88   :  { %7975 = vmatpush3.bf16.msra.mxu0 %v8716_v50 }
 0xc89   :  { %7976 = vmatprep.subr.bf16.mxu0 %v8955_v32 }
 0xc8c   :  { %7977 = vmatpush3.bf16.msra.mxu0 %v8718_v51 }
 0xc8d   :  { %7978 = vmatprep.subr.bf16.mxu0 %v8955_v32 }
 0xc90   :  { %7979 = vmatpush3.bf16.msra.mxu0 %v8720_v53 }
 0xc91   :  { %7980 = vmatprep.subr.bf16.mxu0 %v8955_v32 }
 0xc94   :  { %7981 = vmatpush3.bf16.msra.mxu0 %v8722_v55 }
 0xc95   :  { %7982 = vmatprep.subr.bf16.mxu0 %v8955_v32 }
 0xc98   :  { %7983 = vmatpush3.bf16.msra.mxu0 %v8724_v56 }
 0xc99   :  { %7984 = vmatprep.subr.bf16.mxu0 %v8955_v32 }
 0xc9c   :  { %7985 = vmatpush3.bf16.msra.mxu0 %v8726_v58 }
 0xc9d   :  { %7986 = vmatprep.subr.bf16.mxu0 %v8955_v32 }
 0xca0   :  { %7987 = vmatpush3.bf16.msra.mxu0 %v8728_v16 }
 0xca1   :  { %8018 = vmatprep.subr.bf16.mxu0 %v8955_v32 }
 0xd43   :  { %v2875_v57 = vpop.f32.mrf.mxu0 }
 0xd44   :  { %v2882_v60 = vadd.f32 %v2875_v57, %v2719_v36  ;;  %v8738_v36 = vld [vmem:[%s10728_s1 + $0x58c] sm:$0xff]  }
 0xd45   :  { %v7938_v59 = vpop.f32.mrf.mxu0 }
 0xd46   :  { %v2889_v63 = vadd.f32 %v6736_v61, %v2882_v60 }
 0xd47   :  { %v2878_v62 = vpop.f32.mrf.mxu0 }
 0xd48   :  { %v2883_v0 = vadd.f32 %v2878_v62, %v2722_v41  ;;  %v2891_v3 = vmax.f32 %v2889_v63, 0.0  ;;  %v8746_v41 = vld [vmem:[%s10728_s1 + $0x54c] sm:$0xff]  }
 0xd49   :  { %v7939_v1 = vpop.f32.mrf.mxu0 }
 0xd4a   :  { %v2890_v2 = vadd.f32 %v6736_v61, %v2883_v0  ;;  %v8748_v0 = vld [vmem:[%s10728_s1 + $0x5fc] sm:$0xff]   ;;  %v8749_v1 = vld [vmem:[%s10728_s1 + $0x5f4] sm:$0xff]  }
 0xd4c   :  { %v2892_v4 = vmax.f32 %v2890_v2, 0.0  ;;  %v8750_v2 = vld [vmem:[%s10728_s1 + $0x5ec] sm:$0xff]  }
 0xd4e   :  { %v2893_v5 = vpack.c.bf16 %v2892_v4, %v2891_v3  ;;  %v8751_v3 = vld [vmem:[%s10728_s1 + $0x5e4] sm:$0xff]   ;;  %v8752_v4 = vld [vmem:[%s10728_s1 + $0x5dc] sm:$0xff]  }
 0xd50   :  { %7941 = vmatpush3.bf16.msra.mxu1 %v2893_v5 }
 0xd51   :  { %7946 = vmatprep.subr.bf16.mxu1 %v8955_v32 }
 0xd53   :  { %7943 = vmatmul.mubr.msk.bf16.vlgmr.msra.gmra.mxu1 %vm2901_vm5, %v8713_v6  ;;  %v8754_v6 = vld [vmem:[%s10728_s1 + $0x5cc] sm:$0xff]  }
 0xd54   :  { %7947 = vmatpush3.bf16.msra.mxu1 %v2893_v5  ;;  %7948 = vmatprep.mubr.msk.bf16.mxu1 %vm8956_vm2, %v8955_v32 }
 0xd55   :  { %7952 = vmatprep.subr.bf16.mxu1 %v8955_v32 }
 0xd5b   :  { %7949 = vmatmul.mubr.msk.bf16.vlgmr.msra.gmra.mxu1 %vm2901_vm5, %v8714_v7 }
 0xd5c   :  { %7953 = vmatpush3.bf16.msra.mxu1 %v8717_v8  ;;  %7968 = vmatprep.mubr.msk.bf16.mxu1 %vm8956_vm2, %v8955_v32 }
 0xd5d   :  { %7954 = vmatprep.subr.bf16.mxu1 %v8955_v32 }
 0xd60   :  { %7955 = vmatpush3.bf16.msra.mxu1 %v8719_v9 }
 0xd61   :  { %7956 = vmatprep.subr.bf16.mxu1 %v8955_v32 }
 0xd64   :  { %7957 = vmatpush3.bf16.msra.mxu1 %v8721_v10  ;;  %v6767_v10 = vld [vmem:[%s10729_s2 + $0x5] ss:$0 sm:$0xff] }
 0xd65   :  { %7958 = vmatprep.subr.bf16.mxu1 %v8955_v32 }
 0xd68   :  { %7959 = vmatpush3.bf16.msra.mxu1 %v8723_v11 }
 0xd69   :  { %7960 = vmatprep.subr.bf16.mxu1 %v8955_v32 }
 0xd6c   :  { %7961 = vmatpush3.bf16.msra.mxu1 %v8725_v12 }
 0xd6d   :  { %7962 = vmatprep.subr.bf16.mxu1 %v8955_v32 }
 0xd70   :  { %7963 = vmatpush3.bf16.msra.mxu1 %v8727_v14 }
 0xd71   :  { %7964 = vmatprep.subr.bf16.mxu1 %v8955_v32 }
 0xd74   :  { %7965 = vmatpush3.bf16.msra.mxu1 %v8729_v52 }
 0xd75   :  { %7966 = vmatprep.subr.bf16.mxu1 %v8955_v32 }
 0xd78   :  { %7967 = vmatpush3.bf16.msra.mxu1 %v8731_v17 }
 0xd79   :  { %7992 = vmatprep.subr.bf16.mxu1 %v8955_v32 }
 0xe13   :  { %v2939_v18 = vpop.f32.mrf.mxu1 }
 0xe15   :  { %v7944_v20 = vpop.f32.mrf.mxu1 }
 0xe16   :  { %v8755_v20 = vld [vmem:[%s10728_s1 + $0x5c4] sm:$0xff]  }
 0xe17   :  { %v2942_v19 = vpop.f32.mrf.mxu1 }
 0xe18   :  { %v2946_v54 = vpack.c.bf16 %v2942_v19, %v2939_v18  ;;  %v3486_v18 = vld [vmem:[%s10728_s1 + $0x644] sm:$0x1]  ;;  %v8756_v19 = vld [vmem:[%s10728_s1 + $0x63c] sm:$0xff]  }
 0xe19   :  { %v7945_v15 = vpop.f32.mrf.mxu1 }
 0xe1a   :  { %7989 = vmatmul.mubr.bf16.vlgmr.msra.gmra.mxu0 %v2946_v54  ;;  %v8758_v54 = vld [vmem:[%s10728_s1 + $0x62c] sm:$0xff]   ;;  %v8759_v15 = vld [vmem:[%s10728_s1 + $0x624] sm:$0xff]  }
 0xe1b   :  { %8019 = vmatpush3.bf16.msra.mxu0 %v8730_v13  ;;  %v3007_v22 = vpop.f32.mrf.mxu1  ;;  %8034 = vmatprep.mubr.msk.bf16.mxu0 %vm8956_vm2, %v8955_v32  ;;  %v8757_v13 = vld [vmem:[%s10728_s1 + $0x634] sm:$0xff]  }
 0xe1c   :  { %8020 = vmatprep.subr.bf16.mxu0 %v8955_v32 }
 0xe1d   :  { %v7950_v24 = vpop.f32.mrf.mxu1 }
 0xe1e   :  { %v8762_v24 = vld [vmem:[%s10728_s1 + $0x60c] sm:$0xff]  }
 0xe1f   :  { %8021 = vmatpush3.bf16.msra.mxu0 %v8732_v23  ;;  %v3010_v25 = vpop.f32.mrf.mxu1  ;;  %v8761_v23 = vld [vmem:[%s10728_s1 + $0x614] sm:$0xff]  }
 0xe20   :  { %v3014_v27 = vpack.c.bf16 %v3010_v25, %v3007_v22  ;;  %8022 = vmatprep.subr.bf16.mxu0 %v8955_v32  ;;  %v8760_v22 = vld [vmem:[%s10728_s1 + $0x61c] sm:$0xff]  }
 0xe21   :  { %v7951_v28 = vpop.f32.mrf.mxu1 }
 0xe22   :  { %7969 = vmatmul.mubr.bf16.vlgmr.msra.gmra.mxu1 %v3014_v27 }
 0xe23   :  { %7993 = vmatpush3.bf16.msra.mxu1 %v2893_v5  ;;  %8023 = vmatpush3.bf16.msra.mxu0 %v8733_v26  ;;  %v8753_v5 = vld [vmem:[%s10728_s1 + $0x5d4] sm:$0xff]  }
 0xe24   :  { %8024 = vmatprep.subr.bf16.mxu0 %v8955_v32  ;;  %7994 = vmatprep.mubr.msk.bf16.mxu1 %vm8956_vm2, %v8955_v32 }
 0xe25   :  { %7998 = vmatprep.subr.bf16.mxu1 %v8955_v32 }
 0xe27   :  { %8025 = vmatpush3.bf16.msra.mxu0 %v8734_v29 }
 0xe28   :  { %8026 = vmatprep.subr.bf16.mxu0 %v8955_v32 }
 0xe2a   :  { %7995 = vmatmul.mubr.msk.bf16.vlgmr.msra.gmra.mxu1 %vm2901_vm5, %v8735_v30  ;;  %v8763_v30 = vld [vmem:[%s10728_s1 + $0x604] sm:$0xff]  }
 0xe2b   :  { %8027 = vmatpush3.bf16.msra.mxu0 %v8736_v31  ;;  %7999 = vmatpush3.bf16.msra.mxu1 %v8740_v33 }
 0xe2c   :  { %8028 = vmatprep.subr.bf16.mxu0 %v8955_v32  ;;  %8000 = vmatprep.subr.bf16.mxu1 %v8955_v32 }
 0xe2d   :  { %8014 = vmatprep.mubr.msk.bf16.mxu1 %vm8956_vm2, %v8955_v32 }
 0xe2f   :  { %8029 = vmatpush3.bf16.msra.mxu0 %v8737_v34  ;;  %8001 = vmatpush3.bf16.msra.mxu1 %v8741_v35 }
 0xe30   :  { %8030 = vmatprep.subr.bf16.mxu0 %v8955_v32  ;;  %8002 = vmatprep.subr.bf16.mxu1 %v8955_v32 }
 0xe33   :  { %8031 = vmatpush3.bf16.msra.mxu0 %v8738_v36  ;;  %8003 = vmatpush3.bf16.msra.mxu1 %v8742_v38 }
 0xe34   :  { %8032 = vmatprep.subr.bf16.mxu0 %v8955_v32  ;;  %8004 = vmatprep.subr.bf16.mxu1 %v8955_v32 }
 0xe37   :  { %8033 = vmatpush3.bf16.msra.mxu0 %v8739_v37  ;;  %8005 = vmatpush3.bf16.msra.mxu1 %v8743_v39 }
 0xe38   :  { %8044 = vmatprep.subr.bf16.mxu0 %v8955_v32  ;;  %8006 = vmatprep.subr.bf16.mxu1 %v8955_v32 }
 0xe3a   :  { %8035 = vmatmul.mubr.bf16.vlgmr.msra.gmra.mxu0 %v9624_v21  ;;  %v8744_v21 = vld [vmem:[%s10728_s1 + $0x55c] sm:$0xff]  }
 0xe3b   :  { %8060 = vmatprep.mubr.msk.bf16.mxu0 %vm8956_vm2, %v8955_v32  ;;  %8007 = vmatpush3.bf16.msra.mxu1 %v8744_v21 }
 0xe3c   :  { %8008 = vmatprep.subr.bf16.mxu1 %v8955_v32  ;;  %8045 = vmatpush3.bf16.msra.mxu0 %v8748_v0 }
 0xe3d   :  { %8046 = vmatprep.subr.bf16.mxu0 %v8955_v32 }
 0xe3f   :  { %8009 = vmatpush3.bf16.msra.mxu1 %v8745_v40 }
 0xe40   :  { %8010 = vmatprep.subr.bf16.mxu1 %v8955_v32  ;;  %8047 = vmatpush3.bf16.msra.mxu0 %v8749_v1 }
 0xe41   :  { %8048 = vmatprep.subr.bf16.mxu0 %v8955_v32 }
 0xe43   :  { %8011 = vmatpush3.bf16.msra.mxu1 %v8746_v41 }
 0xe44   :  { %8012 = vmatprep.subr.bf16.mxu1 %v8955_v32  ;;  %8049 = vmatpush3.bf16.msra.mxu0 %v8750_v2  ;;  %v3809_v2 = vld [vmem:[%s10728_s1 + $0x650] sm:$0xf] }
 0xe45   :  { %8050 = vmatprep.subr.bf16.mxu0 %v8955_v32 }
 0xe47   :  { %8013 = vmatpush3.bf16.msra.mxu1 %v8747_v42 }
 0xe48   :  { %8038 = vmatprep.subr.bf16.mxu1 %v8955_v32  ;;  %8051 = vmatpush3.bf16.msra.mxu0 %v8751_v3  ;;  %v8766_v3 = vld [vmem:[%s10728_s1 + $0x68c] sm:$0xff]  }
 0xe49   :  { %8052 = vmatprep.subr.bf16.mxu0 %v8955_v32 }
 0xe4c   :  { %8053 = vmatpush3.bf16.msra.mxu0 %v8752_v4  ;;  %v8767_v4 = vld [vmem:[%s10728_s1 + $0x6c8] sm:$0xff]  }
 0xe4d   :  { %8054 = vmatprep.subr.bf16.mxu0 %v8955_v32 }
 0xe50   :  { %8055 = vmatpush3.bf16.msra.mxu0 %v8753_v5  ;;  %v8768_v5 = vld [vmem:[%s10728_s1 + $0x684] sm:$0xff]  }
 0xe51   :  { %8056 = vmatprep.subr.bf16.mxu0 %v8955_v32 }
 0xe54   :  { %8057 = vmatpush3.bf16.msra.mxu0 %v8754_v6  ;;  %v8769_v6 = vld [vmem:[%s10728_s1 + $0x6c0] sm:$0xff]  }
 0xe55   :  { %8058 = vmatprep.subr.bf16.mxu0 %v8955_v32 }
 0xe58   :  { %8059 = vmatpush3.bf16.msra.mxu0 %v8755_v20 }
 0xe59   :  { %8084 = vmatprep.subr.bf16.mxu0 %v8955_v32 }
 0xeda   :  { %v3202_v43 = vpop.f32.mrf.mxu0 }
 0xedc   :  { %v7990_v44 = vpop.f32.mrf.mxu0 }
 0xede   :  { %v3205_v45 = vpop.f32.mrf.mxu0 }
 0xee0   :  { %v7991_v46 = vpop.f32.mrf.mxu0 }
 0xee2   :  { %v3113_v47 = vpop.f32.mrf.mxu1 }
 0xee3   :  { %v3203_v48 = vadd.f32 %v3202_v43, %v3113_v47  ;;  %v8764_v47 = vld [vmem:[%s10728_s1 + $0x648] sm:$0xff]  }
 0xee4   :  { %v7970_v49 = vpop.f32.mrf.mxu1 }
 0xee6   :  { %v3116_v50 = vpop.f32.mrf.mxu1 }
 0xee7   :  { %v3206_v51 = vadd.f32 %v3205_v45, %v3116_v50 }
 0xee8   :  { %v7971_v53 = vpop.f32.mrf.mxu1 }
 0xeea   :  { %v3253_v55 = vpop.f32.mrf.mxu1 }
 0xeec   :  { %v7996_v56 = vpop.f32.mrf.mxu1 }
 0xeee   :  { %v3256_v58 = vpop.f32.mrf.mxu1 }
 0xeef   :  { %v3260_v57 = vpack.c.bf16 %v3256_v58, %v3253_v55 }
 0xef0   :  { %v7997_v60 = vpop.f32.mrf.mxu1 }
 0xef1   :  { %8015 = vmatmul.mubr.bf16.vlgmr.msra.gmra.mxu1 %v3260_v57 }
 0xef2   :  { %8040 = vmatprep.mubr.msk.bf16.mxu1 %vm8956_vm2, %v8955_v32 }
 0xefa   :  { %v9836_v61 = vpop.f32.mrf.mxu0 }
 0xefc   :  { %v8036_v59 = vpop.f32.mrf.mxu0 }
 0xefe   :  { %v9838_v62 = vpop.f32.mrf.mxu0 }
 0xf00   :  { %v8037_v63 = vpop.f32.mrf.mxu0 }
 0xfb1   :  { %v3359_v7 = vpop.f32.mrf.mxu1 }
 0xfb2   :  { %v3366_v9 = vadd.f32 %v3359_v7, %v3203_v48  ;;  %v6768_v48 = vld [vmem:[%s10729_s2 + $0x6] ss:$0 sm:$0xff]  ;;  %v8770_v7 = vld [vmem:[%s10728_s1 + $0x67c] sm:$0xff]  }
 0xfb3   :  { %v8016_v8 = vpop.f32.mrf.mxu1  ;;  %v3479_v53 = vadd.f32 %v6768_v48, %v9836_v61  ;;  %v3482_v56 = vadd.f32 %v6768_v48, %v9838_v62  ;;  %v3870_v61 = vld [vmem:[%s10728_s1 + $0x694] sm:$0xf] }
 0xfb4   :  { %v9871_v16 = vadd.f32 %v6767_v10, %v3366_v9  ;;  %v8765_v62 = vld [vmem:[%s10728_s1 + $0x6d0] sm:$0xff]   ;;  %v8771_v8 = vld [vmem:[%s10728_s1 + $0x6b8] sm:$0xff]  }
 0xfb5   :  { %v3362_v11 = vpop.f32.mrf.mxu1  ;;  %v8772_v9 = vld [vmem:[%s10728_s1 + $0x674] sm:$0xff]  }
 0xfb6   :  { %v3367_v12 = vadd.f32 %v3362_v11, %v3206_v51  ;;  %v8774_v11 = vld [vmem:[%s10728_s1 + $0x66c] sm:$0xff]  }
 0xfb7   :  { %v8017_v14 = vpop.f32.mrf.mxu1 }
 0xfb8   :  { %v9873_v52 = vadd.f32 %v6767_v10, %v3367_v12  ;;  %v8773_v10 = vld [vmem:[%s10728_s1 + $0x6b0] sm:$0xff]   ;;  %v8775_v12 = vld [vmem:[%s10728_s1 + $0x6a8] sm:$0xff]  }
 0xfb9   :  { %v8776_v14 = vld [vmem:[%s10728_s1 + $0x664] sm:$0xff]  }
 0xfba   :  { %v3485_v17 = vpack.c.bf16 %v9873_v52, %v9871_v16 }
 0xfbc   :  { %8039 = vmatpush3.bf16.msra.mxu1 %v3485_v17  ;;  %v8779_v17 = vld [vmem:[%s10728_s1 + $0x698] sm:$0xff]  }
 0xfbd   :  { %8064 = vmatprep.subr.bf16.mxu1 %v8955_v32 }
 0xfbf   :  { %8041 = vmatmul.mubr.msk.bf16.vlgmr.msra.gmra.mxu1 %vm2901_vm5, %v3486_v18  ;;  %v8780_v18 = vld [vmem:[%s10728_s1 + $0x654] sm:$0xff]  }
 0xfc0   :  { %8080 = vmatprep.mubr.msk.bf16.mxu1 %vm8956_vm2, %v8955_v32  ;;  %8065 = vmatpush3.bf16.msra.mxu1 %v8756_v19 }
 0xfc1   :  { %8066 = vmatprep.subr.bf16.mxu1 %v8955_v32 }
 0xfc4   :  { %8067 = vmatpush3.bf16.msra.mxu1 %v8757_v13 }
 0xfc5   :  { %8068 = vmatprep.subr.bf16.mxu1 %v8955_v32 }
 0xfc8   :  { %8069 = vmatpush3.bf16.msra.mxu1 %v8758_v54 }
 0xfc9   :  { %8070 = vmatprep.subr.bf16.mxu1 %v8955_v32 }
 0xfcc   :  { %8071 = vmatpush3.bf16.msra.mxu1 %v8759_v15  ;;  %v8781_v15 = vld [vmem:[%s10728_s1 + $0x714] sm:$0xff]  }
 0xfcd   :  { %8072 = vmatprep.subr.bf16.mxu1 %v8955_v32 }
 0xfd0   :  { %8073 = vmatpush3.bf16.msra.mxu1 %v8760_v22 }
 0xfd1   :  { %8074 = vmatprep.subr.bf16.mxu1 %v8955_v32 }
 0xfd4   :  { %8075 = vmatpush3.bf16.msra.mxu1 %v8761_v23 }
 0xfd5   :  { %8076 = vmatprep.subr.bf16.mxu1 %v8955_v32 }
 0xfd8   :  { %8077 = vmatpush3.bf16.msra.mxu1 %v8762_v24 }
 0xfd9   :  { %8078 = vmatprep.subr.bf16.mxu1 %v8955_v32 }
 0xfdc   :  { %8079 = vmatpush3.bf16.msra.mxu1 %v8763_v30  ;;  %v8783_v30 = vld [vmem:[%s10728_s1 + $0x704] sm:$0xff]  }
 0xfdd   :  { %8090 = vmatprep.subr.bf16.mxu1 %v8955_v32 }
0x107f   :  { %v3524_v25 = vpop.f32.mrf.mxu1 }
0x1080   :  { %v3530_v26 = vpack.c.bf16 %v3524_v25, %v3524_v25 }
0x1081   :  { %v8042_v27 = vpop.f32.mrf.mxu1 }
0x1082   :  { %8061 = vmatmul.mubr.bf16.vlgmr.msra.gmra.mxu0 %v3530_v26  ;;  %v8782_v26 = vld [vmem:[%s10728_s1 + $0x70c] sm:$0xff]  }
0x1083   :  { %v3527_v28 = vpop.f32.mrf.mxu1  ;;  %8086 = vmatprep.mubr.msk.bf16.mxu0 %vm8956_vm2, %v8955_v32 }
0x1085   :  { %v8043_v29 = vpop.f32.mrf.mxu1 }
0x1086   :  { %v4107_v29 = vld [vmem:[%s10728_s1 + $0x6d8] sm:$0xf] }
0x1142   :  { %v3629_v31 = vpop.f32.mrf.mxu0 }
0x1143   :  { %v3635_v33 = vmax.f32 %v3629_v31, 0.0  ;;  %v8784_v31 = vld [vmem:[%s10728_s1 + $0x6fc] sm:$0xff]  }
0x1144   :  { %v8062_v34 = vpop.f32.mrf.mxu0 }
0x1145   :  { %v3636_v35 = vpack.c.bf16 %v3635_v33, %v3635_v33  ;;  %v8785_v33 = vld [vmem:[%s10728_s1 + $0x6f4] sm:$0xff]   ;;  %v8786_v34 = vld [vmem:[%s10728_s1 + $0x6ec] sm:$0xff]  }
0x1146   :  { %v3632_v36 = vpop.f32.mrf.mxu0 }
0x1147   :  { %8081 = vmatmul.mubr.bf16.vlgmr.msra.gmra.mxu1 %v3636_v35  ;;  %v8787_v35 = vld [vmem:[%s10728_s1 + $0x6e4] sm:$0xff]   ;;  %v8788_v36 = vld [vmem:[%s10728_s1 + $0x6dc] sm:$0xff]  }
0x1148   :  { %v8063_v37 = vpop.f32.mrf.mxu0  ;;  %8092 = vmatprep.mubr.msk.bf16.mxu1 %vm8956_vm2, %v8955_v32 }
0x1207   :  { %v3735_v38 = vpop.f32.mrf.mxu1 }
0x1208   :  { %v6794_v39 = vmul.f32 -1.442695, %v3735_v38 }
0x1209   :  { %v8082_v21 = vpop.f32.mrf.mxu1 }
0x120a   :  { %8913 = vpow2.f32 %v6794_v39 }
0x120b   :  { %v3738_v40 = vpop.f32.mrf.mxu1 }
0x120d   :  { %v8083_v41 = vpop.f32.mrf.mxu1 }
0x1217   :  { %v8914_v42 = vpop.eup %8913 }
0x1218   :  { %v3744_v43 = vadd.f32 1.0, %v8914_v42 }
0x121a   :  { %8915 = vrcp.f32 %v3744_v43 }
0x1227   :  { %v8916_v44 = vpop.eup %8915 }
0x1228   :  { %v3749_v45 = vpack.c.bf16 %v8916_v44, %v8916_v44 }
0x122a   :  { %v3759_v46 = vsel %vm2344_vm4, %v3749_v45, 0 }
0x122b   :  { %8085 = vmatpush3.bf16.msra.mxu0 %v3759_v46 }
0x122c   :  { %8096 = vmatprep.subr.bf16.mxu0 %v8955_v32 }
0x122e   :  { %8087 = vmatmul.mubr.msk.bf16.vlgmr.msra.gmra.mxu0 %vm2337_vm3, %v8764_v47 }
0x122f   :  { %8098 = vmatprep.mubr.msk.bf16.mxu0 %vm8956_vm2, %v8955_v32 }
0x12ee   :  { %v3795_v49 = vpop.f32.mrf.mxu0 }
0x12ef   :  { %v3802_v50 = vmul.f32 %v3795_v49, %v9871_v16  ;;  %v8777_v16 = vld [vmem:[%s10728_s1 + $0x6a0] sm:$0xff]  }
0x12f0   :  { %v8088_v51 = vpop.f32.mrf.mxu0 }
0x12f1   :  { %v3804_v58 = vadd.f32 %v3802_v50, %v3479_v53  ;;  %v8789_v50 = vld [vmem:[%s10728_s1 + $0x758] sm:$0xff]   ;;  %v8790_v51 = vld [vmem:[%s10728_s1 + $0x750] sm:$0xff]   ;;  %v8792_v53 = vld [vmem:[%s10728_s1 + $0x748] sm:$0xff]  }
0x12f2   :  { %v3798_v55 = vpop.f32.mrf.mxu0 }
0x12f3   :  { %v3803_v57 = vmul.f32 %v3798_v55, %v9873_v52  ;;  %v3806_v63 = vmax.f32 %v3804_v58, 0.0  ;;  %v8778_v52 = vld [vmem:[%s10728_s1 + $0x65c] sm:$0xff]   ;;  %v8798_v58 = vld [vmem:[%s10728_s1 + $0x730] sm:$0xff]  }
0x12f4   :  { %v8089_v60 = vpop.f32.mrf.mxu0  ;;  %v8794_v55 = vld [vmem:[%s10728_s1 + $0x740] sm:$0xff]  }
0x12f5   :  { %v3805_v59 = vadd.f32 %v3803_v57, %v3482_v56  ;;  %v8796_v56 = vld [vmem:[%s10728_s1 + $0x738] sm:$0xff]   ;;  %v8800_v57 = vld [vmem:[%s10728_s1 + $0x728] sm:$0xff]   ;;  %v8802_v60 = vld [vmem:[%s10728_s1 + $0x720] sm:$0xff]  }
0x12f7   :  { %v3807_v0 = vmax.f32 %v3805_v59, 0.0 }
0x12f9   :  { %v9939_v1 = vpack.c.bf16 %v3807_v0, %v3806_v63  ;;  %v6824_v63 = vld [vmem:[%s10729_s2 + $0x7] ss:$0 sm:$0xff] }
0x12fb   :  { %8091 = vmatpush3.bf16.msra.mxu1 %v9939_v1  ;;  %8097 = vmatpush3.bf16.msra.mxu0 %v9939_v1 }
0x12fc   :  { %8102 = vmatprep.subr.bf16.mxu1 %v8955_v32  ;;  %8122 = vmatprep.subr.bf16.mxu0 %v8955_v32 }
0x12fe   :  { %8093 = vmatmul.mubr.msk.bf16.vlgmr.msra.gmra.mxu1 %vm2901_vm5, %v3809_v2  ;;  %8099 = vmatmul.mubr.msk.bf16.vlgmr.msra.gmra.mxu0 %vm2901_vm5, %v3870_v61 }
0x12ff   :  { %8103 = vmatpush3.bf16.msra.mxu1 %v8765_v62  ;;  %8123 = vmatpush3.bf16.msra.mxu0 %v8766_v3 }
0x1300   :  { %8104 = vmatprep.subr.bf16.mxu1 %v8955_v32  ;;  %8124 = vmatprep.subr.bf16.mxu0 %v8955_v32 }
0x1301   :  { %8118 = vmatprep.mubr.msk.bf16.mxu1 %vm8956_vm2, %v8955_v32  ;;  %8138 = vmatprep.mubr.msk.bf16.mxu0 %vm8956_vm2, %v8955_v32 }
0x1303   :  { %8105 = vmatpush3.bf16.msra.mxu1 %v8767_v4  ;;  %8125 = vmatpush3.bf16.msra.mxu0 %v8768_v5 }
0x1304   :  { %8106 = vmatprep.subr.bf16.mxu1 %v8955_v32  ;;  %8126 = vmatprep.subr.bf16.mxu0 %v8955_v32 }
0x1307   :  { %8107 = vmatpush3.bf16.msra.mxu1 %v8769_v6  ;;  %8127 = vmatpush3.bf16.msra.mxu0 %v8770_v7  ;;  %v4265_v6 = vld [vmem:[%s10728_s1 + $0x71c] sm:$0xf]  ;;  %v4331_v7 = vld [vmem:[%s10728_s1 + $0x760] sm:$0xf] }
0x1308   :  { %8108 = vmatprep.subr.bf16.mxu1 %v8955_v32  ;;  %8128 = vmatprep.subr.bf16.mxu0 %v8955_v32 }
0x130b   :  { %8109 = vmatpush3.bf16.msra.mxu1 %v8771_v8  ;;  %8129 = vmatpush3.bf16.msra.mxu0 %v8772_v9  ;;  %v8791_v8 = vld [vmem:[%s10728_s1 + $0x79c] sm:$0xff]   ;;  %v8793_v9 = vld [vmem:[%s10728_s1 + $0x794] sm:$0xff]  }
0x130c   :  { %8110 = vmatprep.subr.bf16.mxu1 %v8955_v32  ;;  %8130 = vmatprep.subr.bf16.mxu0 %v8955_v32 }
0x130f   :  { %8111 = vmatpush3.bf16.msra.mxu1 %v8773_v10  ;;  %8131 = vmatpush3.bf16.msra.mxu0 %v8774_v11  ;;  %v8795_v10 = vld [vmem:[%s10728_s1 + $0x78c] sm:$0xff]   ;;  %v8797_v11 = vld [vmem:[%s10728_s1 + $0x784] sm:$0xff]  }
0x1310   :  { %8112 = vmatprep.subr.bf16.mxu1 %v8955_v32  ;;  %8132 = vmatprep.subr.bf16.mxu0 %v8955_v32 }
0x1313   :  { %8113 = vmatpush3.bf16.msra.mxu1 %v8775_v12  ;;  %8133 = vmatpush3.bf16.msra.mxu0 %v8776_v14  ;;  %v8799_v12 = vld [vmem:[%s10728_s1 + $0x77c] sm:$0xff]   ;;  %v8801_v14 = vld [vmem:[%s10728_s1 + $0x774] sm:$0xff]  }
0x1314   :  { %8114 = vmatprep.subr.bf16.mxu1 %v8955_v32  ;;  %8134 = vmatprep.subr.bf16.mxu0 %v8955_v32 }
0x1317   :  { %8115 = vmatpush3.bf16.msra.mxu1 %v8777_v16  ;;  %8135 = vmatpush3.bf16.msra.mxu0 %v8778_v52  ;;  %v8803_v16 = vld [vmem:[%s10728_s1 + $0x76c] sm:$0xff]   ;;  %v8805_v52 = vld [vmem:[%s10728_s1 + $0x764] sm:$0xff]  }
0x1318   :  { %8116 = vmatprep.subr.bf16.mxu1 %v8955_v32  ;;  %8136 = vmatprep.subr.bf16.mxu0 %v8955_v32 }
0x131b   :  { %8117 = vmatpush3.bf16.msra.mxu1 %v8779_v17  ;;  %8137 = vmatpush3.bf16.msra.mxu0 %v8780_v18  ;;  %v8804_v18 = vld [vmem:[%s10728_s1 + $0x820] sm:$0xff]  }
0x131c   :  { %8142 = vmatprep.subr.bf16.mxu1 %v8955_v32  ;;  %8148 = vmatprep.subr.bf16.mxu0 %v8955_v32 }
0x13be   :  { %v3847_v20 = vpop.f32.mrf.mxu1  ;;  %v3908_v19 = vpop.f32.mrf.mxu0 }
0x13bf   :  { %v3853_v13 = vpack.c.bf16 %v3847_v20, %v3847_v20  ;;  %v10021_v54 = vpack.c.bf16 %v3908_v19, %v3908_v19 }
0x13c0   :  { %v8100_v22 = vpop.f32.mrf.mxu0  ;;  %v8094_v23 = vpop.f32.mrf.mxu1 }
0x13c1   :  { %8119 = vmatmul.mubr.bf16.vlgmr.msra.gmra.mxu1 %v10021_v54  ;;  %8139 = vmatmul.mubr.bf16.vlgmr.msra.gmra.mxu0 %v3853_v13 }
0x13c2   :  { %8143 = vmatpush3.bf16.msra.mxu1 %v9939_v1  ;;  %v3911_v24 = vpop.f32.mrf.mxu0  ;;  %8144 = vmatprep.mubr.msk.bf16.mxu1 %vm8956_vm2, %v8955_v32  ;;  %v3850_v25 = vpop.f32.mrf.mxu1 }
0x13c3   :  { %8149 = vmatpush3.bf16.msra.mxu0 %v8781_v15  ;;  %8164 = vmatprep.mubr.msk.bf16.mxu0 %vm8956_vm2, %v8955_v32  ;;  %v8806_v15 = vld [vmem:[%s10728_s1 + $0x818] sm:$0xff]   ;;  %v8807_v24 = vld [vmem:[%s10728_s1 + $0x810] sm:$0xff]  }
0x13c4   :  { %v8101_v27 = vpop.f32.mrf.mxu0  ;;  %v8095_v28 = vpop.f32.mrf.mxu1  ;;  %8150 = vmatprep.subr.bf16.mxu0 %v8955_v32  ;;  %8168 = vmatprep.subr.bf16.mxu1 %v8955_v32 }
0x13c5   :  { %v8808_v28 = vld [vmem:[%s10728_s1 + $0x808] sm:$0xff]  }
0x13c7   :  { %8151 = vmatpush3.bf16.msra.mxu0 %v8782_v26 }
0x13c8   :  { %8152 = vmatprep.subr.bf16.mxu0 %v8955_v32 }
0x13c9   :  { %8145 = vmatmul.mubr.msk.bf16.vlgmr.msra.gmra.mxu1 %vm2901_vm5, %v4107_v29 }
0x13ca   :  { %8170 = vmatprep.mubr.msk.bf16.mxu1 %vm8956_vm2, %v8955_v32 }
0x13cb   :  { %8153 = vmatpush3.bf16.msra.mxu0 %v8783_v30  ;;  %v4568_v30 = vld [vmem:[%s10728_s1 + $0x7a4] sm:$0xf] }
0x13cc   :  { %8154 = vmatprep.subr.bf16.mxu0 %v8955_v32 }
0x13cf   :  { %8155 = vmatpush3.bf16.msra.mxu0 %v8784_v31  ;;  %v8809_v31 = vld [vmem:[%s10728_s1 + $0x800] sm:$0xff]  }
0x13d0   :  { %8156 = vmatprep.subr.bf16.mxu0 %v8955_v32 }
0x13d3   :  { %8157 = vmatpush3.bf16.msra.mxu0 %v8785_v33  ;;  %v8813_v33 = vld [vmem:[%s10728_s1 + $0x7e0] sm:$0xff]  }
0x13d4   :  { %8158 = vmatprep.subr.bf16.mxu0 %v8955_v32 }
0x13d7   :  { %8159 = vmatpush3.bf16.msra.mxu0 %v8786_v34  ;;  %v8810_v34 = vld [vmem:[%s10728_s1 + $0x7f8] sm:$0xff]  }
0x13d8   :  { %8160 = vmatprep.subr.bf16.mxu0 %v8955_v32 }
0x13db   :  { %8161 = vmatpush3.bf16.msra.mxu0 %v8787_v35  ;;  %v8814_v35 = vld [vmem:[%s10728_s1 + $0x7d8] sm:$0xff]  }
0x13dc   :  { %8162 = vmatprep.subr.bf16.mxu0 %v8955_v32 }
0x13df   :  { %8163 = vmatpush3.bf16.msra.mxu0 %v8788_v36  ;;  %v8811_v36 = vld [vmem:[%s10728_s1 + $0x7f0] sm:$0xff]  }
0x13e0   :  { %8200 = vmatprep.subr.bf16.mxu0 %v8955_v32 }
0x1481   :  { %v4013_v37 = vpop.f32.mrf.mxu1  ;;  %v4101_v38 = vpop.f32.mrf.mxu0 }
0x1482   :  { %v4102_v39 = vadd.f32 %v4101_v38, %v4013_v37  ;;  %v8815_v37 = vld [vmem:[%s10728_s1 + $0x7d0] sm:$0xff]   ;;  %v8812_v38 = vld [vmem:[%s10728_s1 + $0x7e8] sm:$0xff]  }
0x1483   :  { %v8120_v21 = vpop.f32.mrf.mxu1  ;;  %v8140_v40 = vpop.f32.mrf.mxu0 }
0x1484   :  { %v8817_v21 = vld [vmem:[%s10728_s1 + $0x7c0] sm:$0xff]   ;;  %v8819_v40 = vld [vmem:[%s10728_s1 + $0x7b0] sm:$0xff]  }
0x1485   :  { %v4016_v41 = vpop.f32.mrf.mxu1  ;;  %v4104_v42 = vpop.f32.mrf.mxu0 }
0x1486   :  { %v8820_v41 = vld [vmem:[%s10728_s1 + $0x7a8] sm:$0xff]  }
0x1487   :  { %v8121_v43 = vpop.f32.mrf.mxu1  ;;  %v8141_v44 = vpop.f32.mrf.mxu0 }
0x1489   :  { %v4145_v45 = vpop.f32.mrf.mxu1 }
0x148a   :  { %v4151_v46 = vpack.c.bf16 %v4145_v45, %v4145_v45 }
0x148b   :  { %v8146_v47 = vpop.f32.mrf.mxu1 }
0x148c   :  { %8165 = vmatmul.mubr.bf16.vlgmr.msra.gmra.mxu0 %v4151_v46 }
0x148d   :  { %v4148_v48 = vpop.f32.mrf.mxu1  ;;  %8216 = vmatprep.mubr.msk.bf16.mxu0 %vm8956_vm2, %v8955_v32  ;;  %8201 = vmatpush3.bf16.msra.mxu0 %v8789_v50 }
0x148e   :  { %8202 = vmatprep.subr.bf16.mxu0 %v8955_v32 }
0x148f   :  { %v8147_v49 = vpop.f32.mrf.mxu1 }
0x1491   :  { %8203 = vmatpush3.bf16.msra.mxu0 %v8790_v51 }
0x1492   :  { %8204 = vmatprep.subr.bf16.mxu0 %v8955_v32 }
0x1495   :  { %8205 = vmatpush3.bf16.msra.mxu0 %v8792_v53 }
0x1496   :  { %8206 = vmatprep.subr.bf16.mxu0 %v8955_v32 }
0x1499   :  { %8207 = vmatpush3.bf16.msra.mxu0 %v8794_v55 }
0x149a   :  { %8208 = vmatprep.subr.bf16.mxu0 %v8955_v32 }
0x149d   :  { %8209 = vmatpush3.bf16.msra.mxu0 %v8796_v56 }
0x149e   :  { %8210 = vmatprep.subr.bf16.mxu0 %v8955_v32 }
0x14a1   :  { %8211 = vmatpush3.bf16.msra.mxu0 %v8798_v58 }
0x14a2   :  { %8212 = vmatprep.subr.bf16.mxu0 %v8955_v32 }
0x14a5   :  { %8213 = vmatpush3.bf16.msra.mxu0 %v8800_v57 }
0x14a6   :  { %8214 = vmatprep.subr.bf16.mxu0 %v8955_v32 }
0x14a9   :  { %8215 = vmatpush3.bf16.msra.mxu0 %v8802_v60 }
0x14aa   :  { %8246 = vmatprep.subr.bf16.mxu0 %v8955_v32 }
0x154c   :  { %v4250_v59 = vpop.f32.mrf.mxu0 }
0x154d   :  { %v4256_v0 = vadd.f32 %v4250_v59, %v4102_v39  ;;  %v8816_v39 = vld [vmem:[%s10728_s1 + $0x7c8] sm:$0xff]  }
0x154e   :  { %v8166_v1 = vpop.f32.mrf.mxu0 }
0x154f   :  { %v4262_v2 = vadd.f32 %v6824_v63, %v4256_v0  ;;  %v8821_v0 = vld [vmem:[%s10728_s1 + $0x860] sm:$0xff]   ;;  %v8822_v1 = vld [vmem:[%s10728_s1 + $0x858] sm:$0xff]  }
0x1550   :  { %v4253_v61 = vpop.f32.mrf.mxu0 }
0x1551   :  { %v4263_v62 = vmax.f32 %v4262_v2, 0.0  ;;  %v8823_v2 = vld [vmem:[%s10728_s1 + $0x850] sm:$0xff]   ;;  %v8824_v61 = vld [vmem:[%s10728_s1 + $0x848] sm:$0xff]  }
0x1552   :  { %v8167_v3 = vpop.f32.mrf.mxu0 }
0x1553   :  { %v4264_v4 = vpack.c.bf16 %v4263_v62, %v4263_v62  ;;  %v8825_v62 = vld [vmem:[%s10728_s1 + $0x840] sm:$0xff]   ;;  %v8826_v3 = vld [vmem:[%s10728_s1 + $0x838] sm:$0xff]  }
0x1555   :  { %v4272_v5 = vsel %vm4270_vm6, %v4264_v4, 0  ;;  %v8827_v4 = vld [vmem:[%s10728_s1 + $0x830] sm:$0xff]  }
0x1556   :  { %8169 = vmatpush3.bf16.msra.mxu1 %v4272_v5 }
0x1557   :  { %8174 = vmatprep.subr.bf16.mxu1 %v8955_v32 }
0x1559   :  { %8171 = vmatmul.mubr.msk.bf16.vlgmr.msra.gmra.mxu1 %vm4266_vm7, %v4265_v6  ;;  %v6852_v6 = vld [vmem:[%s10729_s2 + $0x8] ss:$0 sm:$0xff] }
0x155a   :  { %8175 = vmatpush3.bf16.msra.mxu1 %v4272_v5  ;;  %8176 = vmatprep.mubr.msk.bf16.mxu1 %vm8956_vm2, %v8955_v32 }
0x155b   :  { %8180 = vmatprep.subr.bf16.mxu1 %v8955_v32 }
0x1561   :  { %8177 = vmatmul.mubr.msk.bf16.vlgmr.msra.gmra.mxu1 %vm4266_vm7, %v4331_v7 }
0x1562   :  { %8181 = vmatpush3.bf16.msra.mxu1 %v8791_v8  ;;  %8196 = vmatprep.mubr.msk.bf16.mxu1 %vm8956_vm2, %v8955_v32 }
0x1563   :  { %8182 = vmatprep.subr.bf16.mxu1 %v8955_v32 }
0x1566   :  { %8183 = vmatpush3.bf16.msra.mxu1 %v8793_v9 }
0x1567   :  { %8184 = vmatprep.subr.bf16.mxu1 %v8955_v32 }
0x156a   :  { %8185 = vmatpush3.bf16.msra.mxu1 %v8795_v10 }
0x156b   :  { %8186 = vmatprep.subr.bf16.mxu1 %v8955_v32 }
0x156e   :  { %8187 = vmatpush3.bf16.msra.mxu1 %v8797_v11 }
0x156f   :  { %8188 = vmatprep.subr.bf16.mxu1 %v8955_v32 }
0x1572   :  { %8189 = vmatpush3.bf16.msra.mxu1 %v8799_v12 }
0x1573   :  { %8190 = vmatprep.subr.bf16.mxu1 %v8955_v32 }
0x1576   :  { %8191 = vmatpush3.bf16.msra.mxu1 %v8801_v14 }
0x1577   :  { %8192 = vmatprep.subr.bf16.mxu1 %v8955_v32 }
0x157a   :  { %8193 = vmatpush3.bf16.msra.mxu1 %v8803_v16  ;;  %v4834_v16 = vld [vmem:[%s10728_s1 + $0x8a8] sm:$0x1] }
0x157b   :  { %8194 = vmatprep.subr.bf16.mxu1 %v8955_v32 }
0x157e   :  { %8195 = vmatpush3.bf16.msra.mxu1 %v8805_v52  ;;  %v8828_v52 = vld [vmem:[%s10728_s1 + $0x828] sm:$0xff]  }
0x157f   :  { %8220 = vmatprep.subr.bf16.mxu1 %v8955_v32 }
0x1619   :  { %v4308_v17 = vpop.f32.mrf.mxu1 }
0x161a   :  { %v4314_v20 = vpack.c.bf16 %v4308_v17, %v4308_v17  ;;  %v8829_v17 = vld [vmem:[%s10728_s1 + $0x8a0] sm:$0xff]  }
0x161b   :  { %v8172_v19 = vpop.f32.mrf.mxu1 }
0x161c   :  { %8217 = vmatmul.mubr.bf16.vlgmr.msra.gmra.mxu0 %v4314_v20  ;;  %v8831_v20 = vld [vmem:[%s10728_s1 + $0x890] sm:$0xff]   ;;  %v8832_v19 = vld [vmem:[%s10728_s1 + $0x888] sm:$0xff]  }
0x161d   :  { %8247 = vmatpush3.bf16.msra.mxu0 %v8804_v18  ;;  %v4311_v13 = vpop.f32.mrf.mxu1  ;;  %8262 = vmatprep.mubr.msk.bf16.mxu0 %vm8956_vm2, %v8955_v32  ;;  %v8830_v18 = vld [vmem:[%s10728_s1 + $0x898] sm:$0xff]  }
0x161e   :  { %8248 = vmatprep.subr.bf16.mxu0 %v8955_v32  ;;  %v8833_v13 = vld [vmem:[%s10728_s1 + $0x880] sm:$0xff]  }
0x161f   :  { %v8173_v22 = vpop.f32.mrf.mxu1 }
0x1620   :  { %v8835_v22 = vld [vmem:[%s10728_s1 + $0x870] sm:$0xff]  }
0x1621   :  { %8249 = vmatpush3.bf16.msra.mxu0 %v8806_v15  ;;  %v4369_v23 = vpop.f32.mrf.mxu1  ;;  %v8834_v15 = vld [vmem:[%s10728_s1 + $0x878] sm:$0xff]  }
0x1622   :  { %v4375_v25 = vpack.c.bf16 %v4369_v23, %v4369_v23  ;;  %8250 = vmatprep.subr.bf16.mxu0 %v8955_v32 }
0x1623   :  { %v8178_v26 = vpop.f32.mrf.mxu1 }
0x1624   :  { %8197 = vmatmul.mubr.bf16.vlgmr.msra.gmra.mxu1 %v4375_v25 }
0x1625   :  { %8221 = vmatpush3.bf16.msra.mxu1 %v4272_v5  ;;  %8251 = vmatpush3.bf16.msra.mxu0 %v8807_v24  ;;  %v4372_v27 = vpop.f32.mrf.mxu1 }
0x1626   :  { %8252 = vmatprep.subr.bf16.mxu0 %v8955_v32  ;;  %8222 = vmatprep.mubr.msk.bf16.mxu1 %vm8956_vm2, %v8955_v32 }
0x1627   :  { %v8179_v29 = vpop.f32.mrf.mxu1  ;;  %8226 = vmatprep.subr.bf16.mxu1 %v8955_v32 }
0x1629   :  { %8253 = vmatpush3.bf16.msra.mxu0 %v8808_v28  ;;  %v8836_v28 = vld [vmem:[%s10728_s1 + $0x868] sm:$0xff]  }
0x162a   :  { %8254 = vmatprep.subr.bf16.mxu0 %v8955_v32 }
0x162c   :  { %8223 = vmatmul.mubr.msk.bf16.vlgmr.msra.gmra.mxu1 %vm4266_vm7, %v4568_v30 }
0x162d   :  { %8255 = vmatpush3.bf16.msra.mxu0 %v8809_v31  ;;  %8227 = vmatpush3.bf16.msra.mxu1 %v8813_v33 }
0x162e   :  { %8256 = vmatprep.subr.bf16.mxu0 %v8955_v32  ;;  %8228 = vmatprep.subr.bf16.mxu1 %v8955_v32 }
0x162f   :  { %8242 = vmatprep.mubr.msk.bf16.mxu1 %vm8956_vm2, %v8955_v32 }
0x1631   :  { %8257 = vmatpush3.bf16.msra.mxu0 %v8810_v34  ;;  %8229 = vmatpush3.bf16.msra.mxu1 %v8814_v35 }
0x1632   :  { %8258 = vmatprep.subr.bf16.mxu0 %v8955_v32  ;;  %8230 = vmatprep.subr.bf16.mxu1 %v8955_v32 }
0x1635   :  { %8259 = vmatpush3.bf16.msra.mxu0 %v8811_v36  ;;  %8231 = vmatpush3.bf16.msra.mxu1 %v8815_v37 }
0x1636   :  { %8260 = vmatprep.subr.bf16.mxu0 %v8955_v32  ;;  %8232 = vmatprep.subr.bf16.mxu1 %v8955_v32 }
0x1639   :  { %8261 = vmatpush3.bf16.msra.mxu0 %v8812_v38  ;;  %8233 = vmatpush3.bf16.msra.mxu1 %v8816_v39 }
0x163a   :  { %8272 = vmatprep.subr.bf16.mxu0 %v8955_v32  ;;  %8234 = vmatprep.subr.bf16.mxu1 %v8955_v32 }
0x163c   :  { %8263 = vmatmul.mubr.bf16.vlgmr.msra.gmra.mxu0 %v10021_v54  ;;  %v8818_v54 = vld [vmem:[%s10728_s1 + $0x7b8] sm:$0xff]  }
0x163d   :  { %8288 = vmatprep.mubr.msk.bf16.mxu0 %vm8956_vm2, %v8955_v32  ;;  %8235 = vmatpush3.bf16.msra.mxu1 %v8817_v21 }
0x163e   :  { %8236 = vmatprep.subr.bf16.mxu1 %v8955_v32  ;;  %8273 = vmatpush3.bf16.msra.mxu0 %v8821_v0  ;;  %v8839_v0 = vld [vmem:[%s10728_s1 + $0x928] sm:$0xff]  }
0x163f   :  { %8274 = vmatprep.subr.bf16.mxu0 %v8955_v32 }
0x1641   :  { %8237 = vmatpush3.bf16.msra.mxu1 %v8818_v54 }
0x1642   :  { %8238 = vmatprep.subr.bf16.mxu1 %v8955_v32  ;;  %8275 = vmatpush3.bf16.msra.mxu0 %v8822_v1  ;;  %v8840_v1 = vld [vmem:[%s10728_s1 + $0x8e4] sm:$0xff]  }
0x1643   :  { %8276 = vmatprep.subr.bf16.mxu0 %v8955_v32 }
0x1645   :  { %8239 = vmatpush3.bf16.msra.mxu1 %v8819_v40 }
0x1646   :  { %8240 = vmatprep.subr.bf16.mxu1 %v8955_v32  ;;  %8277 = vmatpush3.bf16.msra.mxu0 %v8823_v2  ;;  %v8841_v2 = vld [vmem:[%s10728_s1 + $0x920] sm:$0xff]  }
0x1647   :  { %8278 = vmatprep.subr.bf16.mxu0 %v8955_v32 }
0x1649   :  { %8241 = vmatpush3.bf16.msra.mxu1 %v8820_v41 }
0x164a   :  { %8266 = vmatprep.subr.bf16.mxu1 %v8955_v32  ;;  %8279 = vmatpush3.bf16.msra.mxu0 %v8824_v61  ;;  %v8842_v61 = vld [vmem:[%s10728_s1 + $0x8dc] sm:$0xff]  }
0x164b   :  { %8280 = vmatprep.subr.bf16.mxu0 %v8955_v32 }
0x164e   :  { %8281 = vmatpush3.bf16.msra.mxu0 %v8825_v62  ;;  %v8843_v62 = vld [vmem:[%s10728_s1 + $0x918] sm:$0xff]  }
0x164f   :  { %8282 = vmatprep.subr.bf16.mxu0 %v8955_v32 }
0x1652   :  { %8283 = vmatpush3.bf16.msra.mxu0 %v8826_v3  ;;  %v8844_v3 = vld [vmem:[%s10728_s1 + $0x8d4] sm:$0xff]  }
0x1653   :  { %8284 = vmatprep.subr.bf16.mxu0 %v8955_v32 }
0x1656   :  { %8285 = vmatpush3.bf16.msra.mxu0 %v8827_v4  ;;  %v8845_v4 = vld [vmem:[%s10728_s1 + $0x910] sm:$0xff]  }
0x1657   :  { %8286 = vmatprep.subr.bf16.mxu0 %v8955_v32 }
0x165a   :  { %8287 = vmatpush3.bf16.msra.mxu0 %v8828_v52 }
0x165b   :  { %8312 = vmatprep.subr.bf16.mxu0 %v8955_v32 }
0x16dc   :  { %v4562_v42 = vpop.f32.mrf.mxu0 }
0x16de   :  { %v8218_v43 = vpop.f32.mrf.mxu0 }
0x16e0   :  { %v4565_v44 = vpop.f32.mrf.mxu0 }
0x16e1   :  { %v5098_v44 = vld [vmem:[%s10728_s1 + $0x8ac] sm:$0xf] }
0x16e2   :  { %v8219_v45 = vpop.f32.mrf.mxu0 }
0x16e3   :  { %v6853_v45 = vld [vmem:[%s10729_s2 + $0x9] ss:$0 sm:$0xff] }
0x16e4   :  { %v4474_v46 = vpop.f32.mrf.mxu1 }
0x16e5   :  { %v4563_v47 = vadd.f32 %v4562_v42, %v4474_v46 }
0x16e6   :  { %v8198_v48 = vpop.f32.mrf.mxu1 }
0x16e8   :  { %v4477_v49 = vpop.f32.mrf.mxu1 }
0x16ea   :  { %v8199_v50 = vpop.f32.mrf.mxu1 }
0x16ec   :  { %v4606_v51 = vpop.f32.mrf.mxu1 }
0x16ed   :  { %v4612_v53 = vpack.c.bf16 %v4606_v51, %v4606_v51 }
0x16ee   :  { %v8224_v55 = vpop.f32.mrf.mxu1 }
0x16ef   :  { %8243 = vmatmul.mubr.bf16.vlgmr.msra.gmra.mxu1 %v4612_v53 }
0x16f0   :  { %v4609_v56 = vpop.f32.mrf.mxu1  ;;  %8268 = vmatprep.mubr.msk.bf16.mxu1 %vm8956_vm2, %v8955_v32 }
0x16f2   :  { %v8225_v58 = vpop.f32.mrf.mxu1 }
0x16fc   :  { %v10232_v57 = vpop.f32.mrf.mxu0 }
0x16fe   :  { %v8264_v60 = vpop.f32.mrf.mxu0 }
0x16ff   :  { %v5150_v60 = vld [vmem:[%s10728_s1 + $0x8b0] sm:$0x3] }
0x1700   :  { %v4830_v59 = vpop.f32.mrf.mxu0 }
0x1701   :  { %v8837_v59 = vld [vmem:[%s10728_s1 + $0x930] sm:$0xff]  }
0x1702   :  { %v8265_v63 = vpop.f32.mrf.mxu0 }
0x1703   :  { %v8838_v63 = vld [vmem:[%s10728_s1 + $0x8ec] sm:$0xff]  }
0x17af   :  { %v4711_v5 = vpop.f32.mrf.mxu1 }
0x17b0   :  { %v4717_v7 = vadd.f32 %v4711_v5, %v4563_v47  ;;  %v4828_v47 = vadd.f32 %v6853_v45, %v10232_v57  ;;  %v5214_v57 = vld [vmem:[%s10728_s1 + $0x8f4] sm:$0x3]  ;;  %v8846_v5 = vld [vmem:[%s10728_s1 + $0x8cc] sm:$0xff]  }
0x17b1   :  { %v8244_v8 = vpop.f32.mrf.mxu1  ;;  %v8862_v45 = vld [vmem:[%s10728_s1 + $0x9b0] sm:$0xff]  }
0x17b2   :  { %v10265_v9 = vadd.f32 %v6852_v6, %v4717_v7  ;;  %v8847_v6 = vld [vmem:[%s10728_s1 + $0x908] sm:$0xff]   ;;  %v8849_v8 = vld [vmem:[%s10728_s1 + $0x900] sm:$0xff]  }
0x17b3   :  { %v4714_v10 = vpop.f32.mrf.mxu1  ;;  %v8848_v7 = vld [vmem:[%s10728_s1 + $0x8c4] sm:$0xff]  }
0x17b4   :  { %v4833_v11 = vpack.c.bf16 %v10265_v9, %v10265_v9  ;;  %v8851_v10 = vld [vmem:[%s10728_s1 + $0x8f8] sm:$0xff]  }
0x17b5   :  { %v8245_v12 = vpop.f32.mrf.mxu1 }
0x17b6   :  { %v4839_v14 = vsel %vm4270_vm6, %v4833_v11, 0  ;;  %v8852_v11 = vld [vmem:[%s10728_s1 + $0x8b4] sm:$0xff]  }
0x17b7   :  { %8267 = vmatpush3.bf16.msra.mxu1 %v4839_v14 }
0x17b8   :  { %8292 = vmatprep.subr.bf16.mxu1 %v8955_v32 }
0x17ba   :  { %8269 = vmatmul.mubr.msk.bf16.vlgmr.msra.gmra.mxu1 %vm4266_vm7, %v4834_v16 }
0x17bb   :  { %8308 = vmatprep.mubr.msk.bf16.mxu1 %vm8956_vm2, %v8955_v32  ;;  %8293 = vmatpush3.bf16.msra.mxu1 %v8829_v17  ;;  %v8853_v17 = vld [vmem:[%s10728_s1 + $0x974] sm:$0xff]  }
0x17bc   :  { %8294 = vmatprep.subr.bf16.mxu1 %v8955_v32 }
0x17bf   :  { %8295 = vmatpush3.bf16.msra.mxu1 %v8830_v18 }
0x17c0   :  { %8296 = vmatprep.subr.bf16.mxu1 %v8955_v32 }
0x17c3   :  { %8297 = vmatpush3.bf16.msra.mxu1 %v8831_v20 }
0x17c4   :  { %8298 = vmatprep.subr.bf16.mxu1 %v8955_v32 }
0x17c7   :  { %8299 = vmatpush3.bf16.msra.mxu1 %v8832_v19 }
0x17c8   :  { %8300 = vmatprep.subr.bf16.mxu1 %v8955_v32 }
0x17cb   :  { %8301 = vmatpush3.bf16.msra.mxu1 %v8833_v13 }
0x17cc   :  { %8302 = vmatprep.subr.bf16.mxu1 %v8955_v32 }
0x17cf   :  { %8303 = vmatpush3.bf16.msra.mxu1 %v8834_v15  ;;  %v8854_v15 = vld [vmem:[%s10728_s1 + $0x96c] sm:$0xff]  }
0x17d0   :  { %8304 = vmatprep.subr.bf16.mxu1 %v8955_v32 }
0x17d3   :  { %8305 = vmatpush3.bf16.msra.mxu1 %v8835_v22 }
0x17d4   :  { %8306 = vmatprep.subr.bf16.mxu1 %v8955_v32 }
0x17d7   :  { %8307 = vmatpush3.bf16.msra.mxu1 %v8836_v28  ;;  %v8858_v28 = vld [vmem:[%s10728_s1 + $0x94c] sm:$0xff]  }
0x17d8   :  { %8318 = vmatprep.subr.bf16.mxu1 %v8955_v32 }
0x187a   :  { %v4875_v23 = vpop.f32.mrf.mxu1 }
0x187b   :  { %v4881_v24 = vpack.c.bf16 %v4875_v23, %v4875_v23 }
0x187c   :  { %v8270_v25 = vpop.f32.mrf.mxu1 }
0x187d   :  { %8289 = vmatmul.mubr.bf16.vlgmr.msra.gmra.mxu0 %v4881_v24  ;;  %v5451_v24 = vld [vmem:[%s10728_s1 + $0x938] sm:$0x3]  ;;  %v8855_v25 = vld [vmem:[%s10728_s1 + $0x964] sm:$0xff]  }
0x187e   :  { %v4878_v26 = vpop.f32.mrf.mxu1  ;;  %8314 = vmatprep.mubr.msk.bf16.mxu0 %vm8956_vm2, %v8955_v32 }
0x187f   :  { %v8856_v26 = vld [vmem:[%s10728_s1 + $0x95c] sm:$0xff]  }
0x1880   :  { %v8271_v27 = vpop.f32.mrf.mxu1 }
0x1881   :  { %v8857_v27 = vld [vmem:[%s10728_s1 + $0x954] sm:$0xff]  }
0x193d   :  { %v4980_v29 = vpop.f32.mrf.mxu0 }
0x193e   :  { %v4986_v30 = vmax.f32 %v4980_v29, 0.0  ;;  %v8859_v29 = vld [vmem:[%s10728_s1 + $0x944] sm:$0xff]  }
0x193f   :  { %v8290_v31 = vpop.f32.mrf.mxu0 }
0x1940   :  { %v4987_v33 = vpack.c.bf16 %v4986_v30, %v4986_v30  ;;  %v8860_v30 = vld [vmem:[%s10728_s1 + $0x93c] sm:$0xff]  }
0x1941   :  { %v4983_v34 = vpop.f32.mrf.mxu0 }
0x1942   :  { %8309 = vmatmul.mubr.bf16.vlgmr.msra.gmra.mxu1 %v4987_v33 }
0x1943   :  { %v8291_v35 = vpop.f32.mrf.mxu0  ;;  %8320 = vmatprep.mubr.msk.bf16.mxu1 %vm8956_vm2, %v8955_v32 }
0x1a02   :  { %v5086_v36 = vpop.f32.mrf.mxu1 }
0x1a03   :  { %v6879_v37 = vmul.f32 -1.442695, %v5086_v36 }
0x1a04   :  { %v8310_v38 = vpop.f32.mrf.mxu1 }
0x1a05   :  { %8917 = vpow2.f32 %v6879_v37 }
0x1a06   :  { %v5089_v39 = vpop.f32.mrf.mxu1 }
0x1a08   :  { %v8311_v21 = vpop.f32.mrf.mxu1 }
0x1a12   :  { %v8918_v54 = vpop.eup %8917 }
0x1a13   :  { %v5095_v40 = vadd.f32 1.0, %v8918_v54 }
0x1a15   :  { %8919 = vrcp.f32 %v5095_v40 }
0x1a22   :  { %v8920_v41 = vpop.eup %8919 }
0x1a23   :  { %v5099_v42 = vpack.c.bf16 %v8920_v41, %v8920_v41 }
0x1a25   :  { %v5104_v43 = vsel %vm2344_vm4, %v5099_v42, 0 }
0x1a26   :  { %8313 = vmatpush3.bf16.msra.mxu0 %v5104_v43 }
0x1a27   :  { %8324 = vmatprep.subr.bf16.mxu0 %v8955_v32 }
0x1a29   :  { %8315 = vmatmul.mubr.msk.bf16.vlgmr.msra.gmra.mxu0 %vm2337_vm3, %v5098_v44  ;;  %v8861_v44 = vld [vmem:[%s10728_s1 + $0x9b8] sm:$0xff]  }
0x1a2a   :  { %8326 = vmatprep.mubr.msk.bf16.mxu0 %vm8956_vm2, %v8955_v32 }
0x1ae9   :  { %v5140_v46 = vpop.f32.mrf.mxu0 }
0x1aea   :  { %v5146_v48 = vmul.f32 %v5140_v46, %v10265_v9  ;;  %v8850_v9 = vld [vmem:[%s10728_s1 + $0x8bc] sm:$0xff]   ;;  %v8864_v46 = vld [vmem:[%s10728_s1 + $0x9a8] sm:$0xff]  }
0x1aeb   :  { %v8316_v49 = vpop.f32.mrf.mxu0 }
0x1aec   :  { %v5147_v50 = vadd.f32 %v5146_v48, %v4828_v47  ;;  %v8866_v47 = vld [vmem:[%s10728_s1 + $0x9a0] sm:$0xff]   ;;  %v8868_v48 = vld [vmem:[%s10728_s1 + $0x998] sm:$0xff]   ;;  %v8870_v49 = vld [vmem:[%s10728_s1 + $0x990] sm:$0xff]  }
0x1aed   :  { %v5143_v51 = vpop.f32.mrf.mxu0 }
0x1aee   :  { %v5148_v53 = vmax.f32 %v5147_v50, 0.0  ;;  %v8872_v50 = vld [vmem:[%s10728_s1 + $0x988] sm:$0xff]   ;;  %v8874_v51 = vld [vmem:[%s10728_s1 + $0x980] sm:$0xff]  }
0x1aef   :  { %v8317_v55 = vpop.f32.mrf.mxu0 }
0x1af0   :  { %v5149_v56 = vpack.c.bf16 %v5148_v53, %v5148_v53  ;;  %v6908_v55 = vld [vmem:[%s10729_s2 + $0xa] ss:$0 sm:$0xff] }
0x1af2   :  { %v10331_v58 = vsel %vm4270_vm6, %v5149_v56, 0 }
0x1af3   :  { %8319 = vmatpush3.bf16.msra.mxu1 %v10331_v58  ;;  %8325 = vmatpush3.bf16.msra.mxu0 %v10331_v58 }
0x1af4   :  { %8330 = vmatprep.subr.bf16.mxu1 %v8955_v32  ;;  %8350 = vmatprep.subr.bf16.mxu0 %v8955_v32 }
0x1af6   :  { %8321 = vmatmul.mubr.msk.bf16.vlgmr.msra.gmra.mxu1 %vm4266_vm7, %v5150_v60  ;;  %8327 = vmatmul.mubr.msk.bf16.vlgmr.msra.gmra.mxu0 %vm4266_vm7, %v5214_v57 }
0x1af7   :  { %8331 = vmatpush3.bf16.msra.mxu1 %v8837_v59  ;;  %8351 = vmatpush3.bf16.msra.mxu0 %v8838_v63 }
0x1af8   :  { %8332 = vmatprep.subr.bf16.mxu1 %v8955_v32  ;;  %8352 = vmatprep.subr.bf16.mxu0 %v8955_v32 }
0x1af9   :  { %8346 = vmatprep.mubr.msk.bf16.mxu1 %vm8956_vm2, %v8955_v32  ;;  %8366 = vmatprep.mubr.msk.bf16.mxu0 %vm8956_vm2, %v8955_v32 }
0x1afb   :  { %8333 = vmatpush3.bf16.msra.mxu1 %v8839_v0  ;;  %8353 = vmatpush3.bf16.msra.mxu0 %v8840_v1 }
0x1afc   :  { %8334 = vmatprep.subr.bf16.mxu1 %v8955_v32  ;;  %8354 = vmatprep.subr.bf16.mxu0 %v8955_v32 }
0x1aff   :  { %8335 = vmatpush3.bf16.msra.mxu1 %v8841_v2  ;;  %8355 = vmatpush3.bf16.msra.mxu0 %v8842_v61  ;;  %v5609_v2 = vld [vmem:[%s10728_s1 + $0x97c] sm:$0x3]  ;;  %v5675_v61 = vld [vmem:[%s10728_s1 + $0x9c0] sm:$0x3] }
0x1b00   :  { %8336 = vmatprep.subr.bf16.mxu1 %v8955_v32  ;;  %8356 = vmatprep.subr.bf16.mxu0 %v8955_v32 }
0x1b03   :  { %8337 = vmatpush3.bf16.msra.mxu1 %v8843_v62  ;;  %8357 = vmatpush3.bf16.msra.mxu0 %v8844_v3  ;;  %v8863_v62 = vld [vmem:[%s10728_s1 + $0x9fc] sm:$0xff]   ;;  %v8865_v3 = vld [vmem:[%s10728_s1 + $0x9f4] sm:$0xff]  }
0x1b04   :  { %8338 = vmatprep.subr.bf16.mxu1 %v8955_v32  ;;  %8358 = vmatprep.subr.bf16.mxu0 %v8955_v32 }
0x1b07   :  { %8339 = vmatpush3.bf16.msra.mxu1 %v8845_v4  ;;  %8359 = vmatpush3.bf16.msra.mxu0 %v8846_v5  ;;  %v8867_v4 = vld [vmem:[%s10728_s1 + $0x9ec] sm:$0xff]   ;;  %v8869_v5 = vld [vmem:[%s10728_s1 + $0x9e4] sm:$0xff]  }
0x1b08   :  { %8340 = vmatprep.subr.bf16.mxu1 %v8955_v32  ;;  %8360 = vmatprep.subr.bf16.mxu0 %v8955_v32 }
0x1b0b   :  { %8341 = vmatpush3.bf16.msra.mxu1 %v8847_v6  ;;  %8361 = vmatpush3.bf16.msra.mxu0 %v8848_v7  ;;  %v8871_v6 = vld [vmem:[%s10728_s1 + $0x9dc] sm:$0xff]   ;;  %v8873_v7 = vld [vmem:[%s10728_s1 + $0x9d4] sm:$0xff]  }
0x1b0c   :  { %8342 = vmatprep.subr.bf16.mxu1 %v8955_v32  ;;  %8362 = vmatprep.subr.bf16.mxu0 %v8955_v32 }
0x1b0f   :  { %8343 = vmatpush3.bf16.msra.mxu1 %v8849_v8  ;;  %8363 = vmatpush3.bf16.msra.mxu0 %v8850_v9  ;;  %v8875_v8 = vld [vmem:[%s10728_s1 + $0x9cc] sm:$0xff]   ;;  %v8877_v9 = vld [vmem:[%s10728_s1 + $0x9c4] sm:$0xff]  }
0x1b10   :  { %8344 = vmatprep.subr.bf16.mxu1 %v8955_v32  ;;  %8364 = vmatprep.subr.bf16.mxu0 %v8955_v32 }
0x1b13   :  { %8345 = vmatpush3.bf16.msra.mxu1 %v8851_v10  ;;  %8365 = vmatpush3.bf16.msra.mxu0 %v8852_v11  ;;  %v8876_v11 = vld [vmem:[%s10728_s1 + $0xa80] sm:$0xff]  }
0x1b14   :  { %8370 = vmatprep.subr.bf16.mxu1 %v8955_v32  ;;  %8376 = vmatprep.subr.bf16.mxu0 %v8955_v32 }
0x1bb6   :  { %v5191_v12 = vpop.f32.mrf.mxu1  ;;  %v5252_v14 = vpop.f32.mrf.mxu0 }
0x1bb7   :  { %v5197_v16 = vpack.c.bf16 %v5191_v12, %v5191_v12  ;;  %v10413_v52 = vpack.c.bf16 %v5252_v14, %v5252_v14 }
0x1bb8   :  { %v8328_v18 = vpop.f32.mrf.mxu0  ;;  %v8322_v20 = vpop.f32.mrf.mxu1 }
0x1bb9   :  { %8347 = vmatmul.mubr.bf16.vlgmr.msra.gmra.mxu1 %v10413_v52  ;;  %8367 = vmatmul.mubr.bf16.vlgmr.msra.gmra.mxu0 %v5197_v16 }
0x1bba   :  { %8371 = vmatpush3.bf16.msra.mxu1 %v10331_v58  ;;  %v5255_v19 = vpop.f32.mrf.mxu0  ;;  %8372 = vmatprep.mubr.msk.bf16.mxu1 %vm8956_vm2, %v8955_v32  ;;  %v5194_v13 = vpop.f32.mrf.mxu1 }
0x1bbb   :  { %8377 = vmatpush3.bf16.msra.mxu0 %v8853_v17  ;;  %8392 = vmatprep.mubr.msk.bf16.mxu0 %vm8956_vm2, %v8955_v32  ;;  %v8878_v17 = vld [vmem:[%s10728_s1 + $0xa78] sm:$0xff]   ;;  %v8879_v19 = vld [vmem:[%s10728_s1 + $0xa70] sm:$0xff]  }
0x1bbc   :  { %v8329_v22 = vpop.f32.mrf.mxu0  ;;  %v8323_v23 = vpop.f32.mrf.mxu1  ;;  %8378 = vmatprep.subr.bf16.mxu0 %v8955_v32  ;;  %8396 = vmatprep.subr.bf16.mxu1 %v8955_v32 }
0x1bbd   :  { %v8880_v23 = vld [vmem:[%s10728_s1 + $0xa68] sm:$0xff]  }
0x1bbf   :  { %8379 = vmatpush3.bf16.msra.mxu0 %v8854_v15 }
0x1bc0   :  { %8380 = vmatprep.subr.bf16.mxu0 %v8955_v32 }
0x1bc1   :  { %8373 = vmatmul.mubr.msk.bf16.vlgmr.msra.gmra.mxu1 %vm4266_vm7, %v5451_v24 }
0x1bc2   :  { %8398 = vmatprep.mubr.msk.bf16.mxu1 %vm8956_vm2, %v8955_v32 }
0x1bc3   :  { %8381 = vmatpush3.bf16.msra.mxu0 %v8855_v25  ;;  %v5912_v25 = vld [vmem:[%s10728_s1 + $0xa04] sm:$0x3] }
0x1bc4   :  { %8382 = vmatprep.subr.bf16.mxu0 %v8955_v32 }
0x1bc7   :  { %8383 = vmatpush3.bf16.msra.mxu0 %v8856_v26  ;;  %v8881_v26 = vld [vmem:[%s10728_s1 + $0xa60] sm:$0xff]  }
0x1bc8   :  { %8384 = vmatprep.subr.bf16.mxu0 %v8955_v32 }
0x1bcb   :  { %8385 = vmatpush3.bf16.msra.mxu0 %v8857_v27  ;;  %v8885_v27 = vld [vmem:[%s10728_s1 + $0xa40] sm:$0xff]  }
0x1bcc   :  { %8386 = vmatprep.subr.bf16.mxu0 %v8955_v32 }
0x1bcf   :  { %8387 = vmatpush3.bf16.msra.mxu0 %v8858_v28  ;;  %v8882_v28 = vld [vmem:[%s10728_s1 + $0xa58] sm:$0xff]  }
0x1bd0   :  { %8388 = vmatprep.subr.bf16.mxu0 %v8955_v32 }
0x1bd3   :  { %8389 = vmatpush3.bf16.msra.mxu0 %v8859_v29  ;;  %v8886_v29 = vld [vmem:[%s10728_s1 + $0xa38] sm:$0xff]  }
0x1bd4   :  { %8390 = vmatprep.subr.bf16.mxu0 %v8955_v32 }
0x1bd7   :  { %8391 = vmatpush3.bf16.msra.mxu0 %v8860_v30  ;;  %v8883_v30 = vld [vmem:[%s10728_s1 + $0xa50] sm:$0xff]  }
0x1bd8   :  { %8428 = vmatprep.subr.bf16.mxu0 %v8955_v32 }
0x1c79   :  { %v5357_v31 = vpop.f32.mrf.mxu1  ;;  %v5445_v33 = vpop.f32.mrf.mxu0 }
0x1c7a   :  { %v5446_v34 = vadd.f32 %v5445_v33, %v5357_v31  ;;  %v8887_v31 = vld [vmem:[%s10728_s1 + $0xa30] sm:$0xff]   ;;  %v8884_v33 = vld [vmem:[%s10728_s1 + $0xa48] sm:$0xff]  }
0x1c7b   :  { %v8348_v35 = vpop.f32.mrf.mxu1  ;;  %v8368_v36 = vpop.f32.mrf.mxu0 }
0x1c7c   :  { %v8889_v35 = vld [vmem:[%s10728_s1 + $0xa20] sm:$0xff]   ;;  %v8891_v36 = vld [vmem:[%s10728_s1 + $0xa10] sm:$0xff]  }
0x1c7d   :  { %v5360_v37 = vpop.f32.mrf.mxu1  ;;  %v5448_v38 = vpop.f32.mrf.mxu0 }
0x1c7e   :  { %v8892_v37 = vld [vmem:[%s10728_s1 + $0xa08] sm:$0xff]  }
0x1c7f   :  { %v8349_v39 = vpop.f32.mrf.mxu1  ;;  %v8369_v21 = vpop.f32.mrf.mxu0 }
0x1c81   :  { %v5489_v54 = vpop.f32.mrf.mxu1 }
0x1c82   :  { %v5495_v40 = vpack.c.bf16 %v5489_v54, %v5489_v54 }
0x1c83   :  { %v8374_v41 = vpop.f32.mrf.mxu1 }
0x1c84   :  { %8393 = vmatmul.mubr.bf16.vlgmr.msra.gmra.mxu0 %v5495_v40 }
0x1c85   :  { %v5492_v42 = vpop.f32.mrf.mxu1  ;;  %8444 = vmatprep.mubr.msk.bf16.mxu0 %vm8956_vm2, %v8955_v32  ;;  %8429 = vmatpush3.bf16.msra.mxu0 %v8861_v44 }
0x1c86   :  { %8430 = vmatprep.subr.bf16.mxu0 %v8955_v32 }
0x1c87   :  { %v8375_v43 = vpop.f32.mrf.mxu1 }
0x1c89   :  { %8431 = vmatpush3.bf16.msra.mxu0 %v8862_v45 }
0x1c8a   :  { %8432 = vmatprep.subr.bf16.mxu0 %v8955_v32 }
0x1c8d   :  { %8433 = vmatpush3.bf16.msra.mxu0 %v8864_v46 }
0x1c8e   :  { %8434 = vmatprep.subr.bf16.mxu0 %v8955_v32 }
0x1c91   :  { %8435 = vmatpush3.bf16.msra.mxu0 %v8866_v47 }
0x1c92   :  { %8436 = vmatprep.subr.bf16.mxu0 %v8955_v32 }
0x1c95   :  { %8437 = vmatpush3.bf16.msra.mxu0 %v8868_v48 }
0x1c96   :  { %8438 = vmatprep.subr.bf16.mxu0 %v8955_v32 }
0x1c99   :  { %8439 = vmatpush3.bf16.msra.mxu0 %v8870_v49 }
0x1c9a   :  { %8440 = vmatprep.subr.bf16.mxu0 %v8955_v32 }
0x1c9d   :  { %8441 = vmatpush3.bf16.msra.mxu0 %v8872_v50 }
0x1c9e   :  { %8442 = vmatprep.subr.bf16.mxu0 %v8955_v32 }
0x1ca1   :  { %8443 = vmatpush3.bf16.msra.mxu0 %v8874_v51 }
0x1ca2   :  { %8474 = vmatprep.subr.bf16.mxu0 %v8955_v32 }
0x1d44   :  { %v5594_v53 = vpop.f32.mrf.mxu0 }
0x1d45   :  { %v5600_v56 = vadd.f32 %v5594_v53, %v5446_v34  ;;  %v8888_v34 = vld [vmem:[%s10728_s1 + $0xa28] sm:$0xff]  }
0x1d46   :  { %v8394_v58 = vpop.f32.mrf.mxu0 }
0x1d47   :  { %v5606_v60 = vadd.f32 %v6908_v55, %v5600_v56  ;;  %v8893_v56 = vld [vmem:[%s10728_s1 + $0xac0] sm:$0xff]   ;;  %v8894_v58 = vld [vmem:[%s10728_s1 + $0xab8] sm:$0xff]  }
0x1d48   :  { %v5597_v57 = vpop.f32.mrf.mxu0 }
0x1d49   :  { %v5607_v59 = vmax.f32 %v5606_v60, 0.0  ;;  %v8895_v60 = vld [vmem:[%s10728_s1 + $0xab0] sm:$0xff]   ;;  %v8896_v57 = vld [vmem:[%s10728_s1 + $0xaa8] sm:$0xff]  }
0x1d4a   :  { %v8395_v63 = vpop.f32.mrf.mxu0 }
0x1d4b   :  { %v5608_v0 = vpack.c.bf16 %v5607_v59, %v5607_v59  ;;  %v8897_v59 = vld [vmem:[%s10728_s1 + $0xaa0] sm:$0xff]   ;;  %v8898_v63 = vld [vmem:[%s10728_s1 + $0xa98] sm:$0xff]  }
0x1d4d   :  { %v5616_v1 = vsel %vm5614_vm8, %v5608_v0, 0  ;;  %v8899_v0 = vld [vmem:[%s10728_s1 + $0xa90] sm:$0xff]  }
0x1d4e   :  { %8397 = vmatpush3.bf16.msra.mxu1 %v5616_v1 }
0x1d4f   :  { %8402 = vmatprep.subr.bf16.mxu1 %v8955_v32 }
0x1d51   :  { %8399 = vmatmul.mubr.msk.bf16.vlgmr.msra.gmra.mxu1 %vm5610_vm9, %v5609_v2  ;;  %v6936_v2 = vld [vmem:[%s10729_s2 + $0xb] ss:$0 sm:$0xff] }
0x1d52   :  { %8403 = vmatpush3.bf16.msra.mxu1 %v5616_v1  ;;  %8404 = vmatprep.mubr.msk.bf16.mxu1 %vm8956_vm2, %v8955_v32 }
0x1d53   :  { %8408 = vmatprep.subr.bf16.mxu1 %v8955_v32 }
0x1d59   :  { %8405 = vmatmul.mubr.msk.bf16.vlgmr.msra.gmra.mxu1 %vm5610_vm9, %v5675_v61 }
0x1d5a   :  { %8409 = vmatpush3.bf16.msra.mxu1 %v8863_v62  ;;  %8424 = vmatprep.mubr.msk.bf16.mxu1 %vm8956_vm2, %v8955_v32 }
0x1d5b   :  { %8410 = vmatprep.subr.bf16.mxu1 %v8955_v32 }
0x1d5e   :  { %8411 = vmatpush3.bf16.msra.mxu1 %v8865_v3 }
0x1d5f   :  { %8412 = vmatprep.subr.bf16.mxu1 %v8955_v32 }
0x1d62   :  { %8413 = vmatpush3.bf16.msra.mxu1 %v8867_v4 }
0x1d63   :  { %8414 = vmatprep.subr.bf16.mxu1 %v8955_v32 }
0x1d66   :  { %8415 = vmatpush3.bf16.msra.mxu1 %v8869_v5 }
0x1d67   :  { %8416 = vmatprep.subr.bf16.mxu1 %v8955_v32 }
0x1d6a   :  { %8417 = vmatpush3.bf16.msra.mxu1 %v8871_v6 }
0x1d6b   :  { %8418 = vmatprep.subr.bf16.mxu1 %v8955_v32 }
0x1d6e   :  { %8419 = vmatpush3.bf16.msra.mxu1 %v8873_v7 }
0x1d6f   :  { %8420 = vmatprep.subr.bf16.mxu1 %v8955_v32 }
0x1d72   :  { %8421 = vmatpush3.bf16.msra.mxu1 %v8875_v8  ;;  %v6178_v8 = vld [vmem:[%s10728_s1 + $0xb08] sm:$0x1] }
0x1d73   :  { %8422 = vmatprep.subr.bf16.mxu1 %v8955_v32 }
0x1d76   :  { %8423 = vmatpush3.bf16.msra.mxu1 %v8877_v9  ;;  %v8900_v9 = vld [vmem:[%s10728_s1 + $0xa88] sm:$0xff]  }
0x1d77   :  { %8448 = vmatprep.subr.bf16.mxu1 %v8955_v32 }
0x1e11   :  { %v5652_v10 = vpop.f32.mrf.mxu1 }
0x1e12   :  { %v5658_v12 = vpack.c.bf16 %v5652_v10, %v5652_v10  ;;  %v8901_v10 = vld [vmem:[%s10728_s1 + $0xb00] sm:$0xff]  }
0x1e13   :  { %v8400_v14 = vpop.f32.mrf.mxu1 }
0x1e14   :  { %8445 = vmatmul.mubr.bf16.vlgmr.msra.gmra.mxu0 %v5658_v12  ;;  %v8903_v12 = vld [vmem:[%s10728_s1 + $0xaf0] sm:$0xff]   ;;  %v8904_v14 = vld [vmem:[%s10728_s1 + $0xae8] sm:$0xff]  }
0x1e15   :  { %8475 = vmatpush3.bf16.msra.mxu0 %v8876_v11  ;;  %v5655_v16 = vpop.f32.mrf.mxu1  ;;  %8490 = vmatprep.mubr.msk.bf16.mxu0 %vm8956_vm2, %v8955_v32  ;;  %v8902_v11 = vld [vmem:[%s10728_s1 + $0xaf8] sm:$0xff]  }
0x1e16   :  { %8476 = vmatprep.subr.bf16.mxu0 %v8955_v32  ;;  %v8905_v16 = vld [vmem:[%s10728_s1 + $0xae0] sm:$0xff]  }
0x1e17   :  { %v8401_v18 = vpop.f32.mrf.mxu1 }
0x1e18   :  { %v8907_v18 = vld [vmem:[%s10728_s1 + $0xad0] sm:$0xff]  }
0x1e19   :  { %8477 = vmatpush3.bf16.msra.mxu0 %v8878_v17  ;;  %v5713_v20 = vpop.f32.mrf.mxu1  ;;  %v8906_v17 = vld [vmem:[%s10728_s1 + $0xad8] sm:$0xff]  }
0x1e1a   :  { %v5719_v13 = vpack.c.bf16 %v5713_v20, %v5713_v20  ;;  %8478 = vmatprep.subr.bf16.mxu0 %v8955_v32 }
0x1e1b   :  { %v8406_v15 = vpop.f32.mrf.mxu1 }
0x1e1c   :  { %8425 = vmatmul.mubr.bf16.vlgmr.msra.gmra.mxu1 %v5719_v13 }
0x1e1d   :  { %8449 = vmatpush3.bf16.msra.mxu1 %v5616_v1  ;;  %8479 = vmatpush3.bf16.msra.mxu0 %v8879_v19  ;;  %v5716_v22 = vpop.f32.mrf.mxu1 }
0x1e1e   :  { %8480 = vmatprep.subr.bf16.mxu0 %v8955_v32  ;;  %8450 = vmatprep.mubr.msk.bf16.mxu1 %vm8956_vm2, %v8955_v32 }
0x1e1f   :  { %v8407_v24 = vpop.f32.mrf.mxu1  ;;  %8454 = vmatprep.subr.bf16.mxu1 %v8955_v32 }
0x1e21   :  { %8481 = vmatpush3.bf16.msra.mxu0 %v8880_v23  ;;  %v8908_v23 = vld [vmem:[%s10728_s1 + $0xac8] sm:$0xff]  }
0x1e22   :  { %8482 = vmatprep.subr.bf16.mxu0 %v8955_v32 }
0x1e24   :  { %8451 = vmatmul.mubr.msk.bf16.vlgmr.msra.gmra.mxu1 %vm5610_vm9, %v5912_v25 }
0x1e25   :  { %8483 = vmatpush3.bf16.msra.mxu0 %v8881_v26  ;;  %8455 = vmatpush3.bf16.msra.mxu1 %v8885_v27 }
0x1e26   :  { %8484 = vmatprep.subr.bf16.mxu0 %v8955_v32  ;;  %8456 = vmatprep.subr.bf16.mxu1 %v8955_v32 }
0x1e27   :  { %8470 = vmatprep.mubr.msk.bf16.mxu1 %vm8956_vm2, %v8955_v32 }
0x1e29   :  { %8485 = vmatpush3.bf16.msra.mxu0 %v8882_v28  ;;  %8457 = vmatpush3.bf16.msra.mxu1 %v8886_v29 }
0x1e2a   :  { %8486 = vmatprep.subr.bf16.mxu0 %v8955_v32  ;;  %8458 = vmatprep.subr.bf16.mxu1 %v8955_v32 }
0x1e2d   :  { %8487 = vmatpush3.bf16.msra.mxu0 %v8883_v30  ;;  %8459 = vmatpush3.bf16.msra.mxu1 %v8887_v31 }
0x1e2e   :  { %8488 = vmatprep.subr.bf16.mxu0 %v8955_v32  ;;  %8460 = vmatprep.subr.bf16.mxu1 %v8955_v32 }
0x1e31   :  { %8489 = vmatpush3.bf16.msra.mxu0 %v8884_v33  ;;  %8461 = vmatpush3.bf16.msra.mxu1 %v8888_v34 }
0x1e32   :  { %8500 = vmatprep.subr.bf16.mxu0 %v8955_v32  ;;  %8462 = vmatprep.subr.bf16.mxu1 %v8955_v32 }
0x1e34   :  { %8491 = vmatmul.mubr.bf16.vlgmr.msra.gmra.mxu0 %v10413_v52  ;;  %v8890_v52 = vld [vmem:[%s10728_s1 + $0xa18] sm:$0xff]  }
0x1e35   :  { %8516 = vmatprep.mubr.msk.bf16.mxu0 %vm8956_vm2, %v8955_v32  ;;  %8463 = vmatpush3.bf16.msra.mxu1 %v8889_v35 }
0x1e36   :  { %8464 = vmatprep.subr.bf16.mxu1 %v8955_v32  ;;  %8501 = vmatpush3.bf16.msra.mxu0 %v8893_v56 }
0x1e37   :  { %8502 = vmatprep.subr.bf16.mxu0 %v8955_v32 }
0x1e39   :  { %8465 = vmatpush3.bf16.msra.mxu1 %v8890_v52 }
0x1e3a   :  { %8466 = vmatprep.subr.bf16.mxu1 %v8955_v32  ;;  %8503 = vmatpush3.bf16.msra.mxu0 %v8894_v58 }
0x1e3b   :  { %8504 = vmatprep.subr.bf16.mxu0 %v8955_v32 }
0x1e3d   :  { %8467 = vmatpush3.bf16.msra.mxu1 %v8891_v36 }
0x1e3e   :  { %8468 = vmatprep.subr.bf16.mxu1 %v8955_v32  ;;  %8505 = vmatpush3.bf16.msra.mxu0 %v8895_v60 }
0x1e3f   :  { %8506 = vmatprep.subr.bf16.mxu0 %v8955_v32 }
0x1e41   :  { %8469 = vmatpush3.bf16.msra.mxu1 %v8892_v37 }
0x1e42   :  { %8494 = vmatprep.subr.bf16.mxu1 %v8955_v32  ;;  %8507 = vmatpush3.bf16.msra.mxu0 %v8896_v57 }
0x1e43   :  { %8508 = vmatprep.subr.bf16.mxu0 %v8955_v32 }
0x1e46   :  { %8509 = vmatpush3.bf16.msra.mxu0 %v8897_v59 }
0x1e47   :  { %8510 = vmatprep.subr.bf16.mxu0 %v8955_v32 }
0x1e4a   :  { %8511 = vmatpush3.bf16.msra.mxu0 %v8898_v63 }
0x1e4b   :  { %8512 = vmatprep.subr.bf16.mxu0 %v8955_v32 }
0x1e4e   :  { %8513 = vmatpush3.bf16.msra.mxu0 %v8899_v0 }
0x1e4f   :  { %8514 = vmatprep.subr.bf16.mxu0 %v8955_v32 }
0x1e52   :  { %8515 = vmatpush3.bf16.msra.mxu0 %v8900_v9 }
0x1e53   :  { %8540 = vmatprep.subr.bf16.mxu0 %v8955_v32 }
0x1ed4   :  { %v5906_v38 = vpop.f32.mrf.mxu0 }
0x1ed6   :  { %v8446_v39 = vpop.f32.mrf.mxu0 }
0x1ed8   :  { %v5909_v21 = vpop.f32.mrf.mxu0 }
0x1ed9   :  { %v6442_v21 = vld [vmem:[%s10728_s1 + $0xb0c] sm:$0x3] }
0x1eda   :  { %v8447_v54 = vpop.f32.mrf.mxu0 }
0x1edc   :  { %v5818_v40 = vpop.f32.mrf.mxu1 }
0x1edd   :  { %v5907_v41 = vadd.f32 %v5906_v38, %v5818_v40 }
0x1ede   :  { %v8426_v42 = vpop.f32.mrf.mxu1 }
0x1ee0   :  { %v5821_v43 = vpop.f32.mrf.mxu1 }
0x1ee2   :  { %v8427_v44 = vpop.f32.mrf.mxu1 }
0x1ee4   :  { %v5950_v45 = vpop.f32.mrf.mxu1 }
0x1ee5   :  { %v5956_v46 = vpack.c.bf16 %v5950_v45, %v5950_v45 }
0x1ee6   :  { %v8452_v47 = vpop.f32.mrf.mxu1 }
0x1ee7   :  { %8471 = vmatmul.mubr.bf16.vlgmr.msra.gmra.mxu1 %v5956_v46 }
0x1ee8   :  { %v5953_v48 = vpop.f32.mrf.mxu1  ;;  %8496 = vmatprep.mubr.msk.bf16.mxu1 %vm8956_vm2, %v8955_v32 }
0x1eea   :  { %v8453_v49 = vpop.f32.mrf.mxu1 }
0x1eeb   :  { %v6494_v49 = vld [vmem:[%s10728_s1 + $0xb10] sm:$0x1] }
0x1ef4   :  { %v10624_v50 = vpop.f32.mrf.mxu0 }
0x1ef6   :  { %v8492_v51 = vpop.f32.mrf.mxu0 }
0x1ef8   :  { %v6174_v53 = vpop.f32.mrf.mxu0 }
0x1efa   :  { %v8493_v55 = vpop.f32.mrf.mxu0 }
0x1fa7   :  { %v6055_v1 = vpop.f32.mrf.mxu1 }
0x1fa8   :  { %v6061_v61 = vadd.f32 %v6055_v1, %v5907_v41 }
0x1fa9   :  { %v8472_v62 = vpop.f32.mrf.mxu1 }
0x1faa   :  { %v10657_v3 = vadd.f32 %v6936_v2, %v6061_v61 }
0x1fab   :  { %v6058_v4 = vpop.f32.mrf.mxu1 }
0x1fac   :  { %v6177_v5 = vpack.c.bf16 %v10657_v3, %v10657_v3 }
0x1fad   :  { %v8473_v6 = vpop.f32.mrf.mxu1 }
0x1fae   :  { %v6183_v7 = vsel %vm5614_vm8, %v6177_v5, 0 }
0x1faf   :  { %8495 = vmatpush3.bf16.msra.mxu1 %v6183_v7 }
0x1fb0   :  { %8520 = vmatprep.subr.bf16.mxu1 %v8955_v32 }
0x1fb2   :  { %8497 = vmatmul.mubr.msk.bf16.vlgmr.msra.gmra.mxu1 %vm5610_vm9, %v6178_v8 }
0x1fb3   :  { %8536 = vmatprep.mubr.msk.bf16.mxu1 %vm8956_vm2, %v8955_v32  ;;  %8521 = vmatpush3.bf16.msra.mxu1 %v8901_v10 }
0x1fb4   :  { %8522 = vmatprep.subr.bf16.mxu1 %v8955_v32 }
0x1fb7   :  { %8523 = vmatpush3.bf16.msra.mxu1 %v8902_v11 }
0x1fb8   :  { %8524 = vmatprep.subr.bf16.mxu1 %v8955_v32 }
0x1fbb   :  { %8525 = vmatpush3.bf16.msra.mxu1 %v8903_v12 }
0x1fbc   :  { %8526 = vmatprep.subr.bf16.mxu1 %v8955_v32 }
0x1fbf   :  { %8527 = vmatpush3.bf16.msra.mxu1 %v8904_v14 }
0x1fc0   :  { %8528 = vmatprep.subr.bf16.mxu1 %v8955_v32 }
0x1fc3   :  { %8529 = vmatpush3.bf16.msra.mxu1 %v8905_v16 }
0x1fc4   :  { %8530 = vmatprep.subr.bf16.mxu1 %v8955_v32 }
0x1fc7   :  { %8531 = vmatpush3.bf16.msra.mxu1 %v8906_v17 }
0x1fc8   :  { %8532 = vmatprep.subr.bf16.mxu1 %v8955_v32 }
0x1fcb   :  { %8533 = vmatpush3.bf16.msra.mxu1 %v8907_v18 }
0x1fcc   :  { %8534 = vmatprep.subr.bf16.mxu1 %v8955_v32 }
0x1fcf   :  { %8535 = vmatpush3.bf16.msra.mxu1 %v8908_v23 }
0x1fd0   :  { %8546 = vmatprep.subr.bf16.mxu1 %v8955_v32 }
0x2072   :  { %v6219_v20 = vpop.f32.mrf.mxu1 }
0x2073   :  { %v6225_v19 = vpack.c.bf16 %v6219_v20, %v6219_v20 }
0x2074   :  { %v8498_v13 = vpop.f32.mrf.mxu1 }
0x2075   :  { %8517 = vmatmul.mubr.bf16.vlgmr.msra.gmra.mxu0 %v6225_v19 }
0x2076   :  { %v6222_v15 = vpop.f32.mrf.mxu1  ;;  %8542 = vmatprep.mubr.msk.bf16.mxu0 %vm8956_vm2, %v8955_v32 }
0x2078   :  { %v8499_v22 = vpop.f32.mrf.mxu1 }
0x2135   :  { %v6324_v24 = vpop.f32.mrf.mxu0 }
0x2136   :  { %v6330_v25 = vmax.f32 %v6324_v24, 0.0 }
0x2137   :  { %v8518_v26 = vpop.f32.mrf.mxu0 }
0x2138   :  { %v6331_v27 = vpack.c.bf16 %v6330_v25, %v6330_v25 }
0x2139   :  { %v6327_v28 = vpop.f32.mrf.mxu0 }
0x213a   :  { %8537 = vmatmul.mubr.bf16.vlgmr.msra.gmra.mxu1 %v6331_v27 }
0x213b   :  { %v8519_v29 = vpop.f32.mrf.mxu0  ;;  %8548 = vmatprep.mubr.msk.bf16.mxu1 %vm8956_vm2, %v8955_v32  ;;  %v6937_v32 = vld [vmem:[%s10729_s2 + $0xc] ss:$0 sm:$0xff]  ;;  %s8957_s2 = smov [#allocation2]  }
0x213c   :  { %v6172_v40 = vadd.f32 %v6937_v32, %v10624_v50  ;;  %s6548_s17 = sshll.u32 %s8957_s2, 4  ;;  %s6549_s17 = int_to_ptr.vmem [resolvable:$true] %s6548_s17 }
0x213d   :  { %s8933_s18 = scalar_lea.vmem %s6549_s17, 32  ;;  %p8938_p1 = scmp.lt.s32.totalorder %s6549_s17, %s6549_s17 }
0x213e   :  { %p8934_p0 = scmp.ne.s32.totalorder %s6549_s17, %s8933_s18  ;;  %p8939_p2 = scmp.lt.s32.totalorder %s8933_s18, %s8933_s18 }
0x2140   :  { %p8940_p3 = por %p8939_p2, %p8938_p1 }
0x2142   :  { %p8941_p4 = pnand %p8940_p3, %p8934_p0 }
0x21fa   :  { %v6430_v30 = vpop.f32.mrf.mxu1 }
0x21fb   :  { %v6963_v31 = vmul.f32 -1.442695, %v6430_v30 }
0x21fc   :  { %v8538_v33 = vpop.f32.mrf.mxu1 }
0x21fd   :  { %8921 = vpow2.f32 %v6963_v31 }
0x21fe   :  { %v6433_v34 = vpop.f32.mrf.mxu1 }
0x2200   :  { %v8539_v35 = vpop.f32.mrf.mxu1 }
0x220a   :  { %v8922_v52 = vpop.eup %8921 }
0x220b   :  { %v6439_v36 = vadd.f32 1.0, %v8922_v52 }
0x220d   :  { %8923 = vrcp.f32 %v6439_v36 }
0x221a   :  { %v8924_v37 = vpop.eup %8923 }
0x221b   :  { %v6443_v38 = vpack.c.bf16 %v8924_v37, %v8924_v37 }
0x221d   :  { %v6448_v39 = vsel %vm2344_vm4, %v6443_v38, 0 }
0x221e   :  { %8541 = vmatpush3.bf16.msra.mxu0 %v6448_v39 }
0x2221   :  { %8543 = vmatmul.mubr.msk.bf16.vlgmr.msra.gmra.mxu0 %vm2337_vm3, %v6442_v21 }
0x22e1   :  { %v6484_v54 = vpop.f32.mrf.mxu0 }
0x22e2   :  { %v6490_v41 = vmul.f32 %v6484_v54, %v10657_v3 }
0x22e3   :  { %v8544_v42 = vpop.f32.mrf.mxu0 }
0x22e4   :  { %v6491_v43 = vadd.f32 %v6490_v41, %v6172_v40 }
0x22e5   :  { %v6487_v44 = vpop.f32.mrf.mxu0 }
0x22e6   :  { %v6492_v45 = vmax.f32 %v6491_v43, 0.0 }
0x22e7   :  { %v8545_v46 = vpop.f32.mrf.mxu0 }
0x22e8   :  { %v6493_v47 = vpack.c.bf16 %v6492_v45, %v6492_v45 }
0x22ea   :  { %v6499_v48 = vsel %vm5614_vm8, %v6493_v47, 0 }
0x22eb   :  { %8547 = vmatpush3.bf16.msra.mxu1 %v6499_v48 }
0x22ee   :  { %8549 = vmatmul.mubr.msk.bf16.vlgmr.msra.gmra.mxu1 %vm5610_vm9, %v6494_v49 }
0x23ae   :  { %v6535_v50 = vpop.f32.mrf.mxu1 }
0x23af   :  { %6541 = vst [vmem:[#allocation2] sm:$0x3] %v6535_v50 }
0x23b0   :  { %v8550_v51 = vpop.f32.mrf.mxu1 }
0x23b1   :  { %8944 = shalt.err (!%p8941_p4)
}
0x23b2   :  { %6551 = dma.vmem_to_hbm [thread:$0]  %s6549_s17, 32, %s10730_s3, [#allocation3]   ;;  %v6538_v53 = vpop.f32.mrf.mxu1 }
0x23b4   :  { %v8551_v55 = vpop.f32.mrf.mxu1 }
0x23b5   :  { %8953 = dma.done.wait [#allocation3], 32  }
0x23b6   :  { %8954 = vsyncadd [#allocation3], 4294967264 }
0x23b7   :  { %6555 = vsyncpa [#allocation3], 1 }

</bundles_post_ra>
